<compile_context>
chip_gen: v7x
topology: tpu7x:2x2x1
jax: 0.10.0
libtpu: 0.0.40
codegen_flags: <defaults>
</compile_context>

<pallas_src>
import functools
import math

import jax
import jax.numpy as jnp
from jax import lax
from jax.experimental import pallas as pl
from jax.experimental.pallas import tpu as pltpu


def _round_up(x: int, m: int) -> int:
    return ((x + m - 1) // m) * m


def _iou_edge_kernel(srcr_ref, dstr_ref, srcc_ref, dstc_ref, grpc_ref,
                     out_ref, nbef_acc, g0_acc, g1_acc, *, TR, TC):
    i = pl.program_id(0)          # row tile of the combined edge list (parallel)
    j = pl.program_id(1)          # column tile (sequential reduction axis)

    @pl.when(j == 0)
    def _init():
        nbef_acc[...] = jnp.zeros_like(nbef_acc)
        g0_acc[...] = jnp.zeros_like(g0_acc)
        g1_acc[...] = jnp.zeros_like(g1_acc)

    src_r = srcr_ref[...]                       # (TR, 1) int32
    dst_r = dstr_ref[...]                       # (TR, 1) int32
    src_c = srcc_ref[...]                       # (1, TC) int32
    dst_c = dstc_ref[...]                       # (1, TC) int32
    grp_c = grpc_ref[...]                       # (1, TC) int32

    # Pairwise edge-key match: same source AND same destination.
    match = jnp.logical_and(src_r == src_c, dst_r == dst_c)
    matchf = match.astype(jnp.float32)          # (TR, TC), exact 0/1

    # Global positions for the strict "earlier occurrence" mask.
    row_idx = i * TR + lax.broadcasted_iota(jnp.int32, (TR, 1), 0)
    col_idx = j * TC + lax.broadcasted_iota(jnp.int32, (1, TC), 1)
    before = (col_idx < row_idx).astype(jnp.float32)          # (TR, TC)

    is_g0 = (grp_c == 0).astype(jnp.float32)                  # (1, TC)

    tot = jnp.sum(matchf, axis=1, keepdims=True)              # (TR, 1)
    g0s = jnp.sum(matchf * is_g0, axis=1, keepdims=True)      # (TR, 1)
    nbef_acc[...] += jnp.sum(matchf * before, axis=1, keepdims=True)
    g0_acc[...] += g0s
    # Valid rows only ever match real edges (group 0 or 1), so g1 = tot - g0.
    # Padded rows get garbage here but are masked by `valid` at finalize.
    g1_acc[...] += tot - g0s

    @pl.when(j == pl.num_programs(1) - 1)
    def _finalize():
        valid = (src_r >= 0).astype(jnp.float32)              # (TR, 1)
        first = (nbef_acc[...] == 0.0).astype(jnp.float32)    # first occurrence
        both = jnp.logical_and(g0_acc[...] > 0.0,
                               g1_acc[...] > 0.0).astype(jnp.float32)
        union_rows = valid * first
        inter_rows = union_rows * both
        union_p = jnp.sum(union_rows)
        inter_p = jnp.sum(inter_rows)
        # Lane-dense (8, 128) partial-sum block: sublane 0 = intersection,
        # sublane 1 = union.  Final reduce + divide happen in the wrapper so
        # the row-tile axis stays megacore-parallel (v7x).
        sub = lax.broadcasted_iota(jnp.int32, (8, 128), 0)
        out_ref[...] = jnp.where(sub == 0, inter_p,
                                 jnp.where(sub == 1, union_p, 0.0))


def _tiles_and_vmem(E: int):
    """Pick (TR, TC, vmem_limit_bytes) from a per-generation VMEM budget."""
    TR = 256                                    # sublane tile (256-multiple)
    try:
        vmem_cap = int(pltpu.get_tpu_info().vmem_capacity_bytes)
    except Exception:
        vmem_cap = 64 * 1024 * 1024             # conservative (v7x physical)
    vmem_limit = int(min(max(vmem_cap // 2, 16 * 1024 * 1024),
                         64 * 1024 * 1024))
    # ~8 live f32 (TR, TC) intermediates dominate the per-step footprint;
    # keep them within a quarter of the scoped limit (inputs, scratch, output
    # and double-buffering take the rest).
    tc_cap = ((vmem_limit // 4) // (8 * TR * 4)) // 256 * 256
    tc_cap = max(512, tc_cap)
    TC = int(min(tc_cap, 4096, _round_up(max(E, 1), 256)))   # multiple of TR
    return TR, TC, vmem_limit


def iou_loss(edges1, edges2, num_nodes: int):
    """edges1, edges2: int arrays of shape (2, E). Returns a float32 scalar.

    num_nodes only sizes the adjacency in the PyTorch module; the IoU depends
    solely on the (src, dst) pair sets, so it does not enter the kernel
    (edge indices are assumed to lie in [0, num_nodes))."""
    del num_nodes
    e1 = jnp.asarray(edges1, jnp.int32)
    e2 = jnp.asarray(edges2, jnp.int32)
    E1, E2 = int(e1.shape[1]), int(e2.shape[1])
    E = E1 + E2

    TR, TC, vmem_limit = _tiles_and_vmem(E)
    EP = _round_up(max(E, 1), TC)               # TC is a multiple of TR
    G, NC = EP // TR, EP // TC
    pad = EP - E

    src = jnp.pad(jnp.concatenate([e1[0], e2[0]]), (0, pad), constant_values=-1)
    dst = jnp.pad(jnp.concatenate([e1[1], e2[1]]), (0, pad), constant_values=-1)
    grp = jnp.pad(jnp.concatenate([jnp.zeros((E1,), jnp.int32),
                                   jnp.ones((E2,), jnp.int32)]),
                  (0, pad), constant_values=-1)

    kernel = functools.partial(_iou_edge_kernel, TR=TR, TC=TC)
    out = pl.pallas_call(
        kernel,
        out_shape=jax.ShapeDtypeStruct((G * 8, 128), jnp.float32),
        grid=(G, NC),
        in_specs=[
            pl.BlockSpec((TR, 1), lambda i, j: (i, 0)),   # src, row view
            pl.BlockSpec((TR, 1), lambda i, j: (i, 0)),   # dst, row view
            pl.BlockSpec((1, TC), lambda i, j: (0, j)),   # src, column view
            pl.BlockSpec((1, TC), lambda i, j: (0, j)),   # dst, column view
            pl.BlockSpec((1, TC), lambda i, j: (0, j)),   # group, column view
        ],
        out_specs=pl.BlockSpec((8, 128), lambda i, j: (i, 0)),
        scratch_shapes=[
            pltpu.VMEM((TR, 1), jnp.float32),   # matches at earlier positions
            pltpu.VMEM((TR, 1), jnp.float32),   # matches in group 0 (edges1)
            pltpu.VMEM((TR, 1), jnp.float32),   # matches in group 1 (edges2)
        ],
        compiler_params=pltpu.CompilerParams(
            dimension_semantics=("parallel", "arbitrary"),
            vmem_limit_bytes=vmem_limit),
    )(src.reshape(EP, 1), dst.reshape(EP, 1),
      src.reshape(1, EP), dst.reshape(1, EP), grp.reshape(1, EP))

    o = out.reshape(G, 8, 128)
    inter = o[:, 0, 0].sum()
    union = o[:, 1, 0].sum()
    # NOTE: both edge lists empty -> 0/0 = NaN, matching the PyTorch module.
    return inter / union


def _iou_loss_ref(edges1, edges2, num_nodes):
    """Pure-JAX reference matching the PyTorch module."""
    def edges_to_adj(edges):
        adj = jnp.zeros((num_nodes, num_nodes), jnp.float32)
        return adj.at[edges[0], edges[1]].set(1.0)

    adj1 = edges_to_adj(edges1)
    adj2 = edges_to_adj(edges2)
    return jnp.minimum(adj1, adj2).sum() / jnp.maximum(adj1, adj2).sum()


if __name__ == "__main__":
    # IoULoss has no learnable parameters, so nothing to initialize.
    num_nodes = 16
    num_edges = 8

    key = jax.random.PRNGKey(0)
    k1, k2 = jax.random.split(key)
    edges1 = jax.random.randint(k1, (2, num_edges), 0, num_nodes, dtype=jnp.int32)
    # Duplicate an edge (exercises PyTorch's duplicate index assignment /
    # dedup) and share a few edges across graphs (non-trivial intersection).
    edges1 = edges1.at[:, -1].set(edges1[:, 0])
    extra = jax.random.randint(k2, (2, num_edges - 4), 0, num_nodes,
                               dtype=jnp.int32)
    edges2 = jnp.concatenate([edges1[:, :4], extra], axis=1)

    out = jax.block_until_ready(iou_loss(edges1, edges2, num_nodes))
    ref = jax.block_until_ready(_iou_loss_ref(edges1, edges2, num_nodes))
    assert jnp.allclose(out, ref, atol=1e-6), (out, ref)

    print("KERNEL_OK")
</pallas_src>

<mosaic_0001>
module attributes {stable_mosaic.version = 11 : i64} {
  func.func @_iou_edge_kernel(%arg0: i32, %arg1: i32, %arg2: memref<256x1xi32, #tpu.memory_space<vmem>>, %arg3: memref<256x1xi32, #tpu.memory_space<vmem>>, %arg4: memref<1x256xi32, #tpu.memory_space<vmem>>, %arg5: memref<1x256xi32, #tpu.memory_space<vmem>>, %arg6: memref<1x256xi32, #tpu.memory_space<vmem>>, %arg7: memref<8x128xf32, #tpu.memory_space<vmem>>, %arg8: memref<256x1xf32, #tpu.memory_space<vmem>>, %arg9: memref<256x1xf32, #tpu.memory_space<vmem>>, %arg10: memref<256x1xf32, #tpu.memory_space<vmem>>) attributes {dimension_semantics = [#tpu.dimension_semantics<parallel>, #tpu.dimension_semantics<arbitrary>], iteration_bounds = array<i64: 1, 1>, scalar_prefetch = 0 : i64, scratch_operands = 3 : i64, tpu.core_type = #tpu.core_type<tc>, window_params = [{transform_indices = @transform_0, window_bounds = array<i64: 256, 1>}, {transform_indices = @transform_1, window_bounds = array<i64: 256, 1>}, {transform_indices = @transform_2, window_bounds = array<i64: 1, 256>}, {transform_indices = @transform_3, window_bounds = array<i64: 1, 256>}, {transform_indices = @transform_4, window_bounds = array<i64: 1, 256>}, {transform_indices = @transform_5, window_bounds = array<i64: 8, 128>}]} {
    %c0_i32 = arith.constant 0 : i32
    %0 = arith.cmpi eq, %arg1, %c0_i32 : i32
    %1 = arith.extui %0 : i1 to i32
    %c0_i32_0 = arith.constant 0 : i32
    %2 = arith.cmpi ne, %1, %c0_i32_0 : i32
    scf.if %2 {
      %cst_28 = arith.constant 0.000000e+00 : f32
      %56 = vector.broadcast %cst_28 : f32 to vector<256x1xf32>
      %c0_29 = arith.constant 0 : index
      %c0_30 = arith.constant 0 : index
      %57 = vector.load %arg8[%c0_29, %c0_30] : memref<256x1xf32, #tpu.memory_space<vmem>>, vector<256x1xf32>
      tpu.vector_store %arg8[%c0_29, %c0_30], %56 {strides = array<i32>} : memref<256x1xf32, #tpu.memory_space<vmem>>, vector<256x1xf32>,
      %cst_31 = arith.constant 0.000000e+00 : f32
      %58 = vector.broadcast %cst_31 : f32 to vector<256x1xf32>
      %c0_32 = arith.constant 0 : index
      %c0_33 = arith.constant 0 : index
      %59 = vector.load %arg9[%c0_32, %c0_33] : memref<256x1xf32, #tpu.memory_space<vmem>>, vector<256x1xf32>
      tpu.vector_store %arg9[%c0_32, %c0_33], %58 {strides = array<i32>} : memref<256x1xf32, #tpu.memory_space<vmem>>, vector<256x1xf32>,
      %cst_34 = arith.constant 0.000000e+00 : f32
      %60 = vector.broadcast %cst_34 : f32 to vector<256x1xf32>
      %c0_35 = arith.constant 0 : index
      %c0_36 = arith.constant 0 : index
      %61 = vector.load %arg10[%c0_35, %c0_36] : memref<256x1xf32, #tpu.memory_space<vmem>>, vector<256x1xf32>
      tpu.vector_store %arg10[%c0_35, %c0_36], %60 {strides = array<i32>} : memref<256x1xf32, #tpu.memory_space<vmem>>, vector<256x1xf32>,
    } else {
    }
    %c0 = arith.constant 0 : index
    %c0_1 = arith.constant 0 : index
    %3 = vector.load %arg2[%c0, %c0_1] : memref<256x1xi32, #tpu.memory_space<vmem>>, vector<256x1xi32>
    %c0_2 = arith.constant 0 : index
    %c0_3 = arith.constant 0 : index
    %4 = vector.load %arg3[%c0_2, %c0_3] : memref<256x1xi32, #tpu.memory_space<vmem>>, vector<256x1xi32>
    %c0_4 = arith.constant 0 : index
    %c0_5 = arith.constant 0 : index
    %5 = vector.load %arg4[%c0_4, %c0_5] : memref<1x256xi32, #tpu.memory_space<vmem>>, vector<1x256xi32>
    %c0_6 = arith.constant 0 : index
    %c0_7 = arith.constant 0 : index
    %6 = vector.load %arg5[%c0_6, %c0_7] : memref<1x256xi32, #tpu.memory_space<vmem>>, vector<1x256xi32>
    %c0_8 = arith.constant 0 : index
    %c0_9 = arith.constant 0 : index
    %7 = vector.load %arg6[%c0_8, %c0_9] : memref<1x256xi32, #tpu.memory_space<vmem>>, vector<1x256xi32>
    %8 = vector.broadcast %3 : vector<256x1xi32> to vector<256x256xi32>
    %9 = vector.broadcast %5 : vector<1x256xi32> to vector<256x256xi32>
    %10 = arith.cmpi eq, %8, %9 : vector<256x256xi32>
    %11 = vector.broadcast %4 : vector<256x1xi32> to vector<256x256xi32>
    %12 = vector.broadcast %6 : vector<1x256xi32> to vector<256x256xi32>
    %13 = arith.cmpi eq, %11, %12 : vector<256x256xi32>
    %14 = arith.andi %10, %13 : vector<256x256xi1>
    %15 = arith.extui %14 : vector<256x256xi1> to vector<256x256xi32>
    %16 = arith.sitofp %15 : vector<256x256xi32> to vector<256x256xf32>
    %c256_i32 = arith.constant 256 : i32
    %17 = arith.muli %arg0, %c256_i32 : i32
    %18 = tpu.iota {dimensions = array<i32: 0>} : vector<256x1xi32>
    %19 = vector.broadcast %17 : i32 to vector<256x1xi32>
    %20 = arith.addi %19, %18 : vector<256x1xi32>
    %c256_i32_10 = arith.constant 256 : i32
    %21 = arith.muli %arg1, %c256_i32_10 : i32
    %22 = tpu.iota {dimensions = array<i32: 1>} : vector<1x256xi32>
    %23 = vector.broadcast %21 : i32 to vector<1x256xi32>
    %24 = arith.addi %23, %22 : vector<1x256xi32>
    %25 = vector.broadcast %24 : vector<1x256xi32> to vector<256x256xi32>
    %26 = vector.broadcast %20 : vector<256x1xi32> to vector<256x256xi32>
    %27 = arith.cmpi slt, %25, %26 : vector<256x256xi32>
    %28 = arith.extui %27 : vector<256x256xi1> to vector<256x256xi32>
    %29 = arith.sitofp %28 : vector<256x256xi32> to vector<256x256xf32>
    %c0_i32_11 = arith.constant 0 : i32
    %30 = vector.broadcast %c0_i32_11 : i32 to vector<1x256xi32>
    %31 = arith.cmpi eq, %7, %30 : vector<1x256xi32>
    %32 = arith.extui %31 : vector<1x256xi1> to vector<1x256xi32>
    %33 = arith.sitofp %32 : vector<1x256xi32> to vector<1x256xf32>
    %cst = arith.constant dense<0.000000e+00> : vector<256xf32>
    %34 = vector.multi_reduction <add>, %16, %cst [1] : vector<256x256xf32> to vector<256xf32>
    %35 = vector.shape_cast %34 : vector<256xf32> to vector<256x1xf32>
    %36 = vector.broadcast %33 : vector<1x256xf32> to vector<256x256xf32>
    %37 = arith.mulf %16, %36 : vector<256x256xf32>
    %cst_12 = arith.constant dense<0.000000e+00> : vector<256xf32>
    %38 = vector.multi_reduction <add>, %37, %cst_12 [1] : vector<256x256xf32> to vector<256xf32>
    %39 = vector.shape_cast %38 : vector<256xf32> to vector<256x1xf32>
    %c0_13 = arith.constant 0 : index
    %c0_14 = arith.constant 0 : index
    %40 = vector.load %arg8[%c0_13, %c0_14] : memref<256x1xf32, #tpu.memory_space<vmem>>, vector<256x1xf32>
    %41 = arith.mulf %16, %29 : vector<256x256xf32>
    %cst_15 = arith.constant dense<0.000000e+00> : vector<256xf32>
    %42 = vector.multi_reduction <add>, %41, %cst_15 [1] : vector<256x256xf32> to vector<256xf32>
    %43 = vector.shape_cast %42 : vector<256xf32> to vector<256x1xf32>
    %44 = arith.addf %40, %43 : vector<256x1xf32>
    %c0_16 = arith.constant 0 : index
    %c0_17 = arith.constant 0 : index
    %45 = vector.load %arg8[%c0_16, %c0_17] : memref<256x1xf32, #tpu.memory_space<vmem>>, vector<256x1xf32>
    tpu.vector_store %arg8[%c0_16, %c0_17], %44 {strides = array<i32>} : memref<256x1xf32, #tpu.memory_space<vmem>>, vector<256x1xf32>,
    %c0_18 = arith.constant 0 : index
    %c0_19 = arith.constant 0 : index
    %46 = vector.load %arg9[%c0_18, %c0_19] : memref<256x1xf32, #tpu.memory_space<vmem>>, vector<256x1xf32>
    %47 = arith.addf %46, %39 : vector<256x1xf32>
    %c0_20 = arith.constant 0 : index
    %c0_21 = arith.constant 0 : index
    %48 = vector.load %arg9[%c0_20, %c0_21] : memref<256x1xf32, #tpu.memory_space<vmem>>, vector<256x1xf32>
    tpu.vector_store %arg9[%c0_20, %c0_21], %47 {strides = array<i32>} : memref<256x1xf32, #tpu.memory_space<vmem>>, vector<256x1xf32>,
    %c0_22 = arith.constant 0 : index
    %c0_23 = arith.constant 0 : index
    %49 = vector.load %arg10[%c0_22, %c0_23] : memref<256x1xf32, #tpu.memory_space<vmem>>, vector<256x1xf32>
    %50 = arith.subf %35, %39 : vector<256x1xf32>
    %51 = arith.addf %49, %50 : vector<256x1xf32>
    %c0_24 = arith.constant 0 : index
    %c0_25 = arith.constant 0 : index
    %52 = vector.load %arg10[%c0_24, %c0_25] : memref<256x1xf32, #tpu.memory_space<vmem>>, vector<256x1xf32>
    tpu.vector_store %arg10[%c0_24, %c0_25], %51 {strides = array<i32>} : memref<256x1xf32, #tpu.memory_space<vmem>>, vector<256x1xf32>,
    %c0_i32_26 = arith.constant 0 : i32
    %53 = arith.cmpi eq, %arg1, %c0_i32_26 : i32
    %54 = arith.extui %53 : i1 to i32
    %c0_i32_27 = arith.constant 0 : i32
    %55 = arith.cmpi ne, %54, %c0_i32_27 : i32
    scf.if %55 {
      %c0_i32_28 = arith.constant 0 : i32
      %56 = vector.broadcast %c0_i32_28 : i32 to vector<256x1xi32>
      %57 = arith.cmpi sge, %3, %56 : vector<256x1xi32>
      %58 = arith.extui %57 : vector<256x1xi1> to vector<256x1xi32>
      %59 = arith.sitofp %58 : vector<256x1xi32> to vector<256x1xf32>
      %c0_29 = arith.constant 0 : index
      %c0_30 = arith.constant 0 : index
      %60 = vector.load %arg8[%c0_29, %c0_30] : memref<256x1xf32, #tpu.memory_space<vmem>>, vector<256x1xf32>
      %cst_31 = arith.constant 0.000000e+00 : f32
      %61 = vector.broadcast %cst_31 : f32 to vector<256x1xf32>
      %62 = arith.cmpf oeq, %60, %61 : vector<256x1xf32>
      %63 = arith.extui %62 : vector<256x1xi1> to vector<256x1xi32>
      %64 = arith.sitofp %63 : vector<256x1xi32> to vector<256x1xf32>
      %c0_32 = arith.constant 0 : index
      %c0_33 = arith.constant 0 : index
      %65 = vector.load %arg9[%c0_32, %c0_33] : memref<256x1xf32, #tpu.memory_space<vmem>>, vector<256x1xf32>
      %cst_34 = arith.constant 0.000000e+00 : f32
      %66 = vector.broadcast %cst_34 : f32 to vector<256x1xf32>
      %67 = arith.cmpf ogt, %65, %66 : vector<256x1xf32>
      %c0_35 = arith.constant 0 : index
      %c0_36 = arith.constant 0 : index
      %68 = vector.load %arg10[%c0_35, %c0_36] : memref<256x1xf32, #tpu.memory_space<vmem>>, vector<256x1xf32>
      %cst_37 = arith.constant 0.000000e+00 : f32
      %69 = vector.broadcast %cst_37 : f32 to vector<256x1xf32>
      %70 = arith.cmpf ogt, %68, %69 : vector<256x1xf32>
      %71 = arith.andi %67, %70 : vector<256x1xi1>
      %72 = arith.extui %71 : vector<256x1xi1> to vector<256x1xi32>
      %73 = arith.sitofp %72 : vector<256x1xi32> to vector<256x1xf32>
      %74 = arith.mulf %59, %64 : vector<256x1xf32>
      %75 = arith.mulf %74, %73 : vector<256x1xf32>
      %76 = vector.shape_cast %74 : vector<256x1xf32> to vector<1x256x1xf32>
      %cst_38 = arith.constant dense<0.000000e+00> : vector<1xf32>
      %77 = vector.multi_reduction <add>, %76, %cst_38 [1, 2] : vector<1x256x1xf32> to vector<1xf32>
      %78 = vector.shape_cast %77 : vector<1xf32> to vector<1x1x1xf32>
      %79 = vector.extract %78[0, 0, 0] : f32 from vector<1x1x1xf32>
      %80 = vector.shape_cast %75 : vector<256x1xf32> to vector<1x256x1xf32>
      %cst_39 = arith.constant dense<0.000000e+00> : vector<1xf32>
      %81 = vector.multi_reduction <add>, %80, %cst_39 [1, 2] : vector<1x256x1xf32> to vector<1xf32>
      %82 = vector.shape_cast %81 : vector<1xf32> to vector<1x1x1xf32>
      %83 = vector.extract %82[0, 0, 0] : f32 from vector<1x1x1xf32>
      %84 = tpu.iota {dimensions = array<i32: 0>} : vector<8x128xi32>
      %c0_i32_40 = arith.constant 0 : i32
      %85 = vector.broadcast %c0_i32_40 : i32 to vector<8x128xi32>
      %86 = arith.cmpi eq, %84, %85 : vector<8x128xi32>
      %c1_i32 = arith.constant 1 : i32
      %87 = vector.broadcast %c1_i32 : i32 to vector<8x128xi32>
      %88 = arith.cmpi eq, %84, %87 : vector<8x128xi32>
      %cst_41 = arith.constant 0.000000e+00 : f32
      %89 = vector.broadcast %79 : f32 to vector<8x128xf32>
      %90 = vector.broadcast %cst_41 : f32 to vector<8x128xf32>
      %91 = arith.select %88, %89, %90 : vector<8x128xi1>, vector<8x128xf32>
      %92 = vector.broadcast %83 : f32 to vector<8x128xf32>
      %93 = arith.select %86, %92, %91 : vector<8x128xi1>, vector<8x128xf32>
      %c0_42 = arith.constant 0 : index
      %c0_43 = arith.constant 0 : index
      %94 = vector.load %arg7[%c0_42, %c0_43] : memref<8x128xf32, #tpu.memory_space<vmem>>, vector<8x128xf32>
      tpu.vector_store %arg7[%c0_42, %c0_43], %93 {strides = array<i32>} : memref<8x128xf32, #tpu.memory_space<vmem>>, vector<8x128xf32>,
    } else {
    }
    return
  }
  func.func @transform_0(%arg0: i32, %arg1: i32) -> (i32, i32) {
    %c0_i32 = arith.constant 0 : i32
    %c0_i32_0 = arith.constant 0 : i32
    return %arg0, %c0_i32 : i32, i32
  }
  func.func @transform_1(%arg0: i32, %arg1: i32) -> (i32, i32) {
    %c0_i32 = arith.constant 0 : i32
    %c0_i32_0 = arith.constant 0 : i32
    return %arg0, %c0_i32 : i32, i32
  }
  func.func @transform_2(%arg0: i32, %arg1: i32) -> (i32, i32) {
    %c0_i32 = arith.constant 0 : i32
    %c0_i32_0 = arith.constant 0 : i32
    return %c0_i32, %arg1 : i32, i32
  }
  func.func @transform_3(%arg0: i32, %arg1: i32) -> (i32, i32) {
    %c0_i32 = arith.constant 0 : i32
    %c0_i32_0 = arith.constant 0 : i32
    return %c0_i32, %arg1 : i32, i32
  }
  func.func @transform_4(%arg0: i32, %arg1: i32) -> (i32, i32) {
    %c0_i32 = arith.constant 0 : i32
    %c0_i32_0 = arith.constant 0 : i32
    return %c0_i32, %arg1 : i32, i32
  }
  func.func @transform_5(%arg0: i32, %arg1: i32) -> (i32, i32) {
    %c0_i32 = arith.constant 0 : i32
    %c0_i32_0 = arith.constant 0 : i32
    return %arg0, %c0_i32 : i32, i32
  }
}

</mosaic_0001>

<bundles_post_ra>
// kernel: tpu_custom_call.1
= control target key start
LH: loop header
LB: loop body
LE: loop exit
PB: predicated region body
PF: predicated region fallthrough
CT: control target
= control target key end

     0   :  { %v2672_v2 = vmov 0   ;;  %s4451_s0 = inlined_call_operand.vmem [shape: s32[256,1], index: 0, kind: input, shape index: {}]   ;;  %s4452_s1 = inlined_call_operand.vmem [shape: s32[256,1], index: 1, kind: input, shape index: {}]   ;;  %s4453_s2 = inlined_call_operand.vmem [shape: s32[1,256], index: 2, kind: input, shape index: {}]   ;;  %s4454_s3 = inlined_call_operand.vmem [shape: s32[1,256], index: 3, kind: input, shape index: {}]   ;;  %s4455_s4 = inlined_call_operand.vmem [shape: s32[1,256], index: 4, kind: input, shape index: {}]   ;;  %s4456_s5 = inlined_call_operand.hbm [shape: f32[8,128], index: 5, kind: output, shape index: {}]  }
   0x1   :  { %v124_v0 = vld [vmem:[%s4451_s0 + $0x10] sm:$0xff]  ;;  %v122_v1 = vld [vmem:[%s4451_s0] sm:$0xff]  ;;  %2615 = vset.pattern.permute.xlu1 %v2672_v2  ;;  %2614 = vset.pattern.permute.xlu0 %v2672_v2  ;;  %v125_v3 = vld [vmem:[%s4451_s0 + $0x18] sm:$0xff] }
   0x2   :  { %196 = vperm.xlu1 %2615, %v124_v0   ;;  %190 = vperm.xlu0 %2614, %v122_v1   ;;  %v123_v4 = vld [vmem:[%s4451_s0 + $0x8] sm:$0xff]  ;;  %v126_v6 = vld [vmem:[%s4451_s0 + $0x20] sm:$0xff]  ;;  %v129_v7 = vld [vmem:[%s4451_s0 + $0x38] sm:$0xff] }
   0x3   :  { %v127_v5 = vld [vmem:[%s4451_s0 + $0x28] sm:$0xff]  ;;  %v128_v8 = vld [vmem:[%s4451_s0 + $0x30] sm:$0xff]  ;;  %v130_v10 = vld [vmem:[%s4451_s0 + $0x40] sm:$0xff] }
   0x4   :  { %v131_v9 = vld [vmem:[%s4451_s0 + $0x48] sm:$0xff]  ;;  %v133_v11 = vld [vmem:[%s4451_s0 + $0x58] sm:$0xff]  ;;  %v132_v12 = vld [vmem:[%s4451_s0 + $0x50] sm:$0xff] }
   0x5   :  { %v135_v13 = vld [vmem:[%s4451_s0 + $0x68] sm:$0xff]  ;;  %v134_v14 = vld [vmem:[%s4451_s0 + $0x60] sm:$0xff] }
   0x6   :  { %199 = vperm.xlu1 %2615, %v125_v3   ;;  %193 = vperm.xlu0 %2614, %v123_v4  }
   0xa   :  { %205 = vperm.xlu1 %2615, %v127_v5   ;;  %202 = vperm.xlu0 %2614, %v126_v6  }
   0xe   :  { %211 = vperm.xlu1 %2615, %v129_v7   ;;  %208 = vperm.xlu0 %2614, %v128_v8  }
  0x12   :  { %217 = vperm.xlu1 %2615, %v131_v9   ;;  %214 = vperm.xlu0 %2614, %v130_v10  }
  0x16   :  { %223 = vperm.xlu1 %2615, %v133_v11   ;;  %220 = vperm.xlu0 %2614, %v132_v12  }
  0x1a   :  { %229 = vperm.xlu1 %2615, %v135_v13   ;;  %226 = vperm.xlu0 %2614, %v134_v14  }
  0x1b   :  { %10 = vsyncpa [#allocation6], 0  ;;  %v137_v15 = vld [vmem:[%s4451_s0 + $0x78] sm:$0xff]  ;;  %v136_v16 = vld [vmem:[%s4451_s0 + $0x70] sm:$0xff]  ;;  %s2674_s29 = smov [#allocation5]  }
  0x1c   :  { %v139_v17 = vld [vmem:[%s4451_s0 + $0x88] sm:$0xff]  ;;  %v138_v18 = vld [vmem:[%s4451_s0 + $0x80] sm:$0xff]  ;;  %v141_v19 = vld [vmem:[%s4451_s0 + $0x98] sm:$0xff]  ;;  %s2406_s30 = sshll.u32 %s2674_s29, 4  ;;  %s2407_s30 = int_to_ptr.vmem [resolvable:$true] %s2406_s30 }
  0x1d   :  { %v140_v20 = vld [vmem:[%s4451_s0 + $0x90] sm:$0xff]  ;;  %v143_v21 = vld [vmem:[%s4451_s0 + $0xa8] sm:$0xff]  ;;  %v142_v22 = vld [vmem:[%s4451_s0 + $0xa0] sm:$0xff]  ;;  %s2648_s7 = scalar_lea.vmem %s2407_s30, 128  ;;  %p2653_p1 = scmp.lt.s32.totalorder %s2407_s30, %s2407_s30 }
  0x1e   :  { %235 = vperm.xlu1 %2615, %v137_v15   ;;  %232 = vperm.xlu0 %2614, %v136_v16   ;;  %v145_v23 = vld [vmem:[%s4451_s0 + $0xb8] sm:$0xff]  ;;  %v144_v24 = vld [vmem:[%s4451_s0 + $0xb0] sm:$0xff]  ;;  %v147_v25 = vld [vmem:[%s4451_s0 + $0xc8] sm:$0xff]  ;;  %p2649_p0 = scmp.ne.s32.totalorder %s2407_s30, %s2648_s7  ;;  %p2654_p2 = scmp.lt.s32.totalorder %s2648_s7, %s2648_s7 }
  0x1f   :  { %v146_v26 = vld [vmem:[%s4451_s0 + $0xc0] sm:$0xff]  ;;  %v148_v28 = vld [vmem:[%s4451_s0 + $0xd0] sm:$0xff]  ;;  %v155_v30 = vld [vmem:[%s4452_s1 + $0x8] sm:$0xff] }
  0x20   :  { %v154_v27 = vld [vmem:[%s4452_s1] sm:$0xff]  ;;  %v156_v29 = vld [vmem:[%s4452_s1 + $0x10] sm:$0xff]  ;;  %v157_v32 = vld [vmem:[%s4452_s1 + $0x18] sm:$0xff]  ;;  %p2655_p3 = por %p2654_p2, %p2653_p1 }
  0x21   :  { %v158_v31 = vld [vmem:[%s4452_s1 + $0x20] sm:$0xff]  ;;  %v160_v33 = vld [vmem:[%s4452_s1 + $0x30] sm:$0xff]  ;;  %v159_v34 = vld [vmem:[%s4452_s1 + $0x28] sm:$0xff] }
  0x22   :  { %241 = vperm.xlu1 %2615, %v139_v17   ;;  %238 = vperm.xlu0 %2614, %v138_v18   ;;  %v162_v35 = vld [vmem:[%s4452_s1 + $0x40] sm:$0xff]  ;;  %v161_v36 = vld [vmem:[%s4452_s1 + $0x38] sm:$0xff]  ;;  %v164_v37 = vld [vmem:[%s4452_s1 + $0x50] sm:$0xff]  ;;  %p2656_p4 = pnand %p2655_p3, %p2649_p0 }
  0x23   :  { %v163_v38 = vld [vmem:[%s4452_s1 + $0x48] sm:$0xff]  ;;  %v166_v39 = vld [vmem:[%s4452_s1 + $0x60] sm:$0xff]  ;;  %v165_v40 = vld [vmem:[%s4452_s1 + $0x58] sm:$0xff] }
  0x24   :  { %v168_v41 = vld [vmem:[%s4452_s1 + $0x70] sm:$0xff]  ;;  %v167_v42 = vld [vmem:[%s4452_s1 + $0x68] sm:$0xff]  ;;  %v170_v43 = vld [vmem:[%s4452_s1 + $0x80] sm:$0xff] }
  0x25   :  { %v169_v44 = vld [vmem:[%s4452_s1 + $0x78] sm:$0xff]  ;;  %v172_v45 = vld [vmem:[%s4452_s1 + $0x90] sm:$0xff]  ;;  %v171_v46 = vld [vmem:[%s4452_s1 + $0x88] sm:$0xff] }
  0x26   :  { %247 = vperm.xlu1 %2615, %v141_v19   ;;  %244 = vperm.xlu0 %2614, %v140_v20   ;;  %v174_v47 = vld [vmem:[%s4452_s1 + $0xa0] sm:$0xff]  ;;  %v173_v48 = vld [vmem:[%s4452_s1 + $0x98] sm:$0xff]  ;;  %v176_v49 = vld [vmem:[%s4452_s1 + $0xb0] sm:$0xff] }
  0x27   :  { %v175_v50 = vld [vmem:[%s4452_s1 + $0xa8] sm:$0xff]  ;;  %v178_v51 = vld [vmem:[%s4452_s1 + $0xc0] sm:$0xff]  ;;  %v177_v52 = vld [vmem:[%s4452_s1 + $0xb8] sm:$0xff] }
  0x28   :  { %v180_v53 = vld [vmem:[%s4452_s1 + $0xd0] sm:$0xff]  ;;  %v179_v54 = vld [vmem:[%s4452_s1 + $0xc8] sm:$0xff]  ;;  %v181_v55 = vld [vmem:[%s4452_s1 + $0xd8] sm:$0xff] }
  0x29   :  { %v149_v56 = vld [vmem:[%s4451_s0 + $0xd8] sm:$0xff]  ;;  %v182_v57 = vld [vmem:[%s4452_s1 + $0xe0] sm:$0xff]  ;;  %v183_v59 = vld [vmem:[%s4452_s1 + $0xe8] sm:$0xff] }
  0x2a   :  { %253 = vperm.xlu1 %2615, %v143_v21   ;;  %250 = vperm.xlu0 %2614, %v142_v22   ;;  %v150_v58 = vld [vmem:[%s4451_s0 + $0xe0] sm:$0xff]  ;;  %v151_v60 = vld [vmem:[%s4451_s0 + $0xe8] sm:$0xff]  ;;  %v184_v61 = vld [vmem:[%s4452_s1 + $0xf0] sm:$0xff]  ;;  %v285_v21 = vlaneseq }
  0x2b   :  { %v152_v62 = vld [vmem:[%s4451_s0 + $0xf0] sm:$0xff]  ;;  %v185_v63 = vld [vmem:[%s4452_s1 + $0xf8] sm:$0xff] }
  0x2c   :  { %v153_v0 = vld [vmem:[%s4451_s0 + $0xf8] sm:$0xff] }
  0x2e   :  { %259 = vperm.xlu1 %2615, %v145_v23   ;;  %256 = vperm.xlu0 %2614, %v144_v24   ;;  %v2939_v24 = vshrl.u32 %v285_v21, 7 }
  0x32   :  { %265 = vperm.xlu1 %2615, %v147_v25   ;;  %262 = vperm.xlu0 %2614, %v146_v26  }
  0x36   :  { %358 = vperm.xlu1 %2615, %v154_v27   ;;  %268 = vperm.xlu0 %2614, %v148_v28   ;;  %v188_v27 = vld [vmem:[%s4455_s4] sm:$0x3] }
  0x37   :  { %v187_v28 = vld [vmem:[%s4454_s3] sm:$0x3]  ;;  %vm983_vm0 = vcmp.eq.s32.totalorder %v188_v27, 0 }
  0x3a   :  { %364 = vperm.xlu1 %2615, %v156_v29   ;;  %361 = vperm.xlu0 %2614, %v155_v30   ;;  %v287_v29 = vsub.s32 0, %v2939_v24  ;;  %v291_v30 = vsub.s32 1, %v2939_v24 }
  0x3e   :  { %370 = vperm.xlu1 %2615, %v158_v31   ;;  %367 = vperm.xlu0 %2614, %v157_v32   ;;  %v186_v31 = vld [vmem:[%s4453_s2] sm:$0x3] }
  0x42   :  { %376 = vperm.xlu1 %2615, %v160_v33   ;;  %373 = vperm.xlu0 %2614, %v159_v34   ;;  %v2960_v34 = vrot.slane %v187_v28, %v287_v29 }
  0x46   :  { %382 = vperm.xlu1 %2615, %v162_v35   ;;  %379 = vperm.xlu0 %2614, %v161_v36   ;;  %v2962_v35 = vrot.slane %v187_v28, %v291_v30  ;;  %v2964_v36 = vrot.slane %v186_v31, %v287_v29 }
  0x4a   :  { %388 = vperm.xlu1 %2615, %v164_v37   ;;  %385 = vperm.xlu0 %2614, %v163_v38   ;;  %v2673_v37 = vmov 0.0  }
  0x4b   :  { %v2510_v38 = vsel %vm983_vm0, 1.0, %v2673_v37 }
  0x4e   :  { %394 = vperm.xlu1 %2615, %v166_v39   ;;  %391 = vperm.xlu0 %2614, %v165_v40   ;;  %v2967_v39 = vrot.slane %v186_v31, %v291_v30 }
  0x52   :  { %400 = vperm.xlu1 %2615, %v168_v41   ;;  %397 = vperm.xlu0 %2614, %v167_v42   ;;  %v2971_v42 = vand.u32 127, %v285_v21 }
  0x54   :  { %vm791_vm7 = vcmp.lt.s32.totalorder %v2971_v42, %v2939_v24 }
  0x56   :  { %406 = vperm.xlu1 %2615, %v170_v43   ;;  %403 = vperm.xlu0 %2614, %v169_v44   ;;  %v720_v43 = vadd.s32 8, %v2939_v24  ;;  %v2978_v44 = vrot.slane %v2510_v38, %v287_v29 }
  0x58   :  { %vm793_vm9 = vcmp.lt.s32.totalorder %v2971_v42, %v720_v43 }
  0x5a   :  { %412 = vperm.xlu1 %2615, %v172_v45   ;;  %409 = vperm.xlu0 %2614, %v171_v46   ;;  %v2980_v45 = vrot.slane %v2510_v38, %v291_v30 }
  0x5e   :  { %418 = vperm.xlu1 %2615, %v174_v47   ;;  %415 = vperm.xlu0 %2614, %v173_v48  }
  0x62   :  { %424 = vperm.xlu1 %2615, %v176_v49   ;;  %421 = vperm.xlu0 %2614, %v175_v50  }
  0x66   :  { %430 = vperm.xlu1 %2615, %v178_v51   ;;  %427 = vperm.xlu0 %2614, %v177_v52  }
  0x6a   :  { %436 = vperm.xlu1 %2615, %v180_v53   ;;  %433 = vperm.xlu0 %2614, %v179_v54   ;;  %v2478_v53 = vsel %vm791_vm7, 1.0, %v2673_v37  ;;  %v721_v54 = vadd.s32 16, %v2939_v24 }
  0x6e   :  { %439 = vperm.xlu1 %2615, %v181_v55   ;;  %271 = vperm.xlu0 %2614, %v149_v56   ;;  %v2479_v55 = vsel %vm793_vm9, 1.0, %v2673_v37 }
  0x72   :  { %442 = vperm.xlu1 %2615, %v182_v57   ;;  %274 = vperm.xlu0 %2614, %v150_v58  }
  0x76   :  { %445 = vperm.xlu1 %2615, %v183_v59   ;;  %277 = vperm.xlu0 %2614, %v151_v60  }
  0x7a   :  { %448 = vperm.xlu1 %2615, %v184_v61   ;;  %280 = vperm.xlu0 %2614, %v152_v62  }
  0x7e   :  { %451 = vperm.xlu1 %2615, %v185_v63   ;;  %283 = vperm.xlu0 %2614, %v153_v0  }
  0x81   :  { %v2897_v1 = vpop.permute.xlu1 %196  ;;  %v191_v2 = vpop.permute.xlu0 %190 }
  0x82   :  { %vm293_vm1 = vcmp.eq.s32.totalorder %v191_v2, %v2964_v36  ;;  %vm294_vm4 = vcmp.eq.s32.totalorder %v191_v2, %v2967_v39  ;;  %vm297_vm15 = vcmp.eq.s32.totalorder %v2897_v1, %v2964_v36  ;;  %vm298_vm0 = vcmp.eq.s32.totalorder %v2897_v1, %v2967_v39 }
  0x83   :  { %v722_v2 = vadd.s32 24, %v2939_v24 }
  0x85   :  { %v2899_v3 = vpop.permute.xlu1 %199  ;;  %v2901_v4 = vpop.permute.xlu0 %193 }
  0x86   :  { %vm295_vm11 = vcmp.eq.s32.totalorder %v2901_v4, %v2964_v36  ;;  %vm296_vm12 = vcmp.eq.s32.totalorder %v2901_v4, %v2967_v39  ;;  %vm300_vm9 = vcmp.eq.s32.totalorder %v2899_v3, %v2967_v39 }
  0x89   :  { %v2903_v5 = vpop.permute.xlu1 %205  ;;  %v2905_v6 = vpop.permute.xlu0 %202 }
  0x8d   :  { %v2907_v7 = vpop.permute.xlu1 %211  ;;  %v2909_v8 = vpop.permute.xlu0 %208 }
  0x91   :  { %v2911_v9 = vpop.permute.xlu1 %217  ;;  %v2913_v10 = vpop.permute.xlu0 %214 }
  0x95   :  { %v2915_v11 = vpop.permute.xlu1 %223  ;;  %v2917_v12 = vpop.permute.xlu0 %220 }
  0x99   :  { %v2919_v13 = vpop.permute.xlu1 %229  ;;  %v2921_v14 = vpop.permute.xlu0 %226 }
  0x9d   :  { %v2923_v15 = vpop.permute.xlu1 %235  ;;  %v2925_v16 = vpop.permute.xlu0 %232 }
  0xa1   :  { %v2927_v17 = vpop.permute.xlu1 %241  ;;  %v2929_v18 = vpop.permute.xlu0 %238 }
  0xa5   :  { %v2931_v19 = vpop.permute.xlu1 %247  ;;  %v2933_v20 = vpop.permute.xlu0 %244 }
  0xa9   :  { %v2935_v22 = vpop.permute.xlu1 %253  ;;  %v2937_v23 = vpop.permute.xlu0 %250 }
  0xad   :  { %v2941_v25 = vpop.permute.xlu1 %259  ;;  %v2943_v26 = vpop.permute.xlu0 %256 }
  0xb1   :  { %v2956_v32 = vpop.permute.xlu1 %265  ;;  %v2958_v33 = vpop.permute.xlu0 %262 }
  0xb5   :  { %v359_v40 = vpop.permute.xlu1 %358  ;;  %v2969_v41 = vpop.permute.xlu0 %268 }
  0xb6   :  { %vm461_vm2 = vcmp.eq.s32.totalorder %v359_v40, %v2960_v34  ;;  %vm462_vm3 = vcmp.eq.s32.totalorder %v359_v40, %v2962_v35 }
  0xb7   :  { %vm525_vm5 = vmand %vm293_vm1, %vm461_vm2 }
  0xb8   :  { %vm526_vm6 = vmand %vm294_vm4, %vm462_vm3  ;;  %v2414_v46 = vsel %vm525_vm5, 1.0, %v2673_v37 }
  0xb9   :  { %v362_v47 = vpop.permute.xlu0 %361  ;;  %v2415_v48 = vsel %vm526_vm6, 1.0, %v2673_v37  ;;  %v365_v49 = vpop.permute.xlu1 %364  ;;  %v1093_v51 = vmul.f32 %v2414_v46, %v2978_v44  ;;  %v1285_v60 = vmul.f32 %v2478_v53, %v2414_v46  ;;  %vm795_vm6 = vcmp.lt.s32.totalorder %v2971_v42, %v721_v54 }
  0xba   :  { %vm463_vm8 = vcmp.eq.s32.totalorder %v362_v47, %v2960_v34  ;;  %vm464_vm10 = vcmp.eq.s32.totalorder %v362_v47, %v2962_v35  ;;  %v986_v50 = vadd.f32 %v2415_v48, %v2414_v46  ;;  %v1094_v52 = vmul.f32 %v2415_v48, %v2980_v45 }
  0xbb   :  { %vm465_vm13 = vcmp.eq.s32.totalorder %v365_v49, %v2960_v34  ;;  %vm527_vm14 = vmand %vm295_vm11, %vm463_vm8  ;;  %vm466_vm1 = vcmp.eq.s32.totalorder %v365_v49, %v2962_v35  ;;  %v1286_v63 = vmul.f32 0.0, %v2415_v48  ;;  %vm299_vm8 = vcmp.eq.s32.totalorder %v2899_v3, %v2964_v36 }
  0xbc   :  { %987 = vadd.xlane.f32.xlu0 %v986_v50  ;;  %vm528_vm2 = vmand %vm296_vm12, %vm464_vm10  ;;  %v2416_v57 = vsel %vm527_vm14, 1.0, %v2673_v37  ;;  %v1157_v59 = vadd.f32 %v1094_v52, %v1093_v51  ;;  %v2480_v31 = vsel %vm795_vm6, 1.0, %v2673_v37  ;;  %vm797_vm12 = vcmp.lt.s32.totalorder %v2971_v42, %v722_v2 }
  0xbd   :  { %v368_v56 = vpop.permute.xlu0 %367  ;;  %v2417_v58 = vsel %vm528_vm2, 1.0, %v2673_v37  ;;  %vm3008_vm3 = vmand %vm297_vm15, %vm465_vm13  ;;  %v1095_v0 = vmul.f32 %v2416_v57, %v2978_v44  ;;  %v1287_v21 = vmul.f32 %v2479_v55, %v2416_v57  ;;  %v1349_v28 = vadd.f32 %v1286_v63, %v1285_v60  ;;  %v371_v38 = vpop.permute.xlu1 %370 }
  0xbe   :  { %v989_v62 = vadd.f32 %v2417_v58, %v2416_v57  ;;  %v1096_v1 = vmul.f32 %v2417_v58, %v2980_v45  ;;  %vm530_vm4 = vmand %vm298_vm0, %vm466_vm1  ;;  %vm467_vm5 = vcmp.eq.s32.totalorder %v368_v56, %v2960_v34  ;;  %vm468_vm7 = vcmp.eq.s32.totalorder %v368_v56, %v2962_v35 }
  0xbf   :  { %v1288_v27 = vmul.f32 0.0, %v2417_v58  ;;  %v2418_v29 = vsel %vm3008_vm3, 1.0, %v2673_v37  ;;  %v2419_v30 = vsel %vm530_vm4, 1.0, %v2673_v37  ;;  %vm531_vm10 = vmand %vm299_vm8, %vm467_vm5  ;;  %vm469_vm13 = vcmp.eq.s32.totalorder %v371_v38, %v2960_v34 }
  0xc0   :  { %1158 = vadd.xlane.f32.xlu0 %v1157_v59  ;;  %990 = vadd.xlane.f32.xlu1 %v989_v62  ;;  %v1160_v4 = vadd.f32 %v1096_v1, %v1095_v0  ;;  %vm532_vm11 = vmand %vm300_vm9, %vm468_vm7  ;;  %v1097_v43 = vmul.f32 %v2418_v29, %v2978_v44  ;;  %v1098_v46 = vmul.f32 %v2419_v30, %v2980_v45  ;;  %v1290_v49 = vmul.f32 0.0, %v2419_v30 }
  0xc1   :  { %v1352_v40 = vadd.f32 %v1288_v27, %v1287_v21  ;;  %v992_v47 = vadd.f32 %v2419_v30, %v2418_v29  ;;  %v1289_v48 = vmul.f32 %v2480_v31, %v2418_v29  ;;  %v2420_v3 = vsel %vm531_vm10, 1.0, %v2673_v37  ;;  %v374_v52 = vpop.permute.xlu0 %373  ;;  %v377_v2 = vpop.permute.xlu1 %376 }
  0xc2   :  { %v2421_v50 = vsel %vm532_vm11, 1.0, %v2673_v37  ;;  %vm470_vm14 = vcmp.eq.s32.totalorder %v371_v38, %v2962_v35  ;;  %v723_v51 = vadd.s32 32, %v2939_v24  ;;  %vm301_vm15 = vcmp.eq.s32.totalorder %v2905_v6, %v2964_v36 }
  0xc3   :  { %v1163_v53 = vadd.f32 %v1098_v46, %v1097_v43  ;;  %v2481_v54 = vsel %vm797_vm12, 1.0, %v2673_v37  ;;  %vm302_vm0 = vcmp.eq.s32.totalorder %v2905_v6, %v2967_v39  ;;  %vm3040_vm1 = vmand %vm301_vm15, %vm469_vm13  ;;  %v1355_v56 = vadd.f32 %v1290_v49, %v1289_v48 }
  0xc4   :  { %1161 = vadd.xlane.f32.xlu0 %v1160_v4  ;;  %1350 = vadd.xlane.f32.xlu1 %v1349_v28  ;;  %v1099_v57 = vmul.f32 %v2420_v3, %v2978_v44  ;;  %v1100_v58 = vmul.f32 %v2421_v50, %v2980_v45  ;;  %vm534_vm2 = vmand %vm302_vm0, %vm470_vm14  ;;  %vm471_vm3 = vcmp.eq.s32.totalorder %v374_v52, %v2960_v34  ;;  %v724_v59 = vadd.s32 40, %v2939_v24 }
  0xc5   :  { %vm799_vm4 = vcmp.lt.s32.totalorder %v2971_v42, %v723_v51  ;;  %vm472_vm5 = vcmp.eq.s32.totalorder %v374_v52, %v2962_v35  ;;  %v995_v6 = vadd.f32 %v2421_v50, %v2420_v3  ;;  %v1291_v60 = vmul.f32 %v2481_v54, %v2420_v3 }
  0xc6   :  { %v1292_v61 = vmul.f32 0.0, %v2421_v50  ;;  %vm303_vm6 = vcmp.eq.s32.totalorder %v2903_v5, %v2964_v36  ;;  %v1166_v62 = vadd.f32 %v1100_v58, %v1099_v57  ;;  %v2422_v63 = vsel %vm3040_vm1, 1.0, %v2673_v37  ;;  %v383_v57 = vpop.permute.xlu1 %382 }
  0xc7   :  { %v2423_v0 = vsel %vm534_vm2, 1.0, %v2673_v37  ;;  %vm304_vm7 = vcmp.eq.s32.totalorder %v2903_v5, %v2967_v39  ;;  %vm535_vm8 = vmand %vm303_vm6, %vm471_vm3  ;;  %v2482_v1 = vsel %vm799_vm4, 1.0, %v2673_v37  ;;  %v1101_v21 = vmul.f32 %v2422_v63, %v2978_v44 }
  0xc8   :  { %1353 = vadd.xlane.f32.xlu0 %v1352_v40  ;;  %993 = vadd.xlane.f32.xlu1 %v992_v47  ;;  %vm536_vm9 = vmand %vm304_vm7, %vm472_vm5  ;;  %v1358_v4 = vadd.f32 %v1292_v61, %v1291_v60  ;;  %v1102_v27 = vmul.f32 %v2423_v0, %v2980_v45  ;;  %v998_v28 = vadd.f32 %v2423_v0, %v2422_v63  ;;  %v1294_v30 = vmul.f32 0.0, %v2423_v0  ;;  %v380_v40 = vpop.permute.xlu0 %379 }
  0xc9   :  { %v1293_v29 = vmul.f32 %v2482_v1, %v2422_v63  ;;  %vm801_vm10 = vcmp.lt.s32.totalorder %v2971_v42, %v724_v59  ;;  %vm473_vm11 = vcmp.eq.s32.totalorder %v377_v2, %v2960_v34  ;;  %v2424_v5 = vsel %vm535_vm8, 1.0, %v2673_v37 }
  0xca   :  { %v2425_v31 = vsel %vm536_vm9, 1.0, %v2673_v37  ;;  %vm474_vm12 = vcmp.eq.s32.totalorder %v377_v2, %v2962_v35  ;;  %v725_v38 = vadd.s32 48, %v2939_v24  ;;  %vm305_vm13 = vcmp.eq.s32.totalorder %v2909_v8, %v2964_v36  ;;  %v389_v47 = vpop.permute.xlu1 %388 }
  0xcb   :  { %v1169_v43 = vadd.f32 %v1102_v27, %v1101_v21  ;;  %v2483_v46 = vsel %vm801_vm10, 1.0, %v2673_v37  ;;  %vm306_vm14 = vcmp.eq.s32.totalorder %v2909_v8, %v2967_v39  ;;  %vm3072_vm15 = vmand %vm305_vm13, %vm473_vm11  ;;  %v1361_v48 = vadd.f32 %v1294_v30, %v1293_v29 }
  0xcc   :  { %1164 = vadd.xlane.f32.xlu0 %v1163_v53  ;;  %1356 = vadd.xlane.f32.xlu1 %v1355_v56  ;;  %v1103_v49 = vmul.f32 %v2424_v5, %v2978_v44  ;;  %v1104_v3 = vmul.f32 %v2425_v31, %v2980_v45  ;;  %vm538_vm0 = vmand %vm306_vm14, %vm474_vm12  ;;  %vm475_vm1 = vcmp.eq.s32.totalorder %v380_v40, %v2960_v34  ;;  %v726_v50 = vadd.s32 56, %v2939_v24  ;;  %v386_v1 = vpop.permute.xlu0 %385 }
  0xcd   :  { %vm803_vm2 = vcmp.lt.s32.totalorder %v2971_v42, %v725_v38  ;;  %vm476_vm3 = vcmp.eq.s32.totalorder %v380_v40, %v2962_v35  ;;  %v1001_v8 = vadd.f32 %v2425_v31, %v2424_v5  ;;  %v1295_v51 = vmul.f32 %v2483_v46, %v2424_v5 }
  0xce   :  { %v1296_v52 = vmul.f32 0.0, %v2425_v31  ;;  %vm307_vm4 = vcmp.eq.s32.totalorder %v2907_v7, %v2964_v36  ;;  %v1172_v53 = vadd.f32 %v1104_v3, %v1103_v49  ;;  %v2426_v54 = vsel %vm3072_vm15, 1.0, %v2673_v37 }
  0xcf   :  { %v2427_v55 = vsel %vm538_vm0, 1.0, %v2673_v37  ;;  %vm308_vm5 = vcmp.eq.s32.totalorder %v2907_v7, %v2967_v39  ;;  %vm539_vm6 = vmand %vm307_vm4, %vm475_vm1  ;;  %v2484_v56 = vsel %vm803_vm2, 1.0, %v2673_v37  ;;  %v1105_v59 = vmul.f32 %v2426_v54, %v2978_v44 }
  0xd0   :  { %996 = vadd.xlane.f32.xlu0 %v995_v6  ;;  %1167 = vadd.xlane.f32.xlu1 %v1166_v62  ;;  %vm540_vm7 = vmand %vm308_vm5, %vm476_vm3  ;;  %v1364_v58 = vadd.f32 %v1296_v52, %v1295_v51  ;;  %v1106_v6 = vmul.f32 %v2427_v55, %v2980_v45  ;;  %v1004_v60 = vadd.f32 %v2427_v55, %v2426_v54  ;;  %v1298_v62 = vmul.f32 0.0, %v2427_v55 }
  0xd1   :  { %v1297_v61 = vmul.f32 %v2484_v56, %v2426_v54  ;;  %vm805_vm8 = vcmp.lt.s32.totalorder %v2971_v42, %v726_v50  ;;  %vm477_vm9 = vcmp.eq.s32.totalorder %v383_v57, %v2960_v34  ;;  %v2428_v7 = vsel %vm539_vm6, 1.0, %v2673_v37  ;;  %v392_v54 = vpop.permute.xlu0 %391 }
  0xd2   :  { %v2429_v63 = vsel %vm540_vm7, 1.0, %v2673_v37  ;;  %vm478_vm10 = vcmp.eq.s32.totalorder %v383_v57, %v2962_v35  ;;  %v727_v0 = vadd.s32 64, %v2939_v24  ;;  %vm309_vm11 = vcmp.eq.s32.totalorder %v2913_v10, %v2964_v36 }
  0xd3   :  { %v1175_v2 = vadd.f32 %v1106_v6, %v1105_v59  ;;  %vm310_vm12 = vcmp.eq.s32.totalorder %v2913_v10, %v2967_v39  ;;  %vm3104_vm13 = vmand %vm309_vm11, %vm477_vm9  ;;  %v1367_v27 = vadd.f32 %v1298_v62, %v1297_v61  ;;  %v1108_v29 = vmul.f32 %v2429_v63, %v2980_v45 }
  0xd4   :  { %1359 = vadd.xlane.f32.xlu0 %v1358_v4  ;;  %999 = vadd.xlane.f32.xlu1 %v998_v28  ;;  %v2485_v4 = vsel %vm805_vm8, 1.0, %v2673_v37  ;;  %v1107_v28 = vmul.f32 %v2428_v7, %v2978_v44  ;;  %vm542_vm14 = vmand %vm310_vm12, %vm478_vm10  ;;  %vm479_vm15 = vcmp.eq.s32.totalorder %v386_v1, %v2960_v34  ;;  %vm807_vm0 = vcmp.lt.s32.totalorder %v2971_v42, %v727_v0 }
  0xd5   :  { %v728_v30 = vadd.s32 72, %v2939_v24  ;;  %vm480_vm1 = vcmp.eq.s32.totalorder %v386_v1, %v2962_v35  ;;  %v1007_v10 = vadd.f32 %v2429_v63, %v2428_v7  ;;  %v1299_v5 = vmul.f32 %v2485_v4, %v2428_v7 }
  0xd6   :  { %v1300_v31 = vmul.f32 0.0, %v2429_v63  ;;  %vm311_vm2 = vcmp.eq.s32.totalorder %v2911_v9, %v2964_v36  ;;  %v1178_v38 = vadd.f32 %v1108_v29, %v1107_v28  ;;  %v2430_v40 = vsel %vm3104_vm13, 1.0, %v2673_v37 }
  0xd7   :  { %vm312_vm3 = vcmp.eq.s32.totalorder %v2911_v9, %v2967_v39  ;;  %vm543_vm4 = vmand %vm311_vm2, %vm479_vm15  ;;  %v2486_v46 = vsel %vm807_vm0, 1.0, %v2673_v37  ;;  %v1109_v49 = vmul.f32 %v2430_v40, %v2978_v44  ;;  %vm809_vm6 = vcmp.lt.s32.totalorder %v2971_v42, %v728_v30 }
  0xd8   :  { %1170 = vadd.xlane.f32.xlu0 %v1169_v43  ;;  %1362 = vadd.xlane.f32.xlu1 %v1361_v48  ;;  %v2431_v43 = vsel %vm542_vm14, 1.0, %v2673_v37  ;;  %vm544_vm5 = vmand %vm312_vm3, %vm480_vm1  ;;  %v1370_v48 = vadd.f32 %v1300_v31, %v1299_v5  ;;  %vm481_vm7 = vcmp.eq.s32.totalorder %v389_v47, %v2960_v34  ;;  %v2432_v9 = vsel %vm543_vm4, 1.0, %v2673_v37  ;;  %v398_v31 = vpop.permute.xlu0 %397 }
  0xd9   :  { %v1110_v3 = vmul.f32 %v2431_v43, %v2980_v45  ;;  %v1010_v50 = vadd.f32 %v2431_v43, %v2430_v40  ;;  %v1302_v51 = vmul.f32 0.0, %v2431_v43  ;;  %v2433_v52 = vsel %vm544_vm5, 1.0, %v2673_v37 }
  0xda   :  { %vm482_vm8 = vcmp.eq.s32.totalorder %v389_v47, %v2962_v35  ;;  %vm313_vm9 = vcmp.eq.s32.totalorder %v2917_v12, %v2964_v36  ;;  %v2487_v56 = vsel %vm809_vm6, 1.0, %v2673_v37  ;;  %vm314_vm10 = vcmp.eq.s32.totalorder %v2917_v12, %v2967_v39 }
  0xdb   :  { %v1181_v55 = vadd.f32 %v1110_v3, %v1109_v49  ;;  %vm3136_vm11 = vmand %vm313_vm9, %vm481_vm7  ;;  %v1111_v59 = vmul.f32 %v2432_v9, %v2978_v44  ;;  %v1112_v6 = vmul.f32 %v2433_v52, %v2980_v45  ;;  %vm483_vm13 = vcmp.eq.s32.totalorder %v392_v54, %v2960_v34 }
  0xdc   :  { %1002 = vadd.xlane.f32.xlu0 %v1001_v8  ;;  %1173 = vadd.xlane.f32.xlu1 %v1172_v53  ;;  %v1301_v8 = vmul.f32 %v2486_v46, %v2430_v40  ;;  %v729_v53 = vadd.s32 80, %v2939_v24  ;;  %vm546_vm12 = vmand %vm314_vm10, %vm482_vm8  ;;  %vm484_vm15 = vcmp.eq.s32.totalorder %v392_v54, %v2962_v35  ;;  %v1013_v12 = vadd.f32 %v2433_v52, %v2432_v9 }
  0xdd   :  { %v1303_v61 = vmul.f32 %v2487_v56, %v2432_v9  ;;  %v1304_v62 = vmul.f32 0.0, %v2433_v52  ;;  %vm315_vm0 = vcmp.eq.s32.totalorder %v2915_v11, %v2964_v36  ;;  %v1184_v7 = vadd.f32 %v1112_v6, %v1111_v59 }
  0xde   :  { %vm811_vm14 = vcmp.lt.s32.totalorder %v2971_v42, %v729_v53  ;;  %v2434_v63 = vsel %vm3136_vm11, 1.0, %v2673_v37  ;;  %v2435_v0 = vsel %vm546_vm12, 1.0, %v2673_v37  ;;  %vm316_vm1 = vcmp.eq.s32.totalorder %v2915_v11, %v2967_v39  ;;  %vm547_vm2 = vmand %vm315_vm0, %vm483_vm13 }
  0xdf   :  { %v2488_v1 = vsel %vm811_vm14, 1.0, %v2673_v37  ;;  %vm548_vm3 = vmand %vm316_vm1, %vm484_vm15  ;;  %v1376_v4 = vadd.f32 %v1304_v62, %v1303_v61  ;;  %v1113_v21 = vmul.f32 %v2434_v63, %v2978_v44  ;;  %v1016_v28 = vadd.f32 %v2435_v0, %v2434_v63  ;;  %v404_v61 = vpop.permute.xlu0 %403 }
  0xe0   :  { %1365 = vadd.xlane.f32.xlu0 %v1364_v58  ;;  %1005 = vadd.xlane.f32.xlu1 %v1004_v60  ;;  %v1373_v58 = vadd.f32 %v1302_v51, %v1301_v8  ;;  %v730_v60 = vadd.s32 88, %v2939_v24  ;;  %v1305_v29 = vmul.f32 %v2488_v1, %v2434_v63  ;;  %v1306_v30 = vmul.f32 0.0, %v2435_v0 }
  0xe1   :  { %v2436_v11 = vsel %vm547_vm2, 1.0, %v2673_v37  ;;  %v731_v5 = vadd.s32 96, %v2939_v24  ;;  %vm317_vm7 = vcmp.eq.s32.totalorder %v2921_v14, %v2964_v36  ;;  %vm318_vm8 = vcmp.eq.s32.totalorder %v2921_v14, %v2967_v39 }
  0xe2   :  { %vm813_vm4 = vcmp.lt.s32.totalorder %v2971_v42, %v730_v60  ;;  %v1379_v43 = vadd.f32 %v1306_v30, %v1305_v29  ;;  %v1115_v46 = vmul.f32 %v2436_v11, %v2978_v44  ;;  %vm487_vm11 = vcmp.eq.s32.totalorder %v398_v31, %v2960_v34 }
  0xe3   :  { %v2489_v40 = vsel %vm813_vm4, 1.0, %v2673_v37  ;;  %vm815_vm12 = vcmp.lt.s32.totalorder %v2971_v42, %v731_v5  ;;  %vm488_vm13 = vcmp.eq.s32.totalorder %v398_v31, %v2962_v35  ;;  %vm319_vm14 = vcmp.eq.s32.totalorder %v2919_v13, %v2964_v36 }
  0xe4   :  { %1176 = vadd.xlane.f32.xlu0 %v1175_v2  ;;  %1368 = vadd.xlane.f32.xlu1 %v1367_v27  ;;  %v395_v2 = vpop.permute.xlu1 %394  ;;  %v1114_v27 = vmul.f32 %v2435_v0, %v2980_v45  ;;  %v1307_v14 = vmul.f32 %v2489_v40, %v2436_v11  ;;  %vm320_vm15 = vcmp.eq.s32.totalorder %v2919_v13, %v2967_v39  ;;  %vm3182_vm0 = vmand %vm319_vm14, %vm487_vm11  ;;  %v2490_v52 = vsel %vm815_vm12, 1.0, %v2673_v37 }
  0xe5   :  { %vm485_vm5 = vcmp.eq.s32.totalorder %v395_v2, %v2960_v34  ;;  %vm486_vm6 = vcmp.eq.s32.totalorder %v395_v2, %v2962_v35  ;;  %vm3189_vm1 = vmand %vm320_vm15, %vm488_vm13  ;;  %vm25_vm2 = vcmask 7168   ;;  %v2440_v6 = vsel %vm3182_vm0, 1.0, %v2673_v37 }
  0xe6   :  { %vm549_vm9 = vmand %vm317_vm7, %vm485_vm5  ;;  %58 = vst.msk [vmem:[#allocation3] sm:$0xff] %vm25_vm2, %v2673_v37  ;;  %v2441_v60 = vsel %vm3189_vm1, 1.0, %v2673_v37  ;;  %vm322_vm7 = vcmp.eq.s32.totalorder %v2925_v16, %v2967_v39  ;;  %v1119_v0 = vmul.f32 %v2440_v6, %v2978_v44  ;;  %v734_v2 = vadd.s32 120, %v2939_v24 }
  0xe7   :  { %vm550_vm10 = vmand %vm318_vm8, %vm486_vm6  ;;  %90 = vst.msk [vmem:[#allocation4] sm:$0xff] %vm25_vm2, %v2673_v37  ;;  %vm321_vm6 = vcmp.eq.s32.totalorder %v2925_v16, %v2964_v36  ;;  %v1120_v1 = vmul.f32 %v2441_v60, %v2980_v45  ;;  %vm492_vm12 = vcmp.eq.s32.totalorder %v404_v61, %v2962_v35  ;;  %v1025_v16 = vadd.f32 %v2441_v60, %v2440_v6 }
  0xe8   :  { %1008 = vadd.xlane.f32.xlu0 %v1007_v10  ;;  %1179 = vadd.xlane.f32.xlu1 %v1178_v38  ;;  %v2437_v10 = vsel %vm548_vm3, 1.0, %v2673_v37  ;;  %v1187_v38 = vadd.f32 %v1114_v27, %v1113_v21  ;;  %v2439_v8 = vsel %vm550_vm10, 1.0, %v2673_v37  ;;  %v3187_v53 = vpop.permute.xlu1 %400  ;;  %26 = vst.msk [vmem:[#allocation2] sm:$0xff] %vm25_vm2, %v2673_v37  ;;  %27 = vst.msk [vmem:[#allocation2 + $0x8] sm:$0xff] %vm25_vm2, %v2673_v37  ;;  %v1312_v21 = vmul.f32 0.0, %v2441_v60 }
  0xe9   :  { %v1116_v47 = vmul.f32 %v2437_v10, %v2980_v45  ;;  %v1019_v49 = vadd.f32 %v2437_v10, %v2436_v11  ;;  %v1308_v3 = vmul.f32 0.0, %v2437_v10  ;;  %v3199_v13 = vmul.f32 %v2439_v8, %v2980_v45  ;;  %28 = vst.msk [vmem:[#allocation2 + $0x10] sm:$0xff] %vm25_vm2, %v2673_v37  ;;  %29 = vst.msk [vmem:[#allocation2 + $0x18] sm:$0xff] %vm25_vm2, %v2673_v37 }
  0xea   :  { %v3205_v59 = vmul.f32 0.0, %v2439_v8  ;;  %30 = vst.msk [vmem:[#allocation2 + $0x20] sm:$0xff] %vm25_vm2, %v2673_v37  ;;  %31 = vst.msk [vmem:[#allocation2 + $0x28] sm:$0xff] %vm25_vm2, %v2673_v37  ;;  %vm489_vm4 = vcmp.eq.s32.totalorder %v3187_v53, %v2960_v34  ;;  %vm490_vm5 = vcmp.eq.s32.totalorder %v3187_v53, %v2962_v35  ;;  %vm491_vm10 = vcmp.eq.s32.totalorder %v404_v61, %v2960_v34 }
  0xeb   :  { %v1190_v51 = vadd.f32 %v1116_v47, %v1115_v46  ;;  %32 = vst.msk [vmem:[#allocation2 + $0x30] sm:$0xff] %vm25_vm2, %v2673_v37  ;;  %33 = vst.msk [vmem:[#allocation2 + $0x38] sm:$0xff] %vm25_vm2, %v2673_v37  ;;  %vm323_vm13 = vcmp.eq.s32.totalorder %v2923_v15, %v2964_v36  ;;  %v1196_v29 = vadd.f32 %v1120_v1, %v1119_v0  ;;  %v737_v0 = vadd.s32 144, %v2939_v24 }
  0xec   :  { %1371 = vadd.xlane.f32.xlu0 %v1370_v48  ;;  %1011 = vadd.xlane.f32.xlu1 %v1010_v50  ;;  %v3173_v48 = vadd.s32 104, %v2939_v24  ;;  %v2438_v50 = vsel %vm549_vm9, 1.0, %v2673_v37  ;;  %34 = vst.msk [vmem:[#allocation2 + $0x40] sm:$0xff] %vm25_vm2, %v2673_v37  ;;  %35 = vst.msk [vmem:[#allocation2 + $0x48] sm:$0xff] %vm25_vm2, %v2673_v37  ;;  %vm324_vm14 = vcmp.eq.s32.totalorder %v2923_v15, %v2967_v39  ;;  %v407_v11 = vpop.permute.xlu1 %406 }
  0xed   :  { %v3196_v56 = vmul.f32 %v2438_v50, %v2978_v44  ;;  %v3201_v57 = vadd.f32 %v2439_v8, %v2438_v50  ;;  %36 = vst.msk [vmem:[#allocation2 + $0x50] sm:$0xff] %vm25_vm2, %v2673_v37  ;;  %37 = vst.msk [vmem:[#allocation2 + $0x58] sm:$0xff] %vm25_vm2, %v2673_v37  ;;  %vm821_vm1 = vcmp.lt.s32.totalorder %v2971_v42, %v734_v2 }
  0xee   :  { %vm817_vm3 = vcmp.lt.s32.totalorder %v2971_v42, %v3173_v48  ;;  %38 = vst.msk [vmem:[#allocation2 + $0x60] sm:$0xff] %vm25_vm2, %v2673_v37  ;;  %39 = vst.msk [vmem:[#allocation2 + $0x68] sm:$0xff] %vm25_vm2, %v2673_v37  ;;  %v735_v48 = vadd.s32 128, %v2939_v24 }
  0xef   :  { %40 = vst.msk [vmem:[#allocation2 + $0x70] sm:$0xff] %vm25_vm2, %v2673_v37  ;;  %41 = vst.msk [vmem:[#allocation2 + $0x78] sm:$0xff] %vm25_vm2, %v2673_v37  ;;  %v1193_v62 = vadd.f32 %v3199_v13, %v3196_v56 }
  0xf0   :  { %1182 = vadd.xlane.f32.xlu0 %v1181_v55  ;;  %1374 = vadd.xlane.f32.xlu1 %v1373_v58  ;;  %v3193_v55 = vadd.f32 %v1308_v3, %v1307_v14  ;;  %v3203_v58 = vmul.f32 %v2490_v52, %v2438_v50  ;;  %42 = vst.msk [vmem:[#allocation2 + $0x80] sm:$0xff] %vm25_vm2, %v2673_v37  ;;  %43 = vst.msk [vmem:[#allocation2 + $0x88] sm:$0xff] %vm25_vm2, %v2673_v37  ;;  %v2493_v3 = vsel %vm821_vm1, 1.0, %v2673_v37 }
  0xf1   :  { %44 = vst.msk [vmem:[#allocation2 + $0x90] sm:$0xff] %vm25_vm2, %v2673_v37  ;;  %45 = vst.msk [vmem:[#allocation2 + $0x98] sm:$0xff] %vm25_vm2, %v2673_v37  ;;  %v739_v50 = vadd.s32 160, %v2939_v24 }
  0xf2   :  { %46 = vst.msk [vmem:[#allocation2 + $0xa0] sm:$0xff] %vm25_vm2, %v2673_v37  ;;  %47 = vst.msk [vmem:[#allocation2 + $0xa8] sm:$0xff] %vm25_vm2, %v2673_v37  ;;  %v1385_v63 = vadd.f32 %v3205_v59, %v3203_v58 }
  0xf3   :  { %48 = vst.msk [vmem:[#allocation2 + $0xb0] sm:$0xff] %vm25_vm2, %v2673_v37  ;;  %49 = vst.msk [vmem:[#allocation2 + $0xb8] sm:$0xff] %vm25_vm2, %v2673_v37 }
  0xf4   :  { %1014 = vadd.xlane.f32.xlu0 %v1013_v12  ;;  %1185 = vadd.xlane.f32.xlu1 %v1184_v7  ;;  %50 = vst.msk [vmem:[#allocation2 + $0xc0] sm:$0xff] %vm25_vm2, %v2673_v37  ;;  %51 = vst.msk [vmem:[#allocation2 + $0xc8] sm:$0xff] %vm25_vm2, %v2673_v37  ;;  %v733_v12 = vadd.s32 112, %v2939_v24  ;;  %v2491_v7 = vsel %vm817_vm3, 1.0, %v2673_v37  ;;  %vm493_vm3 = vcmp.eq.s32.totalorder %v407_v11, %v2960_v34 }
  0xf5   :  { %52 = vst.msk [vmem:[#allocation2 + $0xd0] sm:$0xff] %vm25_vm2, %v2673_v37  ;;  %53 = vst.msk [vmem:[#allocation2 + $0xd8] sm:$0xff] %vm25_vm2, %v2673_v37 }
  0xf6   :  { %54 = vst.msk [vmem:[#allocation2 + $0xe0] sm:$0xff] %vm25_vm2, %v2673_v37  ;;  %55 = vst.msk [vmem:[#allocation2 + $0xe8] sm:$0xff] %vm25_vm2, %v2673_v37  ;;  %vm819_vm11 = vcmp.lt.s32.totalorder %v2971_v42, %v733_v12 }
  0xf7   :  { %56 = vst.msk [vmem:[#allocation2 + $0xf0] sm:$0xff] %vm25_vm2, %v2673_v37  ;;  %57 = vst.msk [vmem:[#allocation2 + $0xf8] sm:$0xff] %vm25_vm2, %v2673_v37  ;;  %v2492_v30 = vsel %vm819_vm11, 1.0, %v2673_v37 }
  0xf8   :  { %1377 = vadd.xlane.f32.xlu0 %v1376_v4  ;;  %1017 = vadd.xlane.f32.xlu1 %v1016_v28  ;;  %59 = vst.msk [vmem:[#allocation3 + $0x8] sm:$0xff] %vm25_vm2, %v2673_v37  ;;  %60 = vst.msk [vmem:[#allocation3 + $0x10] sm:$0xff] %vm25_vm2, %v2673_v37  ;;  %v1311_v4 = vmul.f32 %v2491_v7, %v2440_v6 }
  0xf9   :  { %61 = vst.msk [vmem:[#allocation3 + $0x18] sm:$0xff] %vm25_vm2, %v2673_v37  ;;  %62 = vst.msk [vmem:[#allocation3 + $0x20] sm:$0xff] %vm25_vm2, %v2673_v37 }
  0xfa   :  { %63 = vst.msk [vmem:[#allocation3 + $0x28] sm:$0xff] %vm25_vm2, %v2673_v37  ;;  %64 = vst.msk [vmem:[#allocation3 + $0x30] sm:$0xff] %vm25_vm2, %v2673_v37  ;;  %v1388_v10 = vadd.f32 %v1312_v21, %v1311_v4 }
  0xfb   :  { %65 = vst.msk [vmem:[#allocation3 + $0x38] sm:$0xff] %vm25_vm2, %v2673_v37  ;;  %66 = vst.msk [vmem:[#allocation3 + $0x40] sm:$0xff] %vm25_vm2, %v2673_v37 }
  0xfc   :  { %1188 = vadd.xlane.f32.xlu0 %v1187_v38  ;;  %1380 = vadd.xlane.f32.xlu1 %v1379_v43  ;;  %67 = vst.msk [vmem:[#allocation3 + $0x48] sm:$0xff] %vm25_vm2, %v2673_v37  ;;  %68 = vst.msk [vmem:[#allocation3 + $0x50] sm:$0xff] %vm25_vm2, %v2673_v37  ;;  %v410_v38 = vpop.permute.xlu0 %409 }
  0xfd   :  { %69 = vst.msk [vmem:[#allocation3 + $0x58] sm:$0xff] %vm25_vm2, %v2673_v37  ;;  %70 = vst.msk [vmem:[#allocation3 + $0x60] sm:$0xff] %vm25_vm2, %v2673_v37  ;;  %vm496_vm11 = vcmp.eq.s32.totalorder %v410_v38, %v2962_v35 }
  0xfe   :  { %71 = vst.msk [vmem:[#allocation3 + $0x68] sm:$0xff] %vm25_vm2, %v2673_v37  ;;  %72 = vst.msk [vmem:[#allocation3 + $0x70] sm:$0xff] %vm25_vm2, %v2673_v37 }
  0xff   :  { %73 = vst.msk [vmem:[#allocation3 + $0x78] sm:$0xff] %vm25_vm2, %v2673_v37  ;;  %74 = vst.msk [vmem:[#allocation3 + $0x80] sm:$0xff] %vm25_vm2, %v2673_v37 }
 0x100   :  { %1020 = vadd.xlane.f32.xlu0 %v1019_v49  ;;  %1191 = vadd.xlane.f32.xlu1 %v1190_v51  ;;  %75 = vst.msk [vmem:[#allocation3 + $0x88] sm:$0xff] %vm25_vm2, %v2673_v37  ;;  %76 = vst.msk [vmem:[#allocation3 + $0x90] sm:$0xff] %vm25_vm2, %v2673_v37  ;;  %v3448_v49 = vadd.s32 128, %v2971_v42  ;;  %v413_v42 = vpop.permute.xlu1 %412  ;;  %v416_v52 = vpop.permute.xlu0 %415 }
 0x101   :  { %77 = vst.msk [vmem:[#allocation3 + $0x98] sm:$0xff] %vm25_vm2, %v2673_v37  ;;  %78 = vst.msk [vmem:[#allocation3 + $0xa0] sm:$0xff] %vm25_vm2, %v2673_v37  ;;  %vm497_vm1 = vcmp.eq.s32.totalorder %v413_v42, %v2960_v34 }
 0x102   :  { %79 = vst.msk [vmem:[#allocation3 + $0xa8] sm:$0xff] %vm25_vm2, %v2673_v37  ;;  %80 = vst.msk [vmem:[#allocation3 + $0xb0] sm:$0xff] %vm25_vm2, %v2673_v37 }
 0x103   :  { %81 = vst.msk [vmem:[#allocation3 + $0xb8] sm:$0xff] %vm25_vm2, %v2673_v37  ;;  %82 = vst.msk [vmem:[#allocation3 + $0xc0] sm:$0xff] %vm25_vm2, %v2673_v37 }
 0x104   :  { %83 = vst.msk [vmem:[#allocation3 + $0xc8] sm:$0xff] %vm25_vm2, %v2673_v37  ;;  %84 = vst.msk [vmem:[#allocation3 + $0xd0] sm:$0xff] %vm25_vm2, %v2673_v37  ;;  %1383 = vadd.xlane.f32.xlu0 %v3193_v55  ;;  %1023 = vadd.xlane.f32.xlu1 %v3201_v57  ;;  %v3474_v59 = vpop.permute.xlu1 %418  ;;  %v3478_v61 = vpop.permute.xlu0 %421 }
 0x105   :  { %85 = vst.msk [vmem:[#allocation3 + $0xd8] sm:$0xff] %vm25_vm2, %v2673_v37  ;;  %86 = vst.msk [vmem:[#allocation3 + $0xe0] sm:$0xff] %vm25_vm2, %v2673_v37 }
 0x106   :  { %87 = vst.msk [vmem:[#allocation3 + $0xe8] sm:$0xff] %vm25_vm2, %v2673_v37  ;;  %88 = vst.msk [vmem:[#allocation3 + $0xf0] sm:$0xff] %vm25_vm2, %v2673_v37 }
 0x107   :  { %89 = vst.msk [vmem:[#allocation3 + $0xf8] sm:$0xff] %vm25_vm2, %v2673_v37  ;;  %91 = vst.msk [vmem:[#allocation4 + $0x8] sm:$0xff] %vm25_vm2, %v2673_v37 }
 0x108   :  { %92 = vst.msk [vmem:[#allocation4 + $0x10] sm:$0xff] %vm25_vm2, %v2673_v37  ;;  %93 = vst.msk [vmem:[#allocation4 + $0x18] sm:$0xff] %vm25_vm2, %v2673_v37  ;;  %1194 = vadd.xlane.f32.xlu0 %v1193_v62  ;;  %1386 = vadd.xlane.f32.xlu1 %v1385_v63 }
 0x109   :  { %94 = vst.msk [vmem:[#allocation4 + $0x20] sm:$0xff] %vm25_vm2, %v2673_v37  ;;  %95 = vst.msk [vmem:[#allocation4 + $0x28] sm:$0xff] %vm25_vm2, %v2673_v37 }
 0x10a   :  { %96 = vst.msk [vmem:[#allocation4 + $0x30] sm:$0xff] %vm25_vm2, %v2673_v37  ;;  %97 = vst.msk [vmem:[#allocation4 + $0x38] sm:$0xff] %vm25_vm2, %v2673_v37 }
 0x10b   :  { %98 = vst.msk [vmem:[#allocation4 + $0x40] sm:$0xff] %vm25_vm2, %v2673_v37  ;;  %99 = vst.msk [vmem:[#allocation4 + $0x48] sm:$0xff] %vm25_vm2, %v2673_v37 }
 0x10c   :  { %100 = vst.msk [vmem:[#allocation4 + $0x50] sm:$0xff] %vm25_vm2, %v2673_v37  ;;  %101 = vst.msk [vmem:[#allocation4 + $0x58] sm:$0xff] %vm25_vm2, %v2673_v37  ;;  %1026 = vadd.xlane.f32.xlu0 %v1025_v16  ;;  %1197 = vadd.xlane.f32.xlu1 %v1196_v29  ;;  %v3500_v29 = vpop.permute.xlu0 %427 }
 0x10d   :  { %102 = vst.msk [vmem:[#allocation4 + $0x60] sm:$0xff] %vm25_vm2, %v2673_v37  ;;  %103 = vst.msk [vmem:[#allocation4 + $0x68] sm:$0xff] %vm25_vm2, %v2673_v37 }
 0x10e   :  { %104 = vst.msk [vmem:[#allocation4 + $0x70] sm:$0xff] %vm25_vm2, %v2673_v37  ;;  %105 = vst.msk [vmem:[#allocation4 + $0x78] sm:$0xff] %vm25_vm2, %v2673_v37 }
 0x10f   :  { %106 = vst.msk [vmem:[#allocation4 + $0x80] sm:$0xff] %vm25_vm2, %v2673_v37  ;;  %107 = vst.msk [vmem:[#allocation4 + $0x88] sm:$0xff] %vm25_vm2, %v2673_v37 }
 0x110   :  { %108 = vst.msk [vmem:[#allocation4 + $0x90] sm:$0xff] %vm25_vm2, %v2673_v37  ;;  %109 = vst.msk [vmem:[#allocation4 + $0x98] sm:$0xff] %vm25_vm2, %v2673_v37  ;;  %1389 = vadd.xlane.f32.xlu0 %v1388_v10 }
 0x111   :  { %110 = vst.msk [vmem:[#allocation4 + $0xa0] sm:$0xff] %vm25_vm2, %v2673_v37  ;;  %111 = vst.msk [vmem:[#allocation4 + $0xa8] sm:$0xff] %vm25_vm2, %v2673_v37 }
 0x112   :  { %112 = vst.msk [vmem:[#allocation4 + $0xb0] sm:$0xff] %vm25_vm2, %v2673_v37  ;;  %113 = vst.msk [vmem:[#allocation4 + $0xb8] sm:$0xff] %vm25_vm2, %v2673_v37 }
 0x113   :  { %114 = vst.msk [vmem:[#allocation4 + $0xc0] sm:$0xff] %vm25_vm2, %v2673_v37  ;;  %115 = vst.msk [vmem:[#allocation4 + $0xc8] sm:$0xff] %vm25_vm2, %v2673_v37 }
 0x114   :  { %116 = vst.msk [vmem:[#allocation4 + $0xd0] sm:$0xff] %vm25_vm2, %v2673_v37  ;;  %117 = vst.msk [vmem:[#allocation4 + $0xd8] sm:$0xff] %vm25_vm2, %v2673_v37 }
 0x115   :  { %118 = vst.msk [vmem:[#allocation4 + $0xe0] sm:$0xff] %vm25_vm2, %v2673_v37  ;;  %119 = vst.msk [vmem:[#allocation4 + $0xe8] sm:$0xff] %vm25_vm2, %v2673_v37 }
 0x116   :  { %120 = vst.msk [vmem:[#allocation4 + $0xf0] sm:$0xff] %vm25_vm2, %v2673_v37  ;;  %121 = vst.msk [vmem:[#allocation4 + $0xf8] sm:$0xff] %vm25_vm2, %v2673_v37 }
 0x117   :  { %vm553_vm8 = vmand %vm321_vm6, %vm489_vm4  ;;  %vm494_vm4 = vcmp.eq.s32.totalorder %v407_v11, %v2962_v35  ;;  %vm326_vm6 = vcmp.eq.s32.totalorder %v2929_v18, %v2967_v39  ;;  %v738_v11 = vadd.s32 152, %v2939_v24 }
 0x118   :  { %vm554_vm9 = vmand %vm322_vm7, %vm490_vm5  ;;  %v2442_v27 = vsel %vm553_vm8, 1.0, %v2673_v37  ;;  %vm325_vm5 = vcmp.eq.s32.totalorder %v2929_v18, %v2964_v36  ;;  %v736_v18 = vadd.s32 136, %v2939_v24 }
 0x119   :  { %v2443_v28 = vsel %vm554_vm9, 1.0, %v2673_v37  ;;  %vm555_vm15 = vmand %vm323_vm13, %vm491_vm10  ;;  %v1121_v5 = vmul.f32 %v2442_v27, %v2978_v44  ;;  %v1313_v43 = vmul.f32 %v2492_v30, %v2442_v27  ;;  %vm495_vm9 = vcmp.eq.s32.totalorder %v410_v38, %v2960_v34 }
 0x11a   :  { %vm556_vm0 = vmand %vm324_vm14, %vm492_vm12  ;;  %v1122_v31 = vmul.f32 %v2443_v28, %v2980_v45  ;;  %v1028_v40 = vadd.f32 %v2443_v28, %v2442_v27  ;;  %v1314_v46 = vmul.f32 0.0, %v2443_v28  ;;  %v2444_v15 = vsel %vm555_vm15, 1.0, %v2673_v37  ;;  %v3497_v28 = vpop.permute.xlu1 %424 }
 0x11b   :  { %v2445_v47 = vsel %vm556_vm0, 1.0, %v2673_v37  ;;  %vm3455_vm7 = vmand %vm325_vm5, %vm493_vm3  ;;  %v1123_v51 = vmul.f32 %v2444_v15, %v2978_v44  ;;  %vm824_vm10 = vcmp.lt.s32.totalorder %v3448_v49, %v735_v48  ;;  %v1315_v54 = vmul.f32 %v2493_v3, %v2444_v15 }
 0x11c   :  { %1029 = vadd.xlane.f32.xlu1 %v1028_v40  ;;  %v1199_v14 = vadd.f32 %v1122_v31, %v1121_v5  ;;  %v1391_v8 = vadd.f32 %v1314_v46, %v1313_v43  ;;  %v1124_v9 = vmul.f32 %v2445_v47, %v2980_v45  ;;  %vm558_vm8 = vmand %vm326_vm6, %vm494_vm4  ;;  %v1031_v53 = vadd.f32 %v2445_v47, %v2444_v15 }
 0x11d   :  { %v1316_v55 = vmul.f32 0.0, %v2445_v47  ;;  %vm327_vm12 = vcmp.eq.s32.totalorder %v2927_v17, %v2964_v36  ;;  %v2446_v56 = vsel %vm3455_vm7, 1.0, %v2673_v37  ;;  %v2447_v13 = vsel %vm558_vm8, 1.0, %v2673_v37  ;;  %v3518_v47 = vpop.permute.xlu0 %433 }
 0x11e   :  { %1200 = vadd.xlane.f32.xlu0 %v1199_v14  ;;  %v1202_v57 = vadd.f32 %v1124_v9, %v1123_v51  ;;  %vm328_vm13 = vcmp.eq.s32.totalorder %v2927_v17, %v2967_v39  ;;  %vm559_vm14 = vmand %vm327_vm12, %vm495_vm9  ;;  %v2494_v58 = vsel %vm824_vm10, 1.0, %v2673_v37  ;;  %v1125_v60 = vmul.f32 %v2446_v56, %v2978_v44  ;;  %v3514_v40 = vpop.permute.xlu1 %430 }
 0x11f   :  { %vm560_vm15 = vmand %vm328_vm13, %vm496_vm11  ;;  %v1394_v6 = vadd.f32 %v1316_v55, %v1315_v54  ;;  %v1126_v12 = vmul.f32 %v2447_v13, %v2980_v45  ;;  %v1034_v62 = vadd.f32 %v2447_v13, %v2446_v56  ;;  %v1318_v7 = vmul.f32 %v2494_v58, %v2447_v13 }
 0x120   :  { %1392 = vadd.xlane.f32.xlu1 %v1391_v8  ;;  %vm826_vm0 = vcmp.lt.s32.totalorder %v3448_v49, %v736_v18  ;;  %v2448_v17 = vsel %vm559_vm14, 1.0, %v2673_v37  ;;  %v2449_v63 = vsel %vm560_vm15, 1.0, %v2673_v37  ;;  %vm498_vm3 = vcmp.eq.s32.totalorder %v413_v42, %v2962_v35 }
 0x121   :  { %vm329_vm4 = vcmp.eq.s32.totalorder %v2933_v20, %v2964_v36  ;;  %v1205_v1 = vadd.f32 %v1126_v12, %v1125_v60  ;;  %v2495_v2 = vsel %vm826_vm0, 1.0, %v2673_v37  ;;  %vm330_vm5 = vcmp.eq.s32.totalorder %v2933_v20, %v2967_v39  ;;  %v3543_v54 = vpop.permute.xlu0 %271 }
 0x122   :  { %1032 = vadd.xlane.f32.xlu0 %v1031_v53  ;;  %vm3491_vm6 = vmand %vm329_vm4, %vm497_vm1  ;;  %v1397_v4 = vadd.f32 %v2446_v56, %v1318_v7  ;;  %v1127_v21 = vmul.f32 %v2448_v17, %v2978_v44  ;;  %v1128_v27 = vmul.f32 %v2449_v63, %v2980_v45  ;;  %vm499_vm8 = vcmp.eq.s32.totalorder %v416_v52, %v2960_v34  ;;  %v3539_v53 = vpop.permute.xlu1 %436 }
 0x123   :  { %vm562_vm7 = vmand %vm330_vm5, %vm498_vm3  ;;  %vm828_vm9 = vcmp.lt.s32.totalorder %v3448_v49, %v737_v0  ;;  %vm500_vm10 = vcmp.eq.s32.totalorder %v416_v52, %v2962_v35  ;;  %v1037_v20 = vadd.f32 %v2449_v63, %v2448_v17  ;;  %v1320_v30 = vmul.f32 %v2495_v2, %v2449_v63 }
 0x124   :  { %1203 = vadd.xlane.f32.xlu1 %v1202_v57  ;;  %vm331_vm11 = vcmp.eq.s32.totalorder %v2931_v19, %v2964_v36  ;;  %v2450_v10 = vsel %vm3491_vm6, 1.0, %v2673_v37  ;;  %v2451_v5 = vsel %vm562_vm7, 1.0, %v2673_v37  ;;  %v1208_v31 = vadd.f32 %v1128_v27, %v1127_v21 }
 0x125   :  { %vm332_vm12 = vcmp.eq.s32.totalorder %v2931_v19, %v2967_v39  ;;  %vm563_vm13 = vmand %vm331_vm11, %vm499_vm8  ;;  %v2496_v38 = vsel %vm828_vm9, 1.0, %v2673_v37  ;;  %v1400_v43 = vadd.f32 %v2448_v17, %v1320_v30  ;;  %v1129_v46 = vmul.f32 %v2450_v10, %v2978_v44 }
 0x126   :  { %1395 = vadd.xlane.f32.xlu0 %v1394_v6  ;;  %vm564_vm14 = vmand %vm332_vm12, %vm500_vm10  ;;  %v1130_v15 = vmul.f32 %v2451_v5, %v2980_v45  ;;  %v1040_v48 = vadd.f32 %v2451_v5, %v2450_v10  ;;  %v1322_v14 = vmul.f32 %v2496_v38, %v2451_v5  ;;  %vm830_vm15 = vcmp.lt.s32.totalorder %v3448_v49, %v738_v11  ;;  %v3558_v6 = vpop.permute.xlu1 %439 }
 0x127   :  { %vm501_vm0 = vcmp.eq.s32.totalorder %v3474_v59, %v2960_v34  ;;  %v2452_v19 = vsel %vm563_vm13, 1.0, %v2673_v37  ;;  %v2453_v3 = vsel %vm564_vm14, 1.0, %v2673_v37  ;;  %vm502_vm1 = vcmp.eq.s32.totalorder %v3474_v59, %v2962_v35 }
 0x128   :  { %1035 = vadd.xlane.f32.xlu1 %v1034_v62  ;;  %vm333_vm3 = vcmp.eq.s32.totalorder %v2937_v23, %v2964_v36  ;;  %v1211_v8 = vadd.f32 %v1130_v15, %v1129_v46  ;;  %v2497_v51 = vsel %vm830_vm15, 1.0, %v2673_v37  ;;  %vm334_vm4 = vcmp.eq.s32.totalorder %v2937_v23, %v2967_v39  ;;  %v3562_v62 = vpop.permute.xlu0 %274 }
 0x129   :  { %vm3533_vm5 = vmand %vm333_vm3, %vm501_vm0  ;;  %v1403_v42 = vadd.f32 %v2450_v10, %v1322_v14  ;;  %v1131_v52 = vmul.f32 %v2452_v19, %v2978_v44  ;;  %v1132_v18 = vmul.f32 %v2453_v3, %v2980_v45  ;;  %vm503_vm7 = vcmp.eq.s32.totalorder %v3478_v61, %v2960_v34 }
 0x12a   :  { %1206 = vadd.xlane.f32.xlu0 %v1205_v1  ;;  %vm566_vm6 = vmand %vm334_vm4, %vm502_vm1  ;;  %vm832_vm8 = vcmp.lt.s32.totalorder %v3448_v49, %v739_v50  ;;  %vm504_vm9 = vcmp.eq.s32.totalorder %v3478_v61, %v2962_v35  ;;  %v1043_v23 = vadd.f32 %v2453_v3, %v2452_v19  ;;  %v1324_v55 = vmul.f32 %v2497_v51, %v2453_v3  ;;  %v2617_v51 = vld [vmem:[%s4451_s0] sm:$0xff] }
 0x12b   :  { %v740_v56 = vadd.s32 168, %v2939_v24  ;;  %vm335_vm10 = vcmp.eq.s32.totalorder %v2935_v22, %v2964_v36  ;;  %v2454_v13 = vsel %vm3533_vm5, 1.0, %v2673_v37  ;;  %v2455_v57 = vsel %vm566_vm6, 1.0, %v2673_v37 }
 0x12c   :  { %1398 = vadd.xlane.f32.xlu1 %v1397_v4  ;;  %v1214_v58 = vadd.f32 %v1132_v18, %v1131_v52  ;;  %vm336_vm11 = vcmp.eq.s32.totalorder %v2935_v22, %v2967_v39  ;;  %vm567_vm12 = vmand %vm335_vm10, %vm503_vm7  ;;  %v2498_v59 = vsel %vm832_vm8, 1.0, %v2673_v37  ;;  %v1406_v60 = vadd.f32 %v2452_v19, %v1324_v55 }
 0x12d   :  { %vm568_vm13 = vmand %vm336_vm11, %vm504_vm9  ;;  %v1133_v12 = vmul.f32 %v2454_v13, %v2978_v44  ;;  %v1134_v61 = vmul.f32 %v2455_v57, %v2980_v45  ;;  %v1046_v7 = vadd.f32 %v2455_v57, %v2454_v13  ;;  %v1326_v17 = vmul.f32 %v2498_v59, %v2455_v57 }
 0x12e   :  { %1038 = vadd.xlane.f32.xlu0 %v1037_v20  ;;  %vm834_vm14 = vcmp.lt.s32.totalorder %v3448_v49, %v740_v56  ;;  %vm505_vm15 = vcmp.eq.s32.totalorder %v3497_v28, %v2960_v34  ;;  %v2456_v22 = vsel %vm567_vm12, 1.0, %v2673_v37  ;;  %v2457_v63 = vsel %vm568_vm13, 1.0, %v2673_v37  ;;  %v3587_v20 = vpop.permute.xlu0 %277 }
 0x12f   :  { %vm506_vm0 = vcmp.eq.s32.totalorder %v3497_v28, %v2962_v35  ;;  %v741_v0 = vadd.s32 176, %v2939_v24  ;;  %vm337_vm1 = vcmp.eq.s32.totalorder %v2943_v26, %v2964_v36  ;;  %v1217_v1 = vadd.f32 %v1134_v61, %v1133_v12  ;;  %v3583_v28 = vpop.permute.xlu1 %442 }
 0x130   :  { %1209 = vadd.xlane.f32.xlu1 %v1208_v31  ;;  %v2499_v2 = vsel %vm834_vm14, 1.0, %v2673_v37  ;;  %vm338_vm3 = vcmp.eq.s32.totalorder %v2943_v26, %v2967_v39  ;;  %vm3577_vm4 = vmand %vm337_vm1, %vm505_vm15  ;;  %v1409_v4 = vadd.f32 %v2454_v13, %v1326_v17  ;;  %v1135_v21 = vmul.f32 %v2456_v22, %v2978_v44 }
 0x131   :  { %v1136_v27 = vmul.f32 %v2457_v63, %v2980_v45  ;;  %vm570_vm5 = vmand %vm338_vm3, %vm506_vm0  ;;  %vm507_vm6 = vcmp.eq.s32.totalorder %v3500_v29, %v2960_v34  ;;  %vm836_vm7 = vcmp.lt.s32.totalorder %v3448_v49, %v741_v0  ;;  %vm508_vm8 = vcmp.eq.s32.totalorder %v3500_v29, %v2962_v35 }
 0x132   :  { %1401 = vadd.xlane.f32.xlu0 %v1400_v43  ;;  %v1049_v26 = vadd.f32 %v2457_v63, %v2456_v22  ;;  %v1328_v30 = vmul.f32 %v2499_v2, %v2457_v63  ;;  %v742_v11 = vadd.s32 184, %v2939_v24  ;;  %vm339_vm9 = vcmp.eq.s32.totalorder %v2941_v25, %v2964_v36 }
 0x133   :  { %v2458_v10 = vsel %vm3577_vm4, 1.0, %v2673_v37  ;;  %v2459_v5 = vsel %vm570_vm5, 1.0, %v2673_v37  ;;  %v1220_v31 = vadd.f32 %v1136_v27, %v1135_v21  ;;  %vm340_vm10 = vcmp.eq.s32.totalorder %v2941_v25, %v2967_v39  ;;  %vm571_vm11 = vmand %vm339_vm9, %vm507_vm6  ;;  %v3602_v38 = vpop.permute.xlu1 %445 }
 0x134   :  { %1041 = vadd.xlane.f32.xlu1 %v1040_v48  ;;  %v2500_v29 = vsel %vm836_vm7, 1.0, %v2673_v37  ;;  %vm572_vm12 = vmand %vm340_vm10, %vm508_vm8  ;;  %v1412_v43 = vadd.f32 %v2456_v22, %v1328_v30  ;;  %v1137_v46 = vmul.f32 %v2458_v10, %v2978_v44  ;;  %v1138_v15 = vmul.f32 %v2459_v5, %v2980_v45  ;;  %v3606_v48 = vpop.permute.xlu0 %280 }
 0x135   :  { %v1052_v14 = vadd.f32 %v2459_v5, %v2458_v10  ;;  %v1330_v19 = vmul.f32 %v2500_v29, %v2459_v5  ;;  %vm838_vm13 = vcmp.lt.s32.totalorder %v3448_v49, %v742_v11  ;;  %vm509_vm14 = vcmp.eq.s32.totalorder %v3514_v40, %v2960_v34  ;;  %v1510_v29 = vld [vmem:[#allocation3] sm:$0xff] }
 0x136   :  { %1212 = vadd.xlane.f32.xlu0 %v1211_v8  ;;  %v2460_v25 = vsel %vm571_vm11, 1.0, %v2673_v37  ;;  %v2461_v3 = vsel %vm572_vm12, 1.0, %v2673_v37  ;;  %v743_v50 = vadd.s32 192, %v2939_v24  ;;  %v2616_v8 = vld [vmem:[%s4451_s0 + $0x10] sm:$0xff]  ;;  %vm1737_vm0 = vcmp.ge.s32.totalorder %v2617_v51, 0 }
 0x137   :  { %vm1739_vm15 = vcmp.ge.s32.totalorder %v2616_v8, 0  ;;  %vm510_vm1 = vcmp.eq.s32.totalorder %v3514_v40, %v2962_v35  ;;  %v744_v9 = vadd.s32 200, %v2939_v24  ;;  %vm341_vm4 = vcmp.eq.s32.totalorder %v2958_v33, %v2964_v36  ;;  %v3656_v59 = vpop.permute.xlu1 %448 }
 0x138   :  { %1404 = vadd.xlane.f32.xlu1 %v1403_v42  ;;  %v2618_v42 = vld [vmem:[%s4451_s0 + $0x18] sm:$0xff]  ;;  %v1223_v52 = vadd.f32 %v1138_v15, %v1137_v46  ;;  %v2501_v18 = vsel %vm838_vm13, 1.0, %v2673_v37  ;;  %vm342_vm5 = vcmp.eq.s32.totalorder %v2958_v33, %v2967_v39  ;;  %vm3636_vm6 = vmand %vm341_vm4, %vm509_vm14  ;;  %v1415_v55 = vadd.f32 %v2458_v10, %v1330_v19  ;;  %v2619_v33 = vld [vmem:[%s4451_s0 + $0x8] sm:$0xff]  ;;  %v3664_v12 = vpop.permute.xlu0 %283 }
 0x139   :  { %vm1740_vm3 = vcmp.ge.s32.totalorder %v2618_v42, 0  ;;  %v1139_v56 = vmul.f32 %v2460_v25, %v2978_v44  ;;  %v1140_v13 = vmul.f32 %v2461_v3, %v2980_v45  ;;  %v3644_v57 = vsel %vm1739_vm15, 1.0, %v2673_v37  ;;  %vm3652_vm8 = vmand %vm342_vm5, %vm510_vm1 }
 0x13a   :  { %1044 = vadd.xlane.f32.xlu0 %v1043_v23  ;;  %vm1738_vm7 = vcmp.ge.s32.totalorder %v2619_v33, 0  ;;  %vm840_vm9 = vcmp.lt.s32.totalorder %v3448_v49, %v743_v50  ;;  %vm511_vm10 = vcmp.eq.s32.totalorder %v3518_v47, %v2960_v34  ;;  %vm842_vm11 = vcmp.lt.s32.totalorder %v3448_v49, %v744_v9 }
 0x13b   :  { %v3668_v40 = vadd.s32 216, %v2939_v24  ;;  %v3671_v61 = vadd.s32 224, %v2939_v24  ;;  %vm343_vm12 = vcmp.eq.s32.totalorder %v2956_v32, %v2964_v36  ;;  %vm512_vm13 = vcmp.eq.s32.totalorder %v3518_v47, %v2962_v35  ;;  %v3732_v30 = vpop.permute.xlu1 %451 }
 0x13c   :  { %1215 = vadd.xlane.f32.xlu1 %v1214_v58  ;;  %v1332_v17 = vmul.f32 %v2501_v18, %v2461_v3  ;;  %v2462_v22 = vsel %vm3636_vm6, 1.0, %v2673_v37  ;;  %v2463_v63 = vsel %vm3652_vm8, 1.0, %v2673_v37  ;;  %vm513_vm14 = vcmp.eq.s32.totalorder %v3539_v53, %v2960_v34  ;;  %vm3698_vm1 = vmand %vm343_vm12, %vm511_vm10 }
 0x13d   :  { %v1226_v0 = vadd.f32 %v1140_v13, %v1139_v56  ;;  %v3691_v2 = vsel %vm1740_vm3, 1.0, %v2673_v37  ;;  %vm344_vm15 = vcmp.eq.s32.totalorder %v2956_v32, %v2967_v39  ;;  %v3707_v21 = vsel %vm1738_vm7, 1.0, %v2673_v37  ;;  %v1253_v13 = vld [vmem:[#allocation2] sm:$0xff] }
 0x13e   :  { %1407 = vadd.xlane.f32.xlu0 %v1406_v60  ;;  %v3660_v60 = vadd.s32 208, %v2939_v24  ;;  %vm3714_vm3 = vmand %vm344_vm15, %vm512_vm13  ;;  %vm514_vm5 = vcmp.eq.s32.totalorder %v3539_v53, %v2962_v35  ;;  %v1418_v11 = vadd.f32 %v2460_v25, %v1332_v17  ;;  %v1141_v10 = vmul.f32 %v2462_v22, %v2978_v44 }
 0x13f   :  { %v1142_v5 = vmul.f32 %v2463_v63, %v2980_v45  ;;  %vm846_vm7 = vcmp.lt.s32.totalorder %v3448_v49, %v3668_v40  ;;  %vm848_vm8 = vcmp.lt.s32.totalorder %v3448_v49, %v3671_v61  ;;  %v3745_v46 = vsel %vm3698_vm1, 1.0, %v2673_v37 }
 0x140   :  { %1047 = vadd.xlane.f32.xlu1 %v1046_v7  ;;  %v1055_v7 = vadd.f32 %v2461_v3, %v2460_v25  ;;  %vm844_vm4 = vcmp.lt.s32.totalorder %v3448_v49, %v3660_v60  ;;  %v2465_v15 = vsel %vm3714_vm3, 1.0, %v2673_v37  ;;  %vm516_vm12 = vcmp.eq.s32.totalorder %v3558_v6, %v2962_v35  ;;  %v1606_v3 = vld [vmem:[#allocation4] sm:$0xff] }
 0x141   :  { %v3770_v53 = vadd.s32 240, %v2939_v24  ;;  %vm347_vm13 = vcmp.eq.s32.totalorder %v3543_v54, %v2964_v36  ;;  %v1229_v9 = vadd.f32 %v1142_v5, %v1141_v10  ;;  %v1143_v18 = vmul.f32 %v3745_v46, %v2978_v44 }
 0x142   :  { %1218 = vadd.xlane.f32.xlu0 %v1217_v1  ;;  %v3687_v1 = vsel %vm1737_vm0, 1.0, %v2673_v37  ;;  %vm345_vm0 = vcmp.eq.s32.totalorder %v2969_v41, %v2964_v36  ;;  %v1144_v23 = vmul.f32 %v2465_v15, %v2980_v45  ;;  %vm517_vm15 = vcmp.eq.s32.totalorder %v3583_v28, %v2960_v34 }
 0x143   :  { %vm3728_vm6 = vmand %vm345_vm0, %vm513_vm14  ;;  %vm348_vm14 = vcmp.eq.s32.totalorder %v3543_v54, %v2967_v39  ;;  %vm349_vm1 = vcmp.eq.s32.totalorder %v3562_v62, %v2964_v36  ;;  %vm518_vm3 = vcmp.eq.s32.totalorder %v3583_v28, %v2962_v35  ;;  %v1061_v16 = vadd.f32 %v2465_v15, %v3745_v46 }
 0x144   :  { %1410 = vadd.xlane.f32.xlu1 %v1409_v4  ;;  %v2502_v4 = vsel %vm840_vm9, 1.0, %v2673_v37  ;;  %vm346_vm9 = vcmp.eq.s32.totalorder %v2969_v41, %v2967_v39  ;;  %v3763_v41 = vsel %vm3728_vm6, 1.0, %v2673_v37  ;;  %vm519_vm6 = vcmp.eq.s32.totalorder %v3602_v38, %v2960_v34 }
 0x145   :  { %vm3756_vm10 = vmand %vm346_vm9, %vm514_vm5  ;;  %vm350_vm5 = vcmp.eq.s32.totalorder %v3562_v62, %v2967_v39  ;;  %vm351_vm9 = vcmp.eq.s32.totalorder %v3587_v20, %v2964_v36  ;;  %v1232_v32 = vadd.f32 %v1144_v23, %v1143_v18  ;;  %v2505_v5 = vsel %vm846_vm7, 1.0, %v2673_v37  ;;  %v1608_v23 = vld [vmem:[#allocation4 + $0x10] sm:$0xff] }
 0x146   :  { %1050 = vadd.xlane.f32.xlu0 %v1049_v26  ;;  %v2503_v26 = vsel %vm842_vm11, 1.0, %v2673_v37  ;;  %vm515_vm11 = vcmp.eq.s32.totalorder %v3558_v6, %v2960_v34  ;;  %v1145_v61 = vmul.f32 %v3763_v41, %v2978_v44  ;;  %vm521_vm7 = vcmp.eq.s32.totalorder %v3656_v59, %v2960_v34 }
 0x147   :  { %vm3793_vm0 = vmand %vm347_vm13, %vm515_vm11  ;;  %vm352_vm13 = vcmp.eq.s32.totalorder %v3587_v20, %v2967_v39 }
 0x148   :  { %1221 = vadd.xlane.f32.xlu1 %v1220_v31  ;;  %v1058_v31 = vadd.f32 %v2463_v63, %v2462_v22  ;;  %vm3823_vm11 = vmand %vm349_vm1, %vm517_vm15  ;;  %vm852_vm1 = vcmp.lt.s32.totalorder %v3448_v49, %v3770_v53  ;;  %v3853_v62 = vsel %vm3793_vm0, 1.0, %v2673_v37  ;;  %v1255_v53 = vld [vmem:[#allocation2 + $0x10] sm:$0xff] }
 0x149   :  { %v988_v27 = vpop.xlane.xlu0 %987 }
 0x14a   :  { %1413 = vadd.xlane.f32.xlu0 %v1412_v43  ;;  %v1334_v43 = vmul.f32 %v2502_v4, %v2463_v63  ;;  %v1336_v4 = vmul.f32 %v2503_v26, %v2465_v15 }
 0x14c   :  { %1053 = vadd.xlane.f32.xlu1 %v1052_v14  ;;  %v3751_v14 = vadd.s32 232, %v2939_v24  ;;  %v1421_v42 = vadd.f32 %v2462_v22, %v1334_v43  ;;  %v1424_v15 = vadd.f32 %v3745_v46, %v1336_v4  ;;  %v3905_v46 = vsel %vm852_vm1, 1.0, %v2673_v37  ;;  %v1513_v4 = vld [vmem:[#allocation3 + $0x18] sm:$0xff] }
 0x14d   :  { %v1159_v25 = vpop.xlane.xlu0 %1158  ;;  %v991_v50 = vpop.xlane.xlu1 %990 }
 0x14e   :  { %1224 = vadd.xlane.f32.xlu0 %v1223_v52  ;;  %v1542_v8 = vadd.f32 %v1510_v29, %v1159_v25  ;;  %v1638_v51 = vsub.f32 %v988_v27, %v1159_v25  ;;  %v1511_v52 = vld [vmem:[#allocation3 + $0x8] sm:$0xff]  ;;  %vm850_vm15 = vcmp.lt.s32.totalorder %v3448_v49, %v3751_v14  ;;  %v1512_v25 = vld [vmem:[#allocation3 + $0x10] sm:$0xff] }
 0x14f   :  { %v1254_v27 = vld [vmem:[#allocation2 + $0x8] sm:$0xff]  ;;  %v3899_v20 = vsel %vm850_vm15, 1.0, %v2673_v37 }
 0x150   :  { %1416 = vadd.xlane.f32.xlu1 %v1415_v55  ;;  %v2467_v55 = vsel %vm3756_vm10, 1.0, %v2673_v37  ;;  %1574 = vst.msk [vmem:[#allocation3] sm:$0xff] %vm25_vm2, %v1542_v8  ;;  %v1670_v56 = vadd.f32 %v1638_v51, %v1606_v3  ;;  %vm3811_vm10 = vmand %vm348_vm14, %vm516_vm12  ;;  %vm520_vm12 = vcmp.eq.s32.totalorder %v3602_v38, %v2962_v35  ;;  %v3924_v51 = vadd.s32 248, %v2939_v24 }
 0x151   :  { %v1162_v58 = vpop.xlane.xlu0 %1161  ;;  %v1351_v22 = vpop.xlane.xlu1 %1350  ;;  %vm3837_vm14 = vmand %vm350_vm5, %vm518_vm3  ;;  %v2469_v28 = vsel %vm3811_vm10, 1.0, %v2673_v37  ;;  %v1146_v19 = vmul.f32 %v2467_v55, %v2980_v45  ;;  %v1064_v38 = vadd.f32 %v2467_v55, %v3763_v41  ;;  %vm522_vm3 = vcmp.eq.s32.totalorder %v3656_v59, %v2962_v35 }
 0x152   :  { %1056 = vadd.xlane.f32.xlu0 %v1055_v7  ;;  %v1607_v7 = vld [vmem:[#allocation4 + $0x8] sm:$0xff]  ;;  %1702 = vst.msk [vmem:[#allocation4] sm:$0xff] %vm25_vm2, %v1670_v56  ;;  %v1543_v63 = vadd.f32 %v1511_v52, %v1162_v58  ;;  %v1445_v6 = vadd.f32 %v1351_v22, %v1253_v13  ;;  %vm3885_vm0 = vmand %vm352_vm13, %vm520_vm12  ;;  %v3915_v8 = vsel %vm3837_vm14, 1.0, %v2673_v37  ;;  %v1148_v56 = vmul.f32 %v2469_v28, %v2980_v45 }
 0x153   :  { %vm353_vm5 = vcmp.eq.s32.totalorder %v3606_v48, %v2964_v36  ;;  %vm524_vm14 = vcmp.eq.s32.totalorder %v3732_v30, %v2962_v35  ;;  %v4067_v35 = vld [vmem:[%s4451_s0 + $0x28] sm:$0xff] }
 0x154   :  { %1227 = vadd.xlane.f32.xlu1 %v1226_v0  ;;  %v1639_v0 = vsub.f32 %v991_v50, %v1162_v58  ;;  %1575 = vst.msk [vmem:[#allocation3 + $0x8] sm:$0xff] %vm25_vm2, %v1543_v63  ;;  %1478 = vst.msk [vmem:[#allocation2] sm:$0xff] %vm25_vm2, %v1445_v6  ;;  %v3910_v50 = vsel %vm3823_vm11, 1.0, %v2673_v37  ;;  %vm355_vm11 = vcmp.eq.s32.totalorder %v3664_v12, %v2964_v36  ;;  %v1610_v36 = vld [vmem:[#allocation4 + $0x20] sm:$0xff] }
 0x155   :  { %v1354_v10 = vpop.xlane.xlu0 %1353  ;;  %v994_v40 = vpop.xlane.xlu1 %993 }
 0x156   :  { %1419 = vadd.xlane.f32.xlu0 %v1418_v11  ;;  %v1671_v47 = vadd.f32 %v1639_v0, %v1607_v7  ;;  %v2504_v11 = vsel %vm844_vm4, 1.0, %v2673_v37  ;;  %vm3864_vm4 = vmand %vm351_vm9, %vm519_vm6  ;;  %v1446_v43 = vadd.f32 %v1354_v10, %v1254_v27  ;;  %v1235_v7 = vadd.f32 %v1146_v19, %v1145_v61 }
 0x157   :  { %v1338_v3 = vmul.f32 %v2504_v11, %v2467_v55  ;;  %v3920_v14 = vsel %vm3864_vm4, 1.0, %v2673_v37  ;;  %v1147_v55 = vmul.f32 %v3853_v62, %v2978_v44  ;;  %vm354_vm6 = vcmp.eq.s32.totalorder %v3606_v48, %v2967_v39  ;;  %v1609_v11 = vld [vmem:[#allocation4 + $0x18] sm:$0xff]  ;;  %v1516_v48 = vld [vmem:[#allocation3 + $0x30] sm:$0xff] }
 0x158   :  { %1059 = vadd.xlane.f32.xlu1 %v1058_v31  ;;  %v3877_v31 = vsel %vm848_vm8, 1.0, %v2673_v37  ;;  %1703 = vst.msk [vmem:[#allocation4 + $0x8] sm:$0xff] %vm25_vm2, %v1671_v47  ;;  %1479 = vst.msk [vmem:[#allocation2 + $0x8] sm:$0xff] %vm25_vm2, %v1446_v43  ;;  %vm523_vm9 = vcmp.eq.s32.totalorder %v3732_v30, %v2960_v34  ;;  %v1340_v27 = vmul.f32 %v2505_v5, %v2469_v28  ;;  %v1256_v5 = vld [vmem:[#allocation2 + $0x18] sm:$0xff] }
 0x159   :  { %v2025_v52 = vld [vmem:[#allocation4] sm:$0xff]  ;;  %v1165_v18 = vpop.xlane.xlu0 %1164  ;;  %v1357_v13 = vpop.xlane.xlu1 %1356  ;;  %v1427_v22 = vadd.f32 %v3763_v41, %v1338_v3  ;;  %v1238_v60 = vadd.f32 %v1148_v56, %v1147_v55  ;;  %v1342_v10 = vmul.f32 %v3877_v31, %v3915_v8  ;;  %v1149_v31 = vmul.f32 %v3910_v50, %v2978_v44 }
 0x15a   :  { %1230 = vadd.xlane.f32.xlu0 %v1229_v9  ;;  %v3929_v9 = vsel %vm3885_vm0, 1.0, %v2673_v37  ;;  %vm2057_vm8 = vcmp.gt.f32.partialorder %v2025_v52, 0.0  ;;  %v1544_v33 = vadd.f32 %v1512_v25, %v1165_v18  ;;  %v1640_v58 = vsub.f32 %v994_v40, %v1165_v18  ;;  %v3984_v55 = vld [vmem:[%s4451_s0 + $0x20] sm:$0xff] }
 0x15b   :  { %v1447_v17 = vadd.f32 %v1357_v13, %v1255_v53  ;;  %v1833_v63 = vld [vmem:[#allocation2] sm:$0xff]  ;;  %v1962_v0 = vld [vmem:[#allocation3 + $0x8] sm:$0xff]  ;;  %v1070_v18 = vadd.f32 %v3915_v8, %v3910_v50  ;;  %v1433_v13 = vadd.f32 %v3910_v50, %v1342_v10 }
 0x15c   :  { %1422 = vadd.xlane.f32.xlu1 %v1421_v42  ;;  %v1961_v42 = vld [vmem:[#allocation3] sm:$0xff]  ;;  %1576 = vst.msk [vmem:[#allocation3 + $0x10] sm:$0xff] %vm25_vm2, %v1544_v33  ;;  %vm1865_vm13 = vcmp.eq.f32.partialorder %v1833_v63, 0.0  ;;  %vm1994_vm1 = vcmp.gt.f32.partialorder %v1962_v0, 0.0  ;;  %v1151_v33 = vmul.f32 %v3920_v14, %v2978_v44 }
 0x15d   :  { %vm1993_vm10 = vcmp.gt.f32.partialorder %v1961_v42, 0.0  ;;  %1480 = vst.msk [vmem:[#allocation2 + $0x10] sm:$0xff] %vm25_vm2, %v1447_v17  ;;  %v997_v6 = vpop.xlane.xlu0 %996  ;;  %v2543_v26 = vsel %vm1865_vm13, 1.0, %v2673_v37  ;;  %v1168_v47 = vpop.xlane.xlu1 %1167  ;;  %v1514_v56 = vld [vmem:[#allocation3 + $0x20] sm:$0xff] }
 0x15e   :  { %1062 = vadd.xlane.f32.xlu0 %v1061_v16  ;;  %v1672_v16 = vadd.f32 %v1640_v58, %v1608_v23  ;;  %vm3949_vm12 = vmand %vm1993_vm10, %vm2057_vm8  ;;  %v2185_v29 = vmul.f32 %v2543_v26, %v3687_v1  ;;  %v1545_v43 = vadd.f32 %v1513_v4, %v1168_v47  ;;  %v1150_v1 = vmul.f32 %v3915_v8, %v2980_v45  ;;  %v1257_v0 = vld [vmem:[#allocation2 + $0x20] sm:$0xff] }
 0x15f   :  { %v2026_v54 = vld [vmem:[#allocation4 + $0x8] sm:$0xff]  ;;  %vm356_vm8 = vcmp.eq.s32.totalorder %v3664_v12, %v2967_v39  ;;  %v1430_v23 = vadd.f32 %v3853_v62, %v1340_v27  ;;  %vm1741_vm10 = vcmp.ge.s32.totalorder %v3984_v55, 0  ;;  %v1152_v58 = vmul.f32 %v3929_v9, %v2980_v45 }
 0x160   :  { %1233 = vadd.xlane.f32.xlu1 %v1232_v32  ;;  %v1067_v32 = vadd.f32 %v2469_v28, %v3853_v62  ;;  %vm2058_vm15 = vcmp.gt.f32.partialorder %v2026_v54, 0.0  ;;  %1704 = vst.msk [vmem:[#allocation4 + $0x10] sm:$0xff] %vm25_vm2, %v1672_v16  ;;  %v1834_v40 = vld [vmem:[#allocation2 + $0x8] sm:$0xff]  ;;  %v1641_v28 = vsub.f32 %v997_v6, %v1168_v47  ;;  %1577 = vst.msk [vmem:[#allocation3 + $0x18] sm:$0xff] %vm25_vm2, %v1545_v43  ;;  %v2249_v17 = vsel %vm25_vm2, %v2185_v29, 0.0 }
 0x161   :  { %vm3965_vm4 = vmand %vm1994_vm1, %vm2058_vm15  ;;  %vm1866_vm0 = vcmp.eq.f32.partialorder %v1834_v40, 0.0  ;;  %v1360_v3 = vpop.xlane.xlu0 %1359  ;;  %v1000_v42 = vpop.xlane.xlu1 %999  ;;  %v1241_v16 = vadd.f32 %v1150_v1, %v1149_v31 }
 0x162   :  { %1425 = vadd.xlane.f32.xlu0 %v1424_v15  ;;  %v2575_v15 = vsel %vm3949_vm12, 1.0, %v2673_v37  ;;  %v1673_v25 = vadd.f32 %v1641_v28, %v1609_v11  ;;  %v1448_v52 = vadd.f32 %v1360_v3, %v1256_v5  ;;  %vm3993_vm12 = vmand %vm353_vm5, %vm521_vm7  ;;  %v2576_v62 = vsel %vm3965_vm4, 1.0, %v2673_v37  ;;  %v1515_v28 = vld [vmem:[#allocation3 + $0x28] sm:$0xff] }
 0x163   :  { %v2217_v19 = vmul.f32 %v2575_v15, %v2185_v29  ;;  %v1963_v8 = vld [vmem:[#allocation3 + $0x10] sm:$0xff]  ;;  %vm4012_vm7 = vmand %vm354_vm6, %vm522_vm3  ;;  %vm854_vm5 = vcmp.lt.s32.totalorder %v3448_v49, %v3924_v51  ;;  %v4038_v10 = vsel %vm3993_vm12, 1.0, %v2673_v37  ;;  %v1344_v3 = vmul.f32 %v3899_v20, %v3929_v9 }
 0x164   :  { %1065 = vadd.xlane.f32.xlu1 %v1064_v38  ;;  %v2544_v38 = vsel %vm1866_vm0, 1.0, %v2673_v37  ;;  %1705 = vst.msk [vmem:[#allocation4 + $0x18] sm:$0xff] %vm25_vm2, %v1673_v25  ;;  %v1835_v63 = vld [vmem:[#allocation2 + $0x10] sm:$0xff]  ;;  %1481 = vst.msk [vmem:[#allocation2 + $0x18] sm:$0xff] %vm25_vm2, %v1448_v52  ;;  %vm1995_vm13 = vcmp.gt.f32.partialorder %v1963_v8, 0.0  ;;  %v2475_v29 = vsel %vm4012_vm7, 1.0, %v2673_v37  ;;  %v1244_v25 = vadd.f32 %v1152_v58, %v1151_v33 }
 0x165   :  { %v2186_v53 = vmul.f32 %v2544_v38, %v3707_v21  ;;  %vm4027_vm3 = vmand %vm355_vm11, %vm523_vm9  ;;  %v2321_v59 = vsel %vm25_vm2, %v2217_v19, 0.0  ;;  %vm1867_vm6 = vcmp.eq.f32.partialorder %v1835_v63, 0.0  ;;  %v1171_v54 = vpop.xlane.xlu0 %1170  ;;  %v1363_v34 = vpop.xlane.xlu1 %1362  ;;  %v1073_v19 = vadd.f32 %v3929_v9, %v3920_v14  ;;  %v1611_v38 = vld [vmem:[#allocation4 + $0x28] sm:$0xff]  ;;  %v1612_v49 = vld [vmem:[#allocation4 + $0x30] sm:$0xff] }
 0x166   :  { %1236 = vadd.xlane.f32.xlu0 %v1235_v7  ;;  %v1546_v27 = vadd.f32 %v1514_v56, %v1171_v54  ;;  %v1449_v11 = vadd.f32 %v1363_v34, %v1257_v0  ;;  %v4046_v40 = vsel %vm4027_vm3, 1.0, %v2673_v37  ;;  %vm4056_vm11 = vmand %vm356_vm8, %vm524_vm14  ;;  %vm1742_vm14 = vcmp.ge.s32.totalorder %v4067_v35, 0 }
 0x167   :  { %v2250_v50 = vsel %vm25_vm2, %v2186_v53, 0.0  ;;  %v2027_v41 = vld [vmem:[#allocation4 + $0x10] sm:$0xff]  ;;  %v4077_v21 = vsel %vm4056_vm11, 1.0, %v2673_v37  ;;  %v1346_v20 = vmul.f32 %v3905_v46, %v2475_v29  ;;  %v1153_v33 = vmul.f32 %v4038_v10, %v2978_v44 }
 0x168   :  { %1428 = vadd.xlane.f32.xlu1 %v1427_v22  ;;  %v2218_v22 = vmul.f32 %v2576_v62, %v2186_v53  ;;  %v2251_v4 = vadd.f32 %v2250_v50, %v2249_v17  ;;  %vm2059_vm15 = vcmp.gt.f32.partialorder %v2027_v41, 0.0  ;;  %1578 = vst.msk [vmem:[#allocation3 + $0x20] sm:$0xff] %vm25_vm2, %v1546_v27  ;;  %1482 = vst.msk [vmem:[#allocation2 + $0x20] sm:$0xff] %vm25_vm2, %v1449_v11  ;;  %v2515_v7 = vsel %vm1741_vm10, 1.0, %v2673_v37  ;;  %v1259_v41 = vld [vmem:[#allocation2 + $0x30] sm:$0xff] }
 0x169   :  { %vm2091_vm9 = vmand %vm1995_vm13, %vm2059_vm15  ;;  %v1003_v1 = vpop.xlane.xlu0 %1002  ;;  %v1174_v30 = vpop.xlane.xlu1 %1173  ;;  %v1154_v58 = vmul.f32 %v2475_v29, %v2980_v45  ;;  %v1436_v50 = vadd.f32 %v3920_v14, %v1344_v3  ;;  %v1155_v55 = vmul.f32 %v4046_v40, %v2978_v44 }
 0x16a   :  { %1068 = vadd.xlane.f32.xlu0 %v1067_v32  ;;  %v2322_v6 = vsel %vm25_vm2, %v2218_v22, 0.0  ;;  %v2545_v32 = vsel %vm1867_vm6, 1.0, %v2673_v37  ;;  %v2577_v43 = vsel %vm2091_vm9, 1.0, %v2673_v37  ;;  %v1547_v52 = vadd.f32 %v1515_v28, %v1174_v30 }
 0x16b   :  { %v2323_v26 = vadd.f32 %v2322_v6, %v2321_v59  ;;  %v2187_v47 = vmul.f32 %v2545_v32, %v3644_v57  ;;  %v1964_v57 = vld [vmem:[#allocation3 + $0x18] sm:$0xff]  ;;  %v1156_v6 = vmul.f32 %v4077_v21, %v2980_v45  ;;  %v1247_v51 = vadd.f32 %v1154_v58, %v1153_v33 }
 0x16c   :  { %1239 = vadd.xlane.f32.xlu1 %v1238_v60  ;;  %v1642_v60 = vsub.f32 %v1000_v42, %v1171_v54  ;;  %vm1996_vm1 = vcmp.gt.f32.partialorder %v1964_v57, 0.0  ;;  %v2028_v12 = vld [vmem:[#allocation4 + $0x18] sm:$0xff]  ;;  %1579 = vst.msk [vmem:[#allocation3 + $0x28] sm:$0xff] %vm25_vm2, %v1547_v52  ;;  %v1439_v54 = vadd.f32 %v4038_v10, %v1346_v20  ;;  %v2516_v28 = vsel %vm1742_vm14, 1.0, %v2673_v37 }
 0x16d   :  { %v2252_v15 = vsel %vm25_vm2, %v2187_v47, 0.0  ;;  %v2219_v61 = vmul.f32 %v2577_v43, %v2187_v47  ;;  %vm2060_vm4 = vcmp.gt.f32.partialorder %v2028_v12, 0.0  ;;  %v1836_v42 = vld [vmem:[#allocation2 + $0x18] sm:$0xff]  ;;  %v1006_v22 = vpop.xlane.xlu1 %1005  ;;  %v1250_v35 = vadd.f32 %v1156_v6, %v1155_v55 }
 0x16e   :  { %1431 = vadd.xlane.f32.xlu0 %v1430_v23  ;;  %v1674_v31 = vadd.f32 %v1642_v60, %v1610_v36  ;;  %v2253_v39 = vadd.f32 %v2252_v15, %v2251_v4  ;;  %v1258_v23 = vld [vmem:[#allocation2 + $0x28] sm:$0xff]  ;;  %vm4080_vm0 = vmand %vm1996_vm1, %vm2060_vm4  ;;  %vm1868_vm8 = vcmp.eq.f32.partialorder %v1836_v42, 0.0  ;;  %v1517_v57 = vld [vmem:[#allocation3 + $0x38] sm:$0xff] }
 0x16f   :  { %v2324_v53 = vsel %vm25_vm2, %v2219_v61, 0.0  ;;  %v2546_v9 = vsel %vm1868_vm8, 1.0, %v2673_v37  ;;  %v2578_v63 = vsel %vm4080_vm0, 1.0, %v2673_v37  ;;  %v1965_v0 = vld [vmem:[#allocation3 + $0x20] sm:$0xff]  ;;  %v1260_v42 = vld [vmem:[#allocation2 + $0x38] sm:$0xff] }
 0x170   :  { %1071 = vadd.xlane.f32.xlu1 %v1070_v18  ;;  %1706 = vst.msk [vmem:[#allocation4 + $0x20] sm:$0xff] %vm25_vm2, %v1674_v31  ;;  %v1643_v18 = vsub.f32 %v1003_v1, %v1174_v30  ;;  %v2325_v62 = vadd.f32 %v2324_v53, %v2323_v26  ;;  %v2188_v17 = vmul.f32 %v2546_v9, %v3691_v2  ;;  %v2509_v2 = vsel %vm854_vm5, 1.0, %v2673_v37  ;;  %v1837_v4 = vld [vmem:[#allocation2 + $0x20] sm:$0xff]  ;;  %v1613_v30 = vld [vmem:[#allocation4 + $0x38] sm:$0xff] }
 0x171   :  { %vm1869_vm10 = vcmp.eq.f32.partialorder %v1837_v4, 0.0  ;;  %vm1997_vm12 = vcmp.gt.f32.partialorder %v1965_v0, 0.0  ;;  %v1369_v26 = vpop.xlane.xlu1 %1368  ;;  %v1079_v31 = vadd.f32 %v4077_v21, %v4046_v40  ;;  %v1614_v4 = vld [vmem:[#allocation4 + $0x40] sm:$0xff] }
 0x172   :  { %1242 = vadd.xlane.f32.xlu0 %v1241_v16  ;;  %v1675_v56 = vadd.f32 %v1643_v18, %v1611_v38  ;;  %v1076_v16 = vadd.f32 %v2475_v29, %v4038_v10  ;;  %v2220_v59 = vmul.f32 %v2578_v63, %v2188_v17  ;;  %v2254_v14 = vsel %vm25_vm2, %v2188_v17, 0.0  ;;  %v2622_v18 = vld [vmem:[%s4451_s0 + $0x30] sm:$0xff]  ;;  %v1261_v63 = vld [vmem:[#allocation2 + $0x40] sm:$0xff] }
 0x173   :  { %v2255_v32 = vadd.f32 %v2254_v14, %v2253_v39  ;;  %v2547_v27 = vsel %vm1869_vm10, 1.0, %v2673_v37  ;;  %v1451_v29 = vadd.f32 %v1369_v26, %v1259_v41  ;;  %v1966_v45 = vld [vmem:[#allocation3 + $0x28] sm:$0xff]  ;;  %v1348_v38 = vmul.f32 %v2509_v2, %v4077_v21 }
 0x174   :  { %1434 = vadd.xlane.f32.xlu1 %v1433_v13  ;;  %v1366_v13 = vpop.xlane.xlu0 %1365  ;;  %1707 = vst.msk [vmem:[#allocation4 + $0x28] sm:$0xff] %vm25_vm2, %v1675_v56  ;;  %v2326_v34 = vsel %vm25_vm2, %v2220_v59, 0.0  ;;  %v2189_v10 = vmul.f32 %v2547_v27, %v2515_v7  ;;  %vm1998_vm3 = vcmp.gt.f32.partialorder %v1966_v45, 0.0  ;;  %vm1743_vm9 = vcmp.ge.s32.totalorder %v2622_v18, 0  ;;  %v1518_v7 = vld [vmem:[#allocation3 + $0x40] sm:$0xff]  ;;  %v1263_v18 = vld [vmem:[#allocation2 + $0x50] sm:$0xff] }
 0x175   :  { %v1450_v46 = vadd.f32 %v1366_v13, %v1258_v23  ;;  %v2327_v60 = vadd.f32 %v2326_v34, %v2325_v62  ;;  %1484 = vst.msk [vmem:[#allocation2 + $0x30] sm:$0xff] %vm25_vm2, %v1451_v29  ;;  %v1180_v12 = vpop.xlane.xlu1 %1179  ;;  %v1442_v13 = vadd.f32 %v4046_v40, %v1348_v38  ;;  %v2517_v17 = vsel %vm1743_vm9, 1.0, %v2673_v37  ;;  %v2623_v40 = vld [vmem:[%s4451_s0 + $0x38] sm:$0xff]  ;;  %v1615_v29 = vld [vmem:[#allocation4 + $0x48] sm:$0xff] }
 0x176   :  { %1074 = vadd.xlane.f32.xlu0 %v1073_v19  ;;  %v2256_v5 = vsel %vm25_vm2, %v2189_v10, 0.0  ;;  %v1549_v3 = vadd.f32 %v1517_v57, %v1180_v12  ;;  %vm1744_vm11 = vcmp.ge.s32.totalorder %v2623_v40, 0 }
 0x177   :  { %1483 = vst.msk [vmem:[#allocation2 + $0x28] sm:$0xff] %vm25_vm2, %v1450_v46  ;;  %v2029_v36 = vld [vmem:[#allocation4 + $0x20] sm:$0xff]  ;;  %v2257_v1 = vadd.f32 %v2256_v5, %v2255_v32  ;;  %v1262_v5 = vld [vmem:[#allocation2 + $0x48] sm:$0xff] }
 0x178   :  { %1245 = vadd.xlane.f32.xlu1 %v1244_v25  ;;  %v1177_v44 = vpop.xlane.xlu0 %1176  ;;  %vm2061_vm7 = vcmp.gt.f32.partialorder %v2029_v36, 0.0  ;;  %1581 = vst.msk [vmem:[#allocation3 + $0x38] sm:$0xff] %vm25_vm2, %v1549_v3 }
 0x179   :  { %v1548_v47 = vadd.f32 %v1516_v48, %v1177_v44  ;;  %v1644_v11 = vsub.f32 %v1006_v22, %v1177_v44  ;;  %vm2093_vm5 = vmand %vm1997_vm12, %vm2061_vm7  ;;  %v1012_v9 = vpop.xlane.xlu1 %1011 }
 0x17a   :  { %1437 = vadd.xlane.f32.xlu0 %v1436_v50  ;;  %v2579_v15 = vsel %vm2093_vm5, 1.0, %v2673_v37 }
 0x17b   :  { %1580 = vst.msk [vmem:[#allocation3 + $0x30] sm:$0xff] %vm25_vm2, %v1548_v47  ;;  %v1676_v43 = vadd.f32 %v1644_v11, %v1612_v49  ;;  %v2221_v19 = vmul.f32 %v2579_v15, %v2189_v10  ;;  %v2030_v39 = vld [vmem:[#allocation4 + $0x28] sm:$0xff]  ;;  %v2518_v47 = vsel %vm1744_vm11, 1.0, %v2673_v37 }
 0x17c   :  { %1077 = vadd.xlane.f32.xlu1 %v1076_v16  ;;  %v1009_v61 = vpop.xlane.xlu0 %1008  ;;  %vm2062_vm6 = vcmp.gt.f32.partialorder %v2030_v39, 0.0  ;;  %v1839_v50 = vld [vmem:[#allocation2 + $0x30] sm:$0xff] }
 0x17d   :  { %1708 = vst.msk [vmem:[#allocation4 + $0x30] sm:$0xff] %vm25_vm2, %v1676_v43  ;;  %v1645_v53 = vsub.f32 %v1009_v61, %v1180_v12  ;;  %v2328_v52 = vsel %vm25_vm2, %v2221_v19, 0.0  ;;  %vm2094_vm13 = vmand %vm1998_vm3, %vm2062_vm6  ;;  %vm1871_vm14 = vcmp.eq.f32.partialorder %v1839_v50, 0.0  ;;  %v1375_v59 = vpop.xlane.xlu1 %1374  ;;  %v2624_v61 = vld [vmem:[%s4451_s0 + $0x40] sm:$0xff] }
 0x17e   :  { %1248 = vadd.xlane.f32.xlu0 %v1247_v51  ;;  %v1838_v25 = vld [vmem:[#allocation2 + $0x28] sm:$0xff]  ;;  %v2329_v23 = vadd.f32 %v2328_v52, %v2327_v60  ;;  %v2580_v33 = vsel %vm2094_vm13, 1.0, %v2673_v37  ;;  %v2549_v2 = vsel %vm1871_vm14, 1.0, %v2673_v37  ;;  %v1453_v6 = vadd.f32 %v1375_v59, %v1261_v63  ;;  %v1521_v63 = vld [vmem:[#allocation3 + $0x58] sm:$0xff] }
 0x17f   :  { %vm1870_vm15 = vcmp.eq.f32.partialorder %v1838_v25, 0.0  ;;  %v1677_v21 = vadd.f32 %v1645_v53, %v1613_v30  ;;  %v1968_v49 = vld [vmem:[#allocation3 + $0x38] sm:$0xff]  ;;  %v1519_v51 = vld [vmem:[#allocation3 + $0x48] sm:$0xff]  ;;  %vm1745_vm5 = vcmp.ge.s32.totalorder %v2624_v61, 0  ;;  %v1520_v25 = vld [vmem:[#allocation3 + $0x50] sm:$0xff] }
 0x180   :  { %1440 = vadd.xlane.f32.xlu1 %v1439_v54  ;;  %v2548_v62 = vsel %vm1870_vm15, 1.0, %v2673_v37  ;;  %v1372_v8 = vpop.xlane.xlu0 %1371  ;;  %v2191_v54 = vmul.f32 %v2549_v2, %v2517_v17  ;;  %1486 = vst.msk [vmem:[#allocation2 + $0x40] sm:$0xff] %vm25_vm2, %v1453_v6  ;;  %vm2000_vm8 = vcmp.gt.f32.partialorder %v1968_v49, 0.0  ;;  %v2519_v3 = vsel %vm1745_vm5, 1.0, %v2673_v37  ;;  %v2626_v49 = vld [vmem:[%s4451_s0 + $0x50] sm:$0xff] }
 0x181   :  { %v2190_v20 = vmul.f32 %v2548_v62, %v2516_v28  ;;  %v1452_v56 = vadd.f32 %v1372_v8, %v1260_v42  ;;  %1709 = vst.msk [vmem:[#allocation4 + $0x38] sm:$0xff] %vm25_vm2, %v1677_v21  ;;  %v1186_v10 = vpop.xlane.xlu1 %1185  ;;  %v1616_v8 = vld [vmem:[#allocation4 + $0x50] sm:$0xff] }
 0x182   :  { %1080 = vadd.xlane.f32.xlu0 %v1079_v31  ;;  %v1967_v58 = vld [vmem:[#allocation3 + $0x30] sm:$0xff]  ;;  %v2260_v34 = vsel %vm25_vm2, %v2191_v54, 0.0  ;;  %v1551_v57 = vadd.f32 %v1519_v51, %v1186_v10 }
 0x183   :  { %v2222_v22 = vmul.f32 %v2580_v33, %v2190_v20  ;;  %v2258_v46 = vsel %vm25_vm2, %v2190_v20, 0.0  ;;  %1485 = vst.msk [vmem:[#allocation2 + $0x38] sm:$0xff] %vm25_vm2, %v1452_v56  ;;  %vm1999_vm1 = vcmp.gt.f32.partialorder %v1967_v58, 0.0 }
 0x184   :  { %1251 = vadd.xlane.f32.xlu1 %v1250_v35  ;;  %v2259_v0 = vadd.f32 %v2258_v46, %v2257_v1  ;;  %v2031_v16 = vld [vmem:[#allocation4 + $0x30] sm:$0xff]  ;;  %v1183_v48 = vpop.xlane.xlu0 %1182  ;;  %1583 = vst.msk [vmem:[#allocation3 + $0x48] sm:$0xff] %vm25_vm2, %v1551_v57 }
 0x185   :  { %v2330_v55 = vsel %vm25_vm2, %v2222_v22, 0.0  ;;  %vm2063_vm4 = vcmp.gt.f32.partialorder %v2031_v16, 0.0  ;;  %v1550_v14 = vadd.f32 %v1518_v7, %v1183_v48  ;;  %v1646_v32 = vsub.f32 %v1012_v9, %v1183_v48  ;;  %v1018_v12 = vpop.xlane.xlu1 %1017 }
 0x186   :  { %1443 = vadd.xlane.f32.xlu0 %v1442_v13  ;;  %v2331_v41 = vadd.f32 %v2330_v55, %v2329_v23  ;;  %vm2095_vm0 = vmand %vm1999_vm1, %vm2063_vm4  ;;  %v2261_v11 = vadd.f32 %v2260_v34, %v2259_v0  ;;  %v2625_v23 = vld [vmem:[%s4451_s0 + $0x48] sm:$0xff] }
 0x187   :  { %v2581_v44 = vsel %vm2095_vm0, 1.0, %v2673_v37  ;;  %1582 = vst.msk [vmem:[#allocation3 + $0x40] sm:$0xff] %vm25_vm2, %v1550_v14  ;;  %v1678_v36 = vadd.f32 %v1646_v32, %v1614_v4  ;;  %v1841_v52 = vld [vmem:[#allocation2 + $0x40] sm:$0xff]  ;;  %vm1746_vm3 = vcmp.ge.s32.totalorder %v2625_v23, 0  ;;  %v1617_v4 = vld [vmem:[#allocation4 + $0x58] sm:$0xff]  ;;  %vm1747_vm0 = vcmp.ge.s32.totalorder %v2626_v49, 0 }
 0x188   :  { %v2223_v27 = vmul.f32 %v2581_v44, %v2191_v54  ;;  %v1015_v26 = vpop.xlane.xlu0 %1014  ;;  %v2032_v60 = vld [vmem:[#allocation4 + $0x38] sm:$0xff]  ;;  %vm1873_vm6 = vcmp.eq.f32.partialorder %v1841_v52, 0.0  ;;  %v2520_v48 = vsel %vm1746_vm3, 1.0, %v2673_v37  ;;  %v2629_v49 = vld [vmem:[%s4451_s0 + $0x68] sm:$0xff] }
 0x189   :  { %vm2064_vm10 = vcmp.gt.f32.partialorder %v2032_v60, 0.0  ;;  %1710 = vst.msk [vmem:[#allocation4 + $0x40] sm:$0xff] %vm25_vm2, %v1678_v36  ;;  %v1647_v28 = vsub.f32 %v1015_v26, %v1186_v10  ;;  %v2551_v9 = vsel %vm1873_vm6, 1.0, %v2673_v37  ;;  %v1381_v13 = vpop.xlane.xlu1 %1380  ;;  %v1264_v32 = vld [vmem:[#allocation2 + $0x58] sm:$0xff] }
 0x18a   :  { %v2332_v45 = vsel %vm25_vm2, %v2223_v27, 0.0  ;;  %v1840_v43 = vld [vmem:[#allocation2 + $0x38] sm:$0xff]  ;;  %vm2096_vm12 = vmand %vm2000_vm8, %vm2064_vm10  ;;  %v2193_v17 = vmul.f32 %v2551_v9, %v2519_v3  ;;  %v1455_v22 = vadd.f32 %v1381_v13, %v1263_v18  ;;  %v1523_v18 = vld [vmem:[#allocation3 + $0x68] sm:$0xff] }
 0x18b   :  { %v2333_v15 = vadd.f32 %v2332_v45, %v2331_v41  ;;  %vm1872_vm7 = vcmp.eq.f32.partialorder %v1840_v43, 0.0  ;;  %v1679_v1 = vadd.f32 %v1647_v28, %v1615_v29  ;;  %v2582_v35 = vsel %vm2096_vm12, 1.0, %v2673_v37  ;;  %v1970_v46 = vld [vmem:[#allocation3 + $0x48] sm:$0xff]  ;;  %v1522_v29 = vld [vmem:[#allocation3 + $0x60] sm:$0xff] }
 0x18c   :  { %v2550_v31 = vsel %vm1872_vm7, 1.0, %v2673_v37  ;;  %v1378_v19 = vpop.xlane.xlu0 %1377  ;;  %v2264_v40 = vsel %vm25_vm2, %v2193_v17, 0.0  ;;  %1488 = vst.msk [vmem:[#allocation2 + $0x50] sm:$0xff] %vm25_vm2, %v1455_v22  ;;  %vm2002_vm11 = vcmp.gt.f32.partialorder %v1970_v46, 0.0  ;;  %v2521_v45 = vsel %vm1747_vm0, 1.0, %v2673_v37  ;;  %v1266_v46 = vld [vmem:[#allocation2 + $0x68] sm:$0xff] }
 0x18d   :  { %v2192_v39 = vmul.f32 %v2550_v31, %v2518_v47  ;;  %v1454_v30 = vadd.f32 %v1378_v19, %v1262_v5  ;;  %1711 = vst.msk [vmem:[#allocation4 + $0x48] sm:$0xff] %vm25_vm2, %v1679_v1  ;;  %v1192_v14 = vpop.xlane.xlu1 %1191  ;;  %v1265_v5 = vld [vmem:[#allocation2 + $0x60] sm:$0xff] }
 0x18e   :  { %v1969_v38 = vld [vmem:[#allocation3 + $0x40] sm:$0xff]  ;;  %v1553_v54 = vadd.f32 %v1521_v63, %v1192_v14 }
 0x18f   :  { %v2224_v53 = vmul.f32 %v2582_v35, %v2192_v39  ;;  %v2262_v42 = vsel %vm25_vm2, %v2192_v39, 0.0  ;;  %1487 = vst.msk [vmem:[#allocation2 + $0x48] sm:$0xff] %vm25_vm2, %v1454_v30  ;;  %vm2001_vm13 = vcmp.gt.f32.partialorder %v1969_v38, 0.0  ;;  %v1618_v35 = vld [vmem:[#allocation4 + $0x60] sm:$0xff] }
 0x190   :  { %v2263_v62 = vadd.f32 %v2262_v42, %v2261_v11  ;;  %v1189_v21 = vpop.xlane.xlu0 %1188  ;;  %v2033_v56 = vld [vmem:[#allocation4 + $0x40] sm:$0xff]  ;;  %1585 = vst.msk [vmem:[#allocation3 + $0x58] sm:$0xff] %vm25_vm2, %v1553_v54 }
 0x191   :  { %v2334_v20 = vsel %vm25_vm2, %v2224_v53, 0.0  ;;  %v1552_v33 = vadd.f32 %v1520_v25, %v1189_v21  ;;  %v1648_v58 = vsub.f32 %v1018_v12, %v1189_v21  ;;  %vm2065_vm15 = vcmp.gt.f32.partialorder %v2033_v56, 0.0  ;;  %v1024_v47 = vpop.xlane.xlu1 %1023  ;;  %v2628_v63 = vld [vmem:[%s4451_s0 + $0x60] sm:$0xff] }
 0x192   :  { %v2335_v7 = vadd.f32 %v2334_v20, %v2333_v15  ;;  %vm2097_vm9 = vmand %vm2001_vm13, %vm2065_vm15  ;;  %v2265_v55 = vadd.f32 %v2264_v40, %v2263_v62  ;;  %v2627_v15 = vld [vmem:[%s4451_s0 + $0x58] sm:$0xff] }
 0x193   :  { %1584 = vst.msk [vmem:[#allocation3 + $0x50] sm:$0xff] %vm25_vm2, %v1552_v33  ;;  %v1680_v50 = vadd.f32 %v1648_v58, %v1616_v8  ;;  %v2583_v0 = vsel %vm2097_vm9, 1.0, %v2673_v37  ;;  %v1843_v28 = vld [vmem:[#allocation2 + $0x50] sm:$0xff]  ;;  %vm1748_vm8 = vcmp.ge.s32.totalorder %v2627_v15, 0  ;;  %v1619_v33 = vld [vmem:[#allocation4 + $0x68] sm:$0xff]  ;;  %vm1749_vm9 = vcmp.ge.s32.totalorder %v2628_v63, 0 }
 0x194   :  { %v1021_v16 = vpop.xlane.xlu0 %1020  ;;  %v2225_v2 = vmul.f32 %v2583_v0, %v2193_v17  ;;  %v2034_v59 = vld [vmem:[#allocation4 + $0x48] sm:$0xff]  ;;  %vm1875_vm10 = vcmp.eq.f32.partialorder %v1843_v28, 0.0  ;;  %v2522_v20 = vsel %vm1748_vm8, 1.0, %v2673_v37 }
 0x195   :  { %1712 = vst.msk [vmem:[#allocation4 + $0x50] sm:$0xff] %vm25_vm2, %v1680_v50  ;;  %vm2066_vm14 = vcmp.gt.f32.partialorder %v2034_v59, 0.0  ;;  %v1649_v6 = vsub.f32 %v1021_v16, %v1192_v14  ;;  %v2553_v39 = vsel %vm1875_vm10, 1.0, %v2673_v37  ;;  %v1387_v12 = vpop.xlane.xlu1 %1386 }
 0x196   :  { %v1842_v41 = vld [vmem:[#allocation2 + $0x48] sm:$0xff]  ;;  %v2336_v44 = vsel %vm25_vm2, %v2225_v2, 0.0  ;;  %vm2098_vm1 = vmand %vm2002_vm11, %vm2066_vm14  ;;  %v2195_v25 = vmul.f32 %v2553_v39, %v2521_v45  ;;  %v1457_v3 = vadd.f32 %v1387_v12, %v1265_v5  ;;  %vm1750_vm11 = vcmp.ge.s32.totalorder %v2629_v49, 0  ;;  %v1525_v5 = vld [vmem:[#allocation3 + $0x78] sm:$0xff] }
 0x197   :  { %vm1874_vm4 = vcmp.eq.f32.partialorder %v1842_v41, 0.0  ;;  %v2337_v51 = vadd.f32 %v2336_v44, %v2335_v7  ;;  %v1681_v27 = vadd.f32 %v1649_v6, %v1617_v4  ;;  %v2584_v60 = vsel %vm2098_vm1, 1.0, %v2673_v37  ;;  %v1972_v52 = vld [vmem:[#allocation3 + $0x58] sm:$0xff]  ;;  %v1524_v4 = vld [vmem:[#allocation3 + $0x70] sm:$0xff] }
 0x198   :  { %v2552_v34 = vsel %vm1874_vm4, 1.0, %v2673_v37  ;;  %v1384_v36 = vpop.xlane.xlu0 %1383  ;;  %v2268_v23 = vsel %vm25_vm2, %v2195_v25, 0.0  ;;  %1490 = vst.msk [vmem:[#allocation2 + $0x60] sm:$0xff] %vm25_vm2, %v1457_v3  ;;  %vm2004_vm3 = vcmp.gt.f32.partialorder %v1972_v52, 0.0  ;;  %v2523_v41 = vsel %vm1749_vm9, 1.0, %v2673_v37  ;;  %v1267_v44 = vld [vmem:[#allocation2 + $0x70] sm:$0xff] }
 0x199   :  { %v2194_v26 = vmul.f32 %v2552_v34, %v2520_v48  ;;  %v1456_v11 = vadd.f32 %v1384_v36, %v1264_v32  ;;  %1713 = vst.msk [vmem:[#allocation4 + $0x58] sm:$0xff] %vm25_vm2, %v1681_v27  ;;  %v1198_v13 = vpop.xlane.xlu1 %1197  ;;  %v1620_v27 = vld [vmem:[#allocation4 + $0x70] sm:$0xff] }
 0x19a   :  { %v1971_v10 = vld [vmem:[#allocation3 + $0x50] sm:$0xff]  ;;  %v1555_v17 = vadd.f32 %v1523_v18, %v1198_v13 }
 0x19b   :  { %v2226_v43 = vmul.f32 %v2584_v60, %v2194_v26  ;;  %v2266_v57 = vsel %vm25_vm2, %v2194_v26, 0.0  ;;  %1489 = vst.msk [vmem:[#allocation2 + $0x58] sm:$0xff] %vm25_vm2, %v1456_v11  ;;  %vm2003_vm12 = vcmp.gt.f32.partialorder %v1971_v10, 0.0  ;;  %v2630_v52 = vld [vmem:[%s4451_s0 + $0x70] sm:$0xff] }
 0x19c   :  { %v2267_v61 = vadd.f32 %v2266_v57, %v2265_v55  ;;  %v2035_v31 = vld [vmem:[#allocation4 + $0x50] sm:$0xff]  ;;  %v1195_v1 = vpop.xlane.xlu0 %1194  ;;  %1587 = vst.msk [vmem:[#allocation3 + $0x68] sm:$0xff] %vm25_vm2, %v1555_v17 }
 0x19d   :  { %v2338_v19 = vsel %vm25_vm2, %v2226_v43, 0.0  ;;  %vm2067_vm7 = vcmp.gt.f32.partialorder %v2035_v31, 0.0  ;;  %v1554_v30 = vadd.f32 %v1522_v29, %v1195_v1  ;;  %v1650_v53 = vsub.f32 %v1024_v47, %v1195_v1 }
 0x19e   :  { %v2339_v38 = vadd.f32 %v2338_v19, %v2337_v51  ;;  %vm2099_vm5 = vmand %vm2003_vm12, %vm2067_vm7  ;;  %v2269_v9 = vadd.f32 %v2268_v23, %v2267_v61  ;;  %v2524_v1 = vsel %vm1750_vm11, 1.0, %v2673_v37 }
 0x19f   :  { %v2585_v42 = vsel %vm2099_vm5, 1.0, %v2673_v37  ;;  %1586 = vst.msk [vmem:[#allocation3 + $0x60] sm:$0xff] %vm25_vm2, %v1554_v30  ;;  %v1682_v21 = vadd.f32 %v1650_v53, %v1618_v35  ;;  %v1845_v32 = vld [vmem:[#allocation2 + $0x60] sm:$0xff]  ;;  %v1621_v30 = vld [vmem:[#allocation4 + $0x78] sm:$0xff]  ;;  %vm1751_vm5 = vcmp.ge.s32.totalorder %v2630_v52, 0 }
 0x1a0   :  { %v2227_v62 = vmul.f32 %v2585_v42, %v2195_v25  ;;  %v1027_v8 = vpop.xlane.xlu0 %1026  ;;  %v2036_v56 = vld [vmem:[#allocation4 + $0x58] sm:$0xff]  ;;  %vm1877_vm14 = vcmp.eq.f32.partialorder %v1845_v32, 0.0 }
 0x1a1   :  { %vm2068_vm6 = vcmp.gt.f32.partialorder %v2036_v56, 0.0  ;;  %1714 = vst.msk [vmem:[#allocation4 + $0x60] sm:$0xff] %vm25_vm2, %v1682_v21  ;;  %v1651_v22 = vsub.f32 %v1027_v8, %v1198_v13  ;;  %v2555_v26 = vsel %vm1877_vm14, 1.0, %v2673_v37  ;;  %v1268_v53 = vld [vmem:[#allocation2 + $0x78] sm:$0xff] }
 0x1a2   :  { %v2340_v58 = vsel %vm25_vm2, %v2227_v62, 0.0  ;;  %v1844_v7 = vld [vmem:[#allocation2 + $0x58] sm:$0xff]  ;;  %vm2100_vm13 = vmand %vm2004_vm3, %vm2068_vm6  ;;  %v2197_v29 = vmul.f32 %v2555_v26, %v2523_v41 }
 0x1a3   :  { %v2341_v50 = vadd.f32 %v2340_v58, %v2339_v38  ;;  %vm1876_vm15 = vcmp.eq.f32.partialorder %v1844_v7, 0.0  ;;  %v1683_v0 = vadd.f32 %v1651_v22, %v1619_v33  ;;  %v2586_v59 = vsel %vm2100_vm13, 1.0, %v2673_v37  ;;  %v1974_v57 = vld [vmem:[#allocation3 + $0x68] sm:$0xff]  ;;  %v1526_v33 = vld [vmem:[#allocation3 + $0x80] sm:$0xff] }
 0x1a4   :  { %v2554_v40 = vsel %vm1876_vm15, 1.0, %v2673_v37  ;;  %v1390_v16 = vpop.xlane.xlu0 %1389  ;;  %v2272_v15 = vsel %vm25_vm2, %v2197_v29, 0.0  ;;  %vm2006_vm8 = vcmp.gt.f32.partialorder %v1974_v57, 0.0  ;;  %v2525_v58 = vsel %vm1751_vm5, 1.0, %v2673_v37  ;;  %v1269_v22 = vld [vmem:[#allocation2 + $0x80] sm:$0xff] }
 0x1a5   :  { %v2196_v48 = vmul.f32 %v2554_v40, %v2522_v20  ;;  %v1458_v2 = vadd.f32 %v1390_v16, %v1266_v46  ;;  %1715 = vst.msk [vmem:[#allocation4 + $0x68] sm:$0xff] %vm25_vm2, %v1683_v0  ;;  %v1622_v40 = vld [vmem:[#allocation4 + $0x80] sm:$0xff] }
 0x1a6   :  { %v1973_v14 = vld [vmem:[#allocation3 + $0x60] sm:$0xff] }
 0x1a7   :  { %v2228_v54 = vmul.f32 %v2586_v59, %v2196_v48  ;;  %v2270_v6 = vsel %vm25_vm2, %v2196_v48, 0.0  ;;  %1491 = vst.msk [vmem:[#allocation2 + $0x68] sm:$0xff] %vm25_vm2, %v1458_v2  ;;  %vm2005_vm1 = vcmp.gt.f32.partialorder %v1973_v14, 0.0  ;;  %v2631_v59 = vld [vmem:[%s4451_s0 + $0x78] sm:$0xff] }
 0x1a8   :  { %v2271_v51 = vadd.f32 %v2270_v6, %v2269_v9  ;;  %v2037_v47 = vld [vmem:[#allocation4 + $0x60] sm:$0xff]  ;;  %vm1752_vm15 = vcmp.ge.s32.totalorder %v2631_v59, 0 }
 0x1a9   :  { %v1030_v55 = vpop.xlane.xlu1 %1029  ;;  %v2342_v36 = vsel %vm25_vm2, %v2228_v54, 0.0  ;;  %vm2069_vm4 = vcmp.gt.f32.partialorder %v2037_v47, 0.0 }
 0x1aa   :  { %v2343_v43 = vadd.f32 %v2342_v36, %v2341_v50  ;;  %vm2101_vm0 = vmand %vm2005_vm1, %vm2069_vm4  ;;  %v2273_v35 = vadd.f32 %v2272_v15, %v2271_v51  ;;  %v2526_v36 = vsel %vm1752_vm15, 1.0, %v2673_v37 }
 0x1ab   :  { %v1201_v34 = vpop.xlane.xlu0 %1200  ;;  %v2587_v61 = vsel %vm2101_vm0, 1.0, %v2673_v37 }
 0x1ac   :  { %v1556_v60 = vadd.f32 %v1524_v4, %v1201_v34  ;;  %v1652_v10 = vsub.f32 %v1030_v55, %v1201_v34  ;;  %v2229_v19 = vmul.f32 %v2587_v61, %v2197_v29  ;;  %v2038_v39 = vld [vmem:[#allocation4 + $0x68] sm:$0xff] }
 0x1ad   :  { %v1393_v11 = vpop.xlane.xlu1 %1392  ;;  %vm2070_vm10 = vcmp.gt.f32.partialorder %v2038_v39, 0.0 }
 0x1ae   :  { %v1459_v45 = vadd.f32 %v1393_v11, %v1267_v44  ;;  %1588 = vst.msk [vmem:[#allocation3 + $0x70] sm:$0xff] %vm25_vm2, %v1556_v60  ;;  %v1684_v28 = vadd.f32 %v1652_v10, %v1620_v27  ;;  %v1846_v38 = vld [vmem:[#allocation2 + $0x68] sm:$0xff]  ;;  %vm2102_vm12 = vmand %vm2006_vm8, %vm2070_vm10  ;;  %v2344_v42 = vsel %vm25_vm2, %v2229_v19, 0.0 }
 0x1af   :  { %v1033_v31 = vpop.xlane.xlu0 %1032  ;;  %vm1878_vm7 = vcmp.eq.f32.partialorder %v1846_v38, 0.0  ;;  %v2345_v21 = vadd.f32 %v2344_v42, %v2343_v43  ;;  %v2588_v56 = vsel %vm2102_vm12, 1.0, %v2673_v37  ;;  %v1527_v44 = vld [vmem:[#allocation3 + $0x88] sm:$0xff] }
 0x1b0   :  { %1492 = vst.msk [vmem:[#allocation2 + $0x70] sm:$0xff] %vm25_vm2, %v1459_v45  ;;  %1716 = vst.msk [vmem:[#allocation4 + $0x70] sm:$0xff] %vm25_vm2, %v1684_v28  ;;  %v2556_v18 = vsel %vm1878_vm7, 1.0, %v2673_v37  ;;  %v1623_v11 = vld [vmem:[#allocation4 + $0x88] sm:$0xff] }
 0x1b1   :  { %v1204_v12 = vpop.xlane.xlu1 %1203  ;;  %v2198_v8 = vmul.f32 %v2556_v18, %v2524_v1  ;;  %v1270_v43 = vld [vmem:[#allocation2 + $0x88] sm:$0xff]  ;;  %v1624_v18 = vld [vmem:[#allocation4 + $0x90] sm:$0xff] }
 0x1b2   :  { %v1557_v25 = vadd.f32 %v1525_v5, %v1204_v12  ;;  %v1653_v3 = vsub.f32 %v1033_v31, %v1204_v12  ;;  %v2632_v5 = vld [vmem:[%s4451_s0 + $0x80] sm:$0xff] }
 0x1b3   :  { %v1396_v62 = vpop.xlane.xlu0 %1395  ;;  %v2230_v7 = vmul.f32 %v2588_v56, %v2198_v8  ;;  %v2274_v46 = vsel %vm25_vm2, %v2198_v8, 0.0  ;;  %vm1753_vm0 = vcmp.ge.s32.totalorder %v2632_v5, 0  ;;  %v2633_v56 = vld [vmem:[%s4451_s0 + $0x88] sm:$0xff]  ;;  %v1626_v5 = vld [vmem:[#allocation4 + $0xa0] sm:$0xff] }
 0x1b4   :  { %1589 = vst.msk [vmem:[#allocation3 + $0x78] sm:$0xff] %vm25_vm2, %v1557_v25  ;;  %v1685_v23 = vadd.f32 %v1653_v3, %v1621_v30  ;;  %v1460_v9 = vadd.f32 %v1396_v62, %v1268_v53  ;;  %v2275_v0 = vadd.f32 %v2274_v46, %v2273_v35  ;;  %v1528_v30 = vld [vmem:[#allocation3 + $0x90] sm:$0xff]  ;;  %v2527_v38 = vsel %vm1753_vm0, 1.0, %v2673_v37 }
 0x1b5   :  { %v1036_v20 = vpop.xlane.xlu1 %1035  ;;  %v1975_v13 = vld [vmem:[#allocation3 + $0x70] sm:$0xff]  ;;  %v2346_v41 = vsel %vm25_vm2, %v2230_v7, 0.0  ;;  %vm1754_vm7 = vcmp.ge.s32.totalorder %v2633_v56, 0 }
 0x1b6   :  { %1717 = vst.msk [vmem:[#allocation4 + $0x78] sm:$0xff] %vm25_vm2, %v1685_v23  ;;  %1493 = vst.msk [vmem:[#allocation2 + $0x78] sm:$0xff] %vm25_vm2, %v1460_v9  ;;  %vm2007_vm6 = vcmp.gt.f32.partialorder %v1975_v13, 0.0  ;;  %v2347_v49 = vadd.f32 %v2346_v41, %v2345_v21  ;;  %v1271_v3 = vld [vmem:[#allocation2 + $0x90] sm:$0xff]  ;;  %v1272_v41 = vld [vmem:[#allocation2 + $0x98] sm:$0xff] }
 0x1b7   :  { %v1847_v17 = vld [vmem:[#allocation2 + $0x70] sm:$0xff]  ;;  %v1207_v63 = vpop.xlane.xlu0 %1206 }
 0x1b8   :  { %vm1879_vm3 = vcmp.eq.f32.partialorder %v1847_v17, 0.0  ;;  %v2039_v50 = vld [vmem:[#allocation4 + $0x70] sm:$0xff]  ;;  %v1558_v55 = vadd.f32 %v1526_v33, %v1207_v63  ;;  %v1654_v2 = vsub.f32 %v1036_v20, %v1207_v63  ;;  %v1529_v17 = vld [vmem:[#allocation3 + $0x98] sm:$0xff] }
 0x1b9   :  { %v2557_v16 = vsel %vm1879_vm3, 1.0, %v2673_v37  ;;  %vm2071_vm13 = vcmp.gt.f32.partialorder %v2039_v50, 0.0  ;;  %v1399_v48 = vpop.xlane.xlu1 %1398 }
 0x1ba   :  { %v2199_v14 = vmul.f32 %v2557_v16, %v2525_v58  ;;  %vm2103_vm9 = vmand %vm2007_vm6, %vm2071_vm13  ;;  %v1461_v4 = vadd.f32 %v1399_v48, %v1269_v22  ;;  %1590 = vst.msk [vmem:[#allocation3 + $0x80] sm:$0xff] %vm25_vm2, %v1558_v55  ;;  %v1686_v32 = vadd.f32 %v1654_v2, %v1622_v40  ;;  %v2528_v16 = vsel %vm1754_vm7, 1.0, %v2673_v37  ;;  %v1625_v55 = vld [vmem:[#allocation4 + $0x98] sm:$0xff] }
 0x1bb   :  { %v2589_v54 = vsel %vm2103_vm9, 1.0, %v2673_v37  ;;  %v1976_v6 = vld [vmem:[#allocation3 + $0x78] sm:$0xff]  ;;  %v1039_v51 = vpop.xlane.xlu0 %1038 }
 0x1bc   :  { %1494 = vst.msk [vmem:[#allocation2 + $0x80] sm:$0xff] %vm25_vm2, %v1461_v4  ;;  %v2276_v34 = vsel %vm25_vm2, %v2199_v14, 0.0  ;;  %v2231_v27 = vmul.f32 %v2589_v54, %v2199_v14  ;;  %vm2008_vm11 = vcmp.gt.f32.partialorder %v1976_v6, 0.0  ;;  %1718 = vst.msk [vmem:[#allocation4 + $0x80] sm:$0xff] %vm25_vm2, %v1686_v32 }
 0x1bd   :  { %v2040_v26 = vld [vmem:[#allocation4 + $0x78] sm:$0xff]  ;;  %v1210_v47 = vpop.xlane.xlu1 %1209  ;;  %v2277_v60 = vadd.f32 %v2276_v34, %v2275_v0 }
 0x1be   :  { %vm2072_vm14 = vcmp.gt.f32.partialorder %v2040_v26, 0.0  ;;  %v1848_v10 = vld [vmem:[#allocation2 + $0x78] sm:$0xff]  ;;  %v1559_v29 = vadd.f32 %v1527_v44, %v1210_v47  ;;  %v1655_v45 = vsub.f32 %v1039_v51, %v1210_v47  ;;  %v2348_v57 = vsel %vm25_vm2, %v2231_v27, 0.0  ;;  %v2634_v44 = vld [vmem:[%s4451_s0 + $0x90] sm:$0xff]  ;;  %v1530_v47 = vld [vmem:[#allocation3 + $0xa0] sm:$0xff] }
 0x1bf   :  { %vm2104_vm1 = vmand %vm2008_vm11, %vm2072_vm14  ;;  %vm1880_vm4 = vcmp.eq.f32.partialorder %v1848_v10, 0.0  ;;  %v2349_v28 = vadd.f32 %v2348_v57, %v2347_v49  ;;  %v1402_v31 = vpop.xlane.xlu0 %1401  ;;  %vm1755_vm9 = vcmp.ge.s32.totalorder %v2634_v44, 0  ;;  %v1628_v44 = vld [vmem:[#allocation4 + $0xb0] sm:$0xff] }
 0x1c0   :  { %v2558_v15 = vsel %vm1880_vm4, 1.0, %v2673_v37  ;;  %1591 = vst.msk [vmem:[#allocation3 + $0x88] sm:$0xff] %vm25_vm2, %v1559_v29  ;;  %v1687_v61 = vadd.f32 %v1655_v45, %v1623_v11  ;;  %v1462_v19 = vadd.f32 %v1402_v31, %v1270_v43  ;;  %v2590_v35 = vsel %vm2104_vm1, 1.0, %v2673_v37  ;;  %v1273_v29 = vld [vmem:[#allocation2 + $0xa0] sm:$0xff] }
 0x1c1   :  { %v1042_v1 = vpop.xlane.xlu1 %1041  ;;  %v2200_v39 = vmul.f32 %v2558_v15, %v2526_v36  ;;  %v1977_v12 = vld [vmem:[#allocation3 + $0x80] sm:$0xff]  ;;  %v2529_v10 = vsel %vm1755_vm9, 1.0, %v2673_v37 }
 0x1c2   :  { %1719 = vst.msk [vmem:[#allocation4 + $0x88] sm:$0xff] %vm25_vm2, %v1687_v61  ;;  %1495 = vst.msk [vmem:[#allocation2 + $0x88] sm:$0xff] %vm25_vm2, %v1462_v19  ;;  %vm2009_vm10 = vcmp.gt.f32.partialorder %v1977_v12, 0.0  ;;  %v2635_v12 = vld [vmem:[%s4451_s0 + $0x98] sm:$0xff] }
 0x1c3   :  { %v1849_v25 = vld [vmem:[#allocation2 + $0x80] sm:$0xff]  ;;  %v2278_v53 = vsel %vm25_vm2, %v2200_v39, 0.0  ;;  %v2232_v42 = vmul.f32 %v2590_v35, %v2200_v39  ;;  %v1213_v52 = vpop.xlane.xlu0 %1212  ;;  %vm1756_vm4 = vcmp.ge.s32.totalorder %v2635_v12, 0 }
 0x1c4   :  { %vm1881_vm8 = vcmp.eq.f32.partialorder %v1849_v25, 0.0  ;;  %v2279_v23 = vadd.f32 %v2278_v53, %v2277_v60  ;;  %v2041_v62 = vld [vmem:[#allocation4 + $0x80] sm:$0xff]  ;;  %v1560_v8 = vadd.f32 %v1528_v30, %v1213_v52  ;;  %v1656_v20 = vsub.f32 %v1042_v1, %v1213_v52 }
 0x1c5   :  { %v1405_v21 = vpop.xlane.xlu1 %1404  ;;  %v2559_v9 = vsel %vm1881_vm8, 1.0, %v2673_v37  ;;  %vm2073_vm12 = vcmp.gt.f32.partialorder %v2041_v62, 0.0  ;;  %v2350_v58 = vsel %vm25_vm2, %v2232_v42, 0.0 }
 0x1c6   :  { %v1463_v13 = vadd.f32 %v1405_v21, %v1271_v3  ;;  %v2201_v33 = vmul.f32 %v2559_v9, %v2527_v38  ;;  %vm2105_vm5 = vmand %vm2009_vm10, %vm2073_vm12  ;;  %1592 = vst.msk [vmem:[#allocation3 + $0x90] sm:$0xff] %vm25_vm2, %v1560_v8  ;;  %v1688_v7 = vadd.f32 %v1656_v20, %v1624_v18  ;;  %v2351_v50 = vadd.f32 %v2350_v58, %v2349_v28  ;;  %v1531_v3 = vld [vmem:[#allocation3 + $0xa8] sm:$0xff] }
 0x1c7   :  { %v1978_v22 = vld [vmem:[#allocation3 + $0x88] sm:$0xff]  ;;  %v2591_v46 = vsel %vm2105_vm5, 1.0, %v2673_v37  ;;  %v1045_v63 = vpop.xlane.xlu0 %1044  ;;  %v2530_v21 = vsel %vm1756_vm4, 1.0, %v2673_v37 }
 0x1c8   :  { %1496 = vst.msk [vmem:[#allocation2 + $0x90] sm:$0xff] %vm25_vm2, %v1463_v13  ;;  %v2280_v40 = vsel %vm25_vm2, %v2201_v33, 0.0  ;;  %v2233_v0 = vmul.f32 %v2591_v46, %v2201_v33  ;;  %1720 = vst.msk [vmem:[#allocation4 + $0x90] sm:$0xff] %vm25_vm2, %v1688_v7  ;;  %vm2010_vm3 = vcmp.gt.f32.partialorder %v1978_v22, 0.0  ;;  %v1627_v20 = vld [vmem:[#allocation4 + $0xa8] sm:$0xff]  ;;  %v2636_v46 = vld [vmem:[%s4451_s0 + $0xa0] sm:$0xff] }
 0x1c9   :  { %v1216_v48 = vpop.xlane.xlu1 %1215  ;;  %v2281_v2 = vadd.f32 %v2280_v40, %v2279_v23  ;;  %v2042_v59 = vld [vmem:[#allocation4 + $0x88] sm:$0xff]  ;;  %vm1757_vm5 = vcmp.ge.s32.totalorder %v2636_v46, 0  ;;  %v1630_v46 = vld [vmem:[#allocation4 + $0xc0] sm:$0xff] }
 0x1ca   :  { %v1561_v14 = vadd.f32 %v1529_v17, %v1216_v48  ;;  %v1657_v4 = vsub.f32 %v1045_v63, %v1216_v48  ;;  %v1850_v54 = vld [vmem:[#allocation2 + $0x88] sm:$0xff]  ;;  %vm2074_vm6 = vcmp.gt.f32.partialorder %v2042_v59, 0.0  ;;  %v2352_v6 = vsel %vm25_vm2, %v2233_v0, 0.0 }
 0x1cb   :  { %vm1882_vm13 = vcmp.eq.f32.partialorder %v1850_v54, 0.0  ;;  %vm2106_vm15 = vmand %vm2010_vm3, %vm2074_vm6  ;;  %v2353_v32 = vadd.f32 %v2352_v6, %v2351_v50  ;;  %v1408_v51 = vpop.xlane.xlu0 %1407  ;;  %v1274_v58 = vld [vmem:[#allocation2 + $0xa8] sm:$0xff] }
 0x1cc   :  { %1593 = vst.msk [vmem:[#allocation3 + $0x98] sm:$0xff] %vm25_vm2, %v1561_v14  ;;  %v1689_v49 = vadd.f32 %v1657_v4, %v1625_v55  ;;  %v2560_v34 = vsel %vm1882_vm13, 1.0, %v2673_v37  ;;  %v1464_v36 = vadd.f32 %v1408_v51, %v1272_v41  ;;  %v2592_v60 = vsel %vm2106_vm15, 1.0, %v2673_v37  ;;  %v1532_v55 = vld [vmem:[#allocation3 + $0xb0] sm:$0xff] }
 0x1cd   :  { %v1048_v27 = vpop.xlane.xlu1 %1047  ;;  %v2202_v26 = vmul.f32 %v2560_v34, %v2528_v16  ;;  %v1979_v11 = vld [vmem:[#allocation3 + $0x90] sm:$0xff]  ;;  %v2531_v14 = vsel %vm1757_vm5, 1.0, %v2673_v37 }
 0x1ce   :  { %1721 = vst.msk [vmem:[#allocation4 + $0x98] sm:$0xff] %vm25_vm2, %v1689_v49  ;;  %1497 = vst.msk [vmem:[#allocation2 + $0x98] sm:$0xff] %vm25_vm2, %v1464_v36  ;;  %vm2011_vm14 = vcmp.gt.f32.partialorder %v1979_v11, 0.0  ;;  %v1275_v4 = vld [vmem:[#allocation2 + $0xb0] sm:$0xff] }
 0x1cf   :  { %v1851_v45 = vld [vmem:[#allocation2 + $0x90] sm:$0xff]  ;;  %v2282_v43 = vsel %vm25_vm2, %v2202_v26, 0.0  ;;  %v2234_v57 = vmul.f32 %v2592_v60, %v2202_v26  ;;  %v1219_v28 = vpop.xlane.xlu0 %1218 }
 0x1d0   :  { %vm1883_vm11 = vcmp.eq.f32.partialorder %v1851_v45, 0.0  ;;  %v2283_v15 = vadd.f32 %v2282_v43, %v2281_v2  ;;  %v2043_v61 = vld [vmem:[#allocation4 + $0x90] sm:$0xff]  ;;  %v1562_v1 = vadd.f32 %v1530_v47, %v1219_v28  ;;  %v1658_v19 = vsub.f32 %v1048_v27, %v1219_v28  ;;  %v2637_v47 = vld [vmem:[%s4451_s0 + $0xa8] sm:$0xff]  ;;  %v1533_v45 = vld [vmem:[#allocation3 + $0xb8] sm:$0xff] }
 0x1d1   :  { %v1411_v31 = vpop.xlane.xlu1 %1410  ;;  %v2561_v39 = vsel %vm1883_vm11, 1.0, %v2673_v37  ;;  %vm2075_vm1 = vcmp.gt.f32.partialorder %v2043_v61, 0.0  ;;  %v2354_v38 = vsel %vm25_vm2, %v2234_v57, 0.0  ;;  %vm1758_vm15 = vcmp.ge.s32.totalorder %v2637_v47, 0 }
 0x1d2   :  { %v1465_v30 = vadd.f32 %v1411_v31, %v1273_v29  ;;  %v2203_v35 = vmul.f32 %v2561_v39, %v2529_v10  ;;  %vm2107_vm0 = vmand %vm2011_vm14, %vm2075_vm1  ;;  %1594 = vst.msk [vmem:[#allocation3 + $0xa0] sm:$0xff] %vm25_vm2, %v1562_v1  ;;  %v1690_v25 = vadd.f32 %v1658_v19, %v1626_v5  ;;  %v2355_v52 = vadd.f32 %v2354_v38, %v2353_v32  ;;  %v1629_v19 = vld [vmem:[#allocation4 + $0xb8] sm:$0xff] }
 0x1d3   :  { %v1980_v53 = vld [vmem:[#allocation3 + $0x98] sm:$0xff]  ;;  %v2593_v42 = vsel %vm2107_vm0, 1.0, %v2673_v37  ;;  %v1051_v18 = vpop.xlane.xlu0 %1050  ;;  %v2532_v31 = vsel %vm1758_vm15, 1.0, %v2673_v37 }
 0x1d4   :  { %1498 = vst.msk [vmem:[#allocation2 + $0xa0] sm:$0xff] %vm25_vm2, %v1465_v30  ;;  %v2284_v23 = vsel %vm25_vm2, %v2203_v35, 0.0  ;;  %v2235_v62 = vmul.f32 %v2593_v42, %v2203_v35  ;;  %1722 = vst.msk [vmem:[#allocation4 + $0xa0] sm:$0xff] %vm25_vm2, %v1690_v25  ;;  %vm2012_vm8 = vcmp.gt.f32.partialorder %v1980_v53, 0.0  ;;  %v1276_v38 = vld [vmem:[#allocation2 + $0xb8] sm:$0xff]  ;;  %v2638_v42 = vld [vmem:[%s4451_s0 + $0xb0] sm:$0xff] }
 0x1d5   :  { %v1222_v8 = vpop.xlane.xlu1 %1221  ;;  %v2285_v9 = vadd.f32 %v2284_v23, %v2283_v15  ;;  %v2044_v56 = vld [vmem:[#allocation4 + $0x98] sm:$0xff]  ;;  %vm1759_vm0 = vcmp.ge.s32.totalorder %v2638_v42, 0  ;;  %v1632_v42 = vld [vmem:[#allocation4 + $0xd0] sm:$0xff] }
 0x1d6   :  { %v1563_v13 = vadd.f32 %v1531_v3, %v1222_v8  ;;  %v1659_v33 = vsub.f32 %v1051_v18, %v1222_v8  ;;  %v1852_v7 = vld [vmem:[#allocation2 + $0x98] sm:$0xff]  ;;  %vm2076_vm10 = vcmp.gt.f32.partialorder %v2044_v56, 0.0  ;;  %v2356_v17 = vsel %vm25_vm2, %v2235_v62, 0.0 }
 0x1d7   :  { %vm1884_vm12 = vcmp.eq.f32.partialorder %v1852_v7, 0.0  ;;  %vm2108_vm7 = vmand %vm2012_vm8, %vm2076_vm10  ;;  %v2357_v22 = vadd.f32 %v2356_v17, %v2355_v52  ;;  %v1414_v63 = vpop.xlane.xlu0 %1413 }
 0x1d8   :  { %1595 = vst.msk [vmem:[#allocation3 + $0xa8] sm:$0xff] %vm25_vm2, %v1563_v13  ;;  %v1691_v50 = vadd.f32 %v1659_v33, %v1627_v20  ;;  %v2562_v40 = vsel %vm1884_vm12, 1.0, %v2673_v37  ;;  %v1466_v16 = vadd.f32 %v1414_v63, %v1274_v58  ;;  %v2594_v59 = vsel %vm2108_vm7, 1.0, %v2673_v37  ;;  %v1534_v20 = vld [vmem:[#allocation3 + $0xc0] sm:$0xff] }
 0x1d9   :  { %v1054_v0 = vpop.xlane.xlu1 %1053  ;;  %v2204_v48 = vmul.f32 %v2562_v40, %v2530_v21  ;;  %v1981_v2 = vld [vmem:[#allocation3 + $0xa0] sm:$0xff]  ;;  %v2533_v13 = vsel %vm1759_vm0, 1.0, %v2673_v37 }
 0x1da   :  { %1723 = vst.msk [vmem:[#allocation4 + $0xa8] sm:$0xff] %vm25_vm2, %v1691_v50  ;;  %1499 = vst.msk [vmem:[#allocation2 + $0xa8] sm:$0xff] %vm25_vm2, %v1466_v16  ;;  %vm2013_vm6 = vcmp.gt.f32.partialorder %v1981_v2, 0.0  ;;  %v1277_v33 = vld [vmem:[#allocation2 + $0xc0] sm:$0xff] }
 0x1db   :  { %v1853_v41 = vld [vmem:[#allocation2 + $0xa0] sm:$0xff]  ;;  %v2286_v54 = vsel %vm25_vm2, %v2204_v48, 0.0  ;;  %v2236_v6 = vmul.f32 %v2594_v59, %v2204_v48  ;;  %v1225_v32 = vpop.xlane.xlu0 %1224 }
 0x1dc   :  { %vm1885_vm3 = vcmp.eq.f32.partialorder %v1853_v41, 0.0  ;;  %v2287_v49 = vadd.f32 %v2286_v54, %v2285_v9  ;;  %v2045_v51 = vld [vmem:[#allocation4 + $0xa0] sm:$0xff]  ;;  %v1564_v27 = vadd.f32 %v1532_v55, %v1225_v32  ;;  %v1660_v36 = vsub.f32 %v1054_v0, %v1225_v32  ;;  %v2639_v55 = vld [vmem:[%s4451_s0 + $0xb8] sm:$0xff]  ;;  %v1535_v41 = vld [vmem:[#allocation3 + $0xc8] sm:$0xff] }
 0x1dd   :  { %v1417_v34 = vpop.xlane.xlu1 %1416  ;;  %v2563_v26 = vsel %vm1885_vm3, 1.0, %v2673_v37  ;;  %vm2077_vm13 = vcmp.gt.f32.partialorder %v2045_v51, 0.0  ;;  %v2358_v10 = vsel %vm25_vm2, %v2236_v6, 0.0  ;;  %vm1760_vm7 = vcmp.ge.s32.totalorder %v2639_v55, 0 }
 0x1de   :  { %v1467_v11 = vadd.f32 %v1417_v34, %v1275_v4  ;;  %v2205_v60 = vmul.f32 %v2563_v26, %v2531_v14  ;;  %vm2109_vm9 = vmand %vm2013_vm6, %vm2077_vm13  ;;  %1596 = vst.msk [vmem:[#allocation3 + $0xb0] sm:$0xff] %vm25_vm2, %v1564_v27  ;;  %v1692_v29 = vadd.f32 %v1660_v36, %v1628_v44  ;;  %v2359_v28 = vadd.f32 %v2358_v10, %v2357_v22  ;;  %v1631_v36 = vld [vmem:[#allocation4 + $0xc8] sm:$0xff] }
 0x1df   :  { %v1982_v43 = vld [vmem:[#allocation3 + $0xa8] sm:$0xff]  ;;  %v2595_v57 = vsel %vm2109_vm9, 1.0, %v2673_v37  ;;  %v1057_v5 = vpop.xlane.xlu0 %1056  ;;  %v2534_v34 = vsel %vm1760_vm7, 1.0, %v2673_v37 }
 0x1e0   :  { %1500 = vst.msk [vmem:[#allocation2 + $0xb0] sm:$0xff] %vm25_vm2, %v1467_v11  ;;  %v2288_v15 = vsel %vm25_vm2, %v2205_v60, 0.0  ;;  %v2237_v61 = vmul.f32 %v2595_v57, %v2205_v60  ;;  %1724 = vst.msk [vmem:[#allocation4 + $0xb0] sm:$0xff] %vm25_vm2, %v1692_v29  ;;  %vm2014_vm11 = vcmp.gt.f32.partialorder %v1982_v43, 0.0  ;;  %v1278_v10 = vld [vmem:[#allocation2 + $0xc8] sm:$0xff]  ;;  %v2640_v57 = vld [vmem:[%s4451_s0 + $0xc0] sm:$0xff] }
 0x1e1   :  { %v1228_v1 = vpop.xlane.xlu1 %1227  ;;  %v2289_v39 = vadd.f32 %v2288_v15, %v2287_v49  ;;  %v2046_v12 = vld [vmem:[#allocation4 + $0xa8] sm:$0xff]  ;;  %vm1761_vm9 = vcmp.ge.s32.totalorder %v2640_v57, 0  ;;  %v1634_v57 = vld [vmem:[#allocation4 + $0xe0] sm:$0xff] }
 0x1e2   :  { %v1565_v30 = vadd.f32 %v1533_v45, %v1228_v1  ;;  %v1661_v35 = vsub.f32 %v1057_v5, %v1228_v1  ;;  %v1854_v25 = vld [vmem:[#allocation2 + $0xa8] sm:$0xff]  ;;  %vm2078_vm14 = vcmp.gt.f32.partialorder %v2046_v12, 0.0  ;;  %v2360_v3 = vsel %vm25_vm2, %v2237_v61, 0.0 }
 0x1e3   :  { %vm1886_vm1 = vcmp.eq.f32.partialorder %v1854_v25, 0.0  ;;  %vm2110_vm4 = vmand %vm2014_vm11, %vm2078_vm14  ;;  %v2361_v53 = vadd.f32 %v2360_v3, %v2359_v28  ;;  %v1420_v18 = vpop.xlane.xlu0 %1419 }
 0x1e4   :  { %1597 = vst.msk [vmem:[#allocation3 + $0xb8] sm:$0xff] %vm25_vm2, %v1565_v30  ;;  %v1693_v52 = vadd.f32 %v1661_v35, %v1629_v19  ;;  %v2564_v23 = vsel %vm1886_vm1, 1.0, %v2673_v37  ;;  %v1468_v21 = vadd.f32 %v1420_v18, %v1276_v38  ;;  %v2596_v56 = vsel %vm2110_vm4, 1.0, %v2673_v37  ;;  %v1536_v19 = vld [vmem:[#allocation3 + $0xd0] sm:$0xff] }
 0x1e5   :  { %v1060_v62 = vpop.xlane.xlu1 %1059  ;;  %v2206_v8 = vmul.f32 %v2564_v23, %v2532_v31  ;;  %v1983_v9 = vld [vmem:[#allocation3 + $0xb0] sm:$0xff]  ;;  %v2535_v30 = vsel %vm1761_vm9, 1.0, %v2673_v37 }
 0x1e6   :  { %1725 = vst.msk [vmem:[#allocation4 + $0xb8] sm:$0xff] %vm25_vm2, %v1693_v52  ;;  %1501 = vst.msk [vmem:[#allocation2 + $0xb8] sm:$0xff] %vm25_vm2, %v1468_v21  ;;  %vm2015_vm10 = vcmp.gt.f32.partialorder %v1983_v9, 0.0  ;;  %v1279_v35 = vld [vmem:[#allocation2 + $0xd0] sm:$0xff] }
 0x1e7   :  { %v1855_v58 = vld [vmem:[#allocation2 + $0xb0] sm:$0xff]  ;;  %v2290_v7 = vsel %vm25_vm2, %v2206_v8, 0.0  ;;  %v2238_v17 = vmul.f32 %v2596_v56, %v2206_v8  ;;  %v1231_v22 = vpop.xlane.xlu0 %1230 }
 0x1e8   :  { %vm1887_vm8 = vcmp.eq.f32.partialorder %v1855_v58, 0.0  ;;  %v2291_v50 = vadd.f32 %v2290_v7, %v2289_v39  ;;  %v2047_v63 = vld [vmem:[#allocation4 + $0xb0] sm:$0xff]  ;;  %v1566_v0 = vadd.f32 %v1534_v20, %v1231_v22  ;;  %v1662_v16 = vsub.f32 %v1060_v62, %v1231_v22  ;;  %v2641_v20 = vld [vmem:[%s4451_s0 + $0xc8] sm:$0xff]  ;;  %v1537_v58 = vld [vmem:[#allocation3 + $0xd8] sm:$0xff] }
 0x1e9   :  { %v1423_v40 = vpop.xlane.xlu1 %1422  ;;  %v2565_v48 = vsel %vm1887_vm8, 1.0, %v2673_v37  ;;  %vm2079_vm12 = vcmp.gt.f32.partialorder %v2047_v63, 0.0  ;;  %v2362_v14 = vsel %vm25_vm2, %v2238_v17, 0.0  ;;  %vm1762_vm4 = vcmp.ge.s32.totalorder %v2641_v20, 0 }
 0x1ea   :  { %v1469_v2 = vadd.f32 %v1423_v40, %v1277_v33  ;;  %v2207_v59 = vmul.f32 %v2565_v48, %v2533_v13  ;;  %vm2111_vm5 = vmand %vm2015_vm10, %vm2079_vm12  ;;  %1598 = vst.msk [vmem:[#allocation3 + $0xc0] sm:$0xff] %vm25_vm2, %v1566_v0  ;;  %v1694_v4 = vadd.f32 %v1662_v16, %v1630_v46  ;;  %v2363_v32 = vadd.f32 %v2362_v14, %v2361_v53  ;;  %v1633_v16 = vld [vmem:[#allocation4 + $0xd8] sm:$0xff] }
 0x1eb   :  { %v1984_v54 = vld [vmem:[#allocation3 + $0xb8] sm:$0xff]  ;;  %v2597_v6 = vsel %vm2111_vm5, 1.0, %v2673_v37  ;;  %v1063_v44 = vpop.xlane.xlu0 %1062  ;;  %v2536_v40 = vsel %vm1762_vm4, 1.0, %v2673_v37 }
 0x1ec   :  { %1502 = vst.msk [vmem:[#allocation2 + $0xc0] sm:$0xff] %vm25_vm2, %v1469_v2  ;;  %v2292_v49 = vsel %vm25_vm2, %v2207_v59, 0.0  ;;  %v2239_v51 = vmul.f32 %v2597_v6, %v2207_v59  ;;  %1726 = vst.msk [vmem:[#allocation4 + $0xc0] sm:$0xff] %vm25_vm2, %v1694_v4  ;;  %vm2016_vm3 = vcmp.gt.f32.partialorder %v1984_v54, 0.0  ;;  %v1280_v14 = vld [vmem:[#allocation2 + $0xd8] sm:$0xff]  ;;  %v2642_v6 = vld [vmem:[%s4451_s0 + $0xd0] sm:$0xff] }
 0x1ed   :  { %v1234_v27 = vpop.xlane.xlu1 %1233  ;;  %v2293_v26 = vadd.f32 %v2292_v49, %v2291_v50  ;;  %v2048_v47 = vld [vmem:[#allocation4 + $0xb8] sm:$0xff]  ;;  %vm1763_vm5 = vcmp.ge.s32.totalorder %v2642_v6, 0 }
 0x1ee   :  { %v1567_v11 = vadd.f32 %v1535_v41, %v1234_v27  ;;  %v1663_v60 = vsub.f32 %v1063_v44, %v1234_v27  ;;  %v1856_v29 = vld [vmem:[#allocation2 + $0xb8] sm:$0xff]  ;;  %vm2080_vm6 = vcmp.gt.f32.partialorder %v2048_v47, 0.0  ;;  %v2364_v45 = vsel %vm25_vm2, %v2239_v51, 0.0 }
 0x1ef   :  { %vm1888_vm13 = vcmp.eq.f32.partialorder %v1856_v29, 0.0  ;;  %vm2112_vm15 = vmand %vm2016_vm3, %vm2080_vm6  ;;  %v2365_v43 = vadd.f32 %v2364_v45, %v2363_v32  ;;  %v1426_v5 = vpop.xlane.xlu0 %1425 }
 0x1f0   :  { %1599 = vst.msk [vmem:[#allocation3 + $0xc8] sm:$0xff] %vm25_vm2, %v1567_v11  ;;  %v1695_v28 = vadd.f32 %v1663_v60, %v1631_v36  ;;  %v2566_v15 = vsel %vm1888_vm13, 1.0, %v2673_v37  ;;  %v1470_v31 = vadd.f32 %v1426_v5, %v1278_v10  ;;  %v2598_v12 = vsel %vm2112_vm15, 1.0, %v2673_v37  ;;  %v1538_v36 = vld [vmem:[#allocation3 + $0xe0] sm:$0xff] }
 0x1f1   :  { %v1066_v61 = vpop.xlane.xlu1 %1065  ;;  %v2208_v1 = vmul.f32 %v2566_v15, %v2534_v34  ;;  %v1985_v39 = vld [vmem:[#allocation3 + $0xc0] sm:$0xff]  ;;  %v2537_v11 = vsel %vm1763_vm5, 1.0, %v2673_v37 }
 0x1f2   :  { %1727 = vst.msk [vmem:[#allocation4 + $0xc8] sm:$0xff] %vm25_vm2, %v1695_v28  ;;  %1503 = vst.msk [vmem:[#allocation2 + $0xc8] sm:$0xff] %vm25_vm2, %v1470_v31  ;;  %vm2017_vm14 = vcmp.gt.f32.partialorder %v1985_v39, 0.0  ;;  %v1281_v60 = vld [vmem:[#allocation2 + $0xe0] sm:$0xff] }
 0x1f3   :  { %v1857_v38 = vld [vmem:[#allocation2 + $0xc0] sm:$0xff]  ;;  %v2294_v25 = vsel %vm25_vm2, %v2208_v1, 0.0  ;;  %v2240_v3 = vmul.f32 %v2598_v12, %v2208_v1  ;;  %v1237_v53 = vpop.xlane.xlu0 %1236 }
 0x1f4   :  { %vm1889_vm11 = vcmp.eq.f32.partialorder %v1857_v38, 0.0  ;;  %v2295_v52 = vadd.f32 %v2294_v25, %v2293_v26  ;;  %v2049_v18 = vld [vmem:[#allocation4 + $0xc0] sm:$0xff]  ;;  %v1568_v62 = vadd.f32 %v1536_v19, %v1237_v53  ;;  %v1664_v21 = vsub.f32 %v1066_v61, %v1237_v53 }
 0x1f5   :  { %v1429_v23 = vpop.xlane.xlu1 %1428  ;;  %v2567_v8 = vsel %vm1889_vm11, 1.0, %v2673_v37  ;;  %vm2081_vm1 = vcmp.gt.f32.partialorder %v2049_v18, 0.0  ;;  %v2366_v13 = vsel %vm25_vm2, %v2240_v3, 0.0  ;;  %v1635_v18 = vld [vmem:[#allocation4 + $0xe8] sm:$0xff] }
 0x1f6   :  { %v1471_v9 = vadd.f32 %v1429_v23, %v1279_v35  ;;  %v2209_v56 = vmul.f32 %v2567_v8, %v2535_v30  ;;  %vm2113_vm0 = vmand %vm2017_vm14, %vm2081_vm1  ;;  %1600 = vst.msk [vmem:[#allocation3 + $0xd0] sm:$0xff] %vm25_vm2, %v1568_v62  ;;  %v1696_v33 = vadd.f32 %v1664_v21, %v1632_v42  ;;  %v2367_v22 = vadd.f32 %v2366_v13, %v2365_v43  ;;  %v1539_v35 = vld [vmem:[#allocation3 + $0xe8] sm:$0xff] }
 0x1f7   :  { %v1986_v7 = vld [vmem:[#allocation3 + $0xc8] sm:$0xff]  ;;  %v2599_v17 = vsel %vm2113_vm0, 1.0, %v2673_v37  ;;  %v1069_v46 = vpop.xlane.xlu0 %1068 }
 0x1f8   :  { %1504 = vst.msk [vmem:[#allocation2 + $0xd0] sm:$0xff] %vm25_vm2, %v1471_v9  ;;  %v2296_v50 = vsel %vm25_vm2, %v2209_v56, 0.0  ;;  %v2241_v63 = vmul.f32 %v2599_v17, %v2209_v56  ;;  %1728 = vst.msk [vmem:[#allocation4 + $0xd0] sm:$0xff] %vm25_vm2, %v1696_v33  ;;  %vm2018_vm8 = vcmp.gt.f32.partialorder %v1986_v7, 0.0  ;;  %v1282_v8 = vld [vmem:[#allocation2 + $0xe8] sm:$0xff]  ;;  %v1540_v7 = vld [vmem:[#allocation3 + $0xf0] sm:$0xff] }
 0x1f9   :  { %v1240_v0 = vpop.xlane.xlu1 %1239  ;;  %v2297_v48 = vadd.f32 %v2296_v50, %v2295_v52  ;;  %v2050_v55 = vld [vmem:[#allocation4 + $0xc8] sm:$0xff]  ;;  %v1636_v50 = vld [vmem:[#allocation4 + $0xf0] sm:$0xff] }
 0x1fa   :  { %v1569_v2 = vadd.f32 %v1537_v58, %v1240_v0  ;;  %v1665_v59 = vsub.f32 %v1069_v46, %v1240_v0  ;;  %v1858_v4 = vld [vmem:[#allocation2 + $0xc8] sm:$0xff]  ;;  %vm2082_vm10 = vcmp.gt.f32.partialorder %v2050_v55, 0.0  ;;  %v2368_v41 = vsel %vm25_vm2, %v2241_v63, 0.0  ;;  %v2643_v0 = vld [vmem:[%s4451_s0 + $0xd8] sm:$0xff] }
 0x1fb   :  { %vm1890_vm12 = vcmp.eq.f32.partialorder %v1858_v4, 0.0  ;;  %vm2114_vm7 = vmand %vm2018_vm8, %vm2082_vm10  ;;  %v2369_v54 = vadd.f32 %v2368_v41, %v2367_v22  ;;  %v1432_v44 = vpop.xlane.xlu0 %1431  ;;  %v1283_v22 = vld [vmem:[#allocation2 + $0xf0] sm:$0xff]  ;;  %vm1764_vm9 = vcmp.ge.s32.totalorder %v2643_v0, 0 }
 0x1fc   :  { %1601 = vst.msk [vmem:[#allocation3 + $0xd8] sm:$0xff] %vm25_vm2, %v1569_v2  ;;  %v1697_v32 = vadd.f32 %v1665_v59, %v1633_v16  ;;  %v2568_v49 = vsel %vm1890_vm12, 1.0, %v2673_v37  ;;  %v1472_v34 = vadd.f32 %v1432_v44, %v1280_v14  ;;  %v2600_v47 = vsel %vm2114_vm7, 1.0, %v2673_v37  ;;  %v2644_v59 = vld [vmem:[%s4451_s0 + $0xe0] sm:$0xff]  ;;  %v2645_v44 = vld [vmem:[%s4451_s0 + $0xe8] sm:$0xff] }
 0x1fd   :  { %v1072_v51 = vpop.xlane.xlu1 %1071  ;;  %v2210_v27 = vmul.f32 %v2568_v49, %v2536_v40  ;;  %v1987_v26 = vld [vmem:[#allocation3 + $0xd0] sm:$0xff]  ;;  %vm1765_vm14 = vcmp.ge.s32.totalorder %v2644_v59, 0  ;;  %vm1766_vm0 = vcmp.ge.s32.totalorder %v2645_v44, 0 }
 0x1fe   :  { %1729 = vst.msk [vmem:[#allocation4 + $0xd8] sm:$0xff] %vm25_vm2, %v1697_v32  ;;  %1505 = vst.msk [vmem:[#allocation2 + $0xd8] sm:$0xff] %vm25_vm2, %v1472_v34  ;;  %vm2019_vm6 = vcmp.gt.f32.partialorder %v1987_v26, 0.0  ;;  %v2538_v32 = vsel %vm1764_vm9, 1.0, %v2673_v37  ;;  %v2539_v34 = vsel %vm1765_vm14, 1.0, %v2673_v37 }
 0x1ff   :  { %v1859_v10 = vld [vmem:[#allocation2 + $0xd0] sm:$0xff]  ;;  %v2298_v29 = vsel %vm25_vm2, %v2210_v27, 0.0  ;;  %v2242_v45 = vmul.f32 %v2600_v47, %v2210_v27  ;;  %v1243_v43 = vpop.xlane.xlu0 %1242 }
 0x200   :  { %vm1891_vm3 = vcmp.eq.f32.partialorder %v1859_v10, 0.0  ;;  %v2299_v28 = vadd.f32 %v2298_v29, %v2297_v48  ;;  %v2051_v5 = vld [vmem:[#allocation4 + $0xd0] sm:$0xff]  ;;  %v1570_v61 = vadd.f32 %v1538_v36, %v1243_v43  ;;  %v1666_v31 = vsub.f32 %v1072_v51, %v1243_v43  ;;  %v1637_v36 = vld [vmem:[#allocation4 + $0xf8] sm:$0xff] }
 0x201   :  { %v1435_v15 = vpop.xlane.xlu1 %1434  ;;  %v2569_v1 = vsel %vm1891_vm3, 1.0, %v2673_v37  ;;  %vm2083_vm13 = vcmp.gt.f32.partialorder %v2051_v5, 0.0  ;;  %v2370_v12 = vsel %vm25_vm2, %v2242_v45, 0.0  ;;  %v2540_v43 = vsel %vm1766_vm0, 1.0, %v2673_v37  ;;  %v2646_v5 = vld [vmem:[%s4451_s0 + $0xf0] sm:$0xff] }
 0x202   :  { %v1473_v19 = vadd.f32 %v1435_v15, %v1281_v60  ;;  %v2211_v39 = vmul.f32 %v2569_v1, %v2537_v11  ;;  %vm2115_vm15 = vmand %vm2019_vm6, %vm2083_vm13  ;;  %1602 = vst.msk [vmem:[#allocation3 + $0xe0] sm:$0xff] %vm25_vm2, %v1570_v61  ;;  %v1698_v30 = vadd.f32 %v1666_v31, %v1634_v57  ;;  %v2371_v25 = vadd.f32 %v2370_v12, %v2369_v54  ;;  %v1541_v54 = vld [vmem:[#allocation3 + $0xf8] sm:$0xff] }
 0x203   :  { %v2601_v38 = vsel %vm2115_vm15, 1.0, %v2673_v37  ;;  %v1075_v3 = vpop.xlane.xlu0 %1074  ;;  %v1988_v4 = vld [vmem:[#allocation3 + $0xd8] sm:$0xff]  ;;  %vm1767_vm6 = vcmp.ge.s32.totalorder %v2646_v5, 0 }
 0x204   :  { %1506 = vst.msk [vmem:[#allocation2 + $0xe0] sm:$0xff] %vm25_vm2, %v1473_v19  ;;  %v2300_v53 = vsel %vm25_vm2, %v2211_v39, 0.0  ;;  %v2243_v42 = vmul.f32 %v2601_v38, %v2211_v39  ;;  %1730 = vst.msk [vmem:[#allocation4 + $0xe0] sm:$0xff] %vm25_vm2, %v1698_v30  ;;  %vm2020_vm10 = vcmp.gt.f32.partialorder %v1988_v4, 0.0  ;;  %v1284_v60 = vld [vmem:[#allocation2 + $0xf8] sm:$0xff] }
 0x205   :  { %v1246_v52 = vpop.xlane.xlu1 %1245  ;;  %v4368_v23 = vadd.f32 %v2300_v53, %v2299_v28  ;;  %v1860_v17 = vld [vmem:[#allocation2 + $0xd8] sm:$0xff] }
 0x206   :  { %v1571_v62 = vadd.f32 %v1539_v35, %v1246_v52  ;;  %v1667_v21 = vsub.f32 %v1075_v3, %v1246_v52  ;;  %v2372_v20 = vsel %vm25_vm2, %v2243_v42, 0.0  ;;  %v2052_v40 = vld [vmem:[#allocation4 + $0xd8] sm:$0xff]  ;;  %vm1892_vm11 = vcmp.eq.f32.partialorder %v1860_v17, 0.0 }
 0x207   :  { %v4371_v9 = vadd.f32 %v2372_v20, %v2371_v25  ;;  %v1438_v13 = vpop.xlane.xlu0 %1437  ;;  %vm2084_vm4 = vcmp.gt.f32.partialorder %v2052_v40, 0.0  ;;  %v2570_v51 = vsel %vm1892_vm11, 1.0, %v2673_v37  ;;  %v2541_v35 = vsel %vm1767_vm6, 1.0, %v2673_v37 }
 0x208   :  { %1603 = vst.msk [vmem:[#allocation3 + $0xe8] sm:$0xff] %vm25_vm2, %v1571_v62  ;;  %v1699_v56 = vadd.f32 %v1667_v21, %v1635_v18  ;;  %v1474_v58 = vadd.f32 %v1438_v13, %v1282_v8  ;;  %vm4397_vm7 = vmand %vm2020_vm10, %vm2084_vm4  ;;  %v2212_v57 = vmul.f32 %v2570_v51, %v2538_v32  ;;  %v2647_v62 = vld [vmem:[%s4451_s0 + $0xf8] sm:$0xff] }
 0x209   :  { %v1078_v33 = vpop.xlane.xlu1 %1077  ;;  %v1989_v6 = vld [vmem:[#allocation3 + $0xe0] sm:$0xff]  ;;  %v2602_v12 = vsel %vm4397_vm7, 1.0, %v2673_v37  ;;  %vm1768_vm4 = vcmp.ge.s32.totalorder %v2647_v62, 0 }
 0x20a   :  { %1731 = vst.msk [vmem:[#allocation4 + $0xe8] sm:$0xff] %vm25_vm2, %v1699_v56  ;;  %1507 = vst.msk [vmem:[#allocation2 + $0xe8] sm:$0xff] %vm25_vm2, %v1474_v58  ;;  %vm2021_vm12 = vcmp.gt.f32.partialorder %v1989_v6, 0.0  ;;  %v2244_v3 = vmul.f32 %v2602_v12, %v2212_v57  ;;  %v2302_v53 = vsel %vm25_vm2, %v2212_v57, 0.0  ;;  %v2542_v17 = vsel %vm1768_vm4, 1.0, %v2673_v37 }
 0x20b   :  { %v1249_v46 = vpop.xlane.xlu0 %1248  ;;  %v1861_v63 = vld [vmem:[#allocation2 + $0xe0] sm:$0xff] }
 0x20c   :  { %v1572_v48 = vadd.f32 %v1540_v7, %v1249_v46  ;;  %v1668_v55 = vsub.f32 %v1078_v33, %v1249_v46  ;;  %v2053_v2 = vld [vmem:[#allocation4 + $0xe0] sm:$0xff]  ;;  %vm1893_vm1 = vcmp.eq.f32.partialorder %v1861_v63, 0.0  ;;  %v2374_v58 = vsel %vm25_vm2, %v2244_v3, 0.0 }
 0x20d   :  { %v1441_v16 = vpop.xlane.xlu1 %1440  ;;  %vm2085_vm8 = vcmp.gt.f32.partialorder %v2053_v2, 0.0  ;;  %v2571_v29 = vsel %vm1893_vm1, 1.0, %v2673_v37  ;;  %v2303_v7 = vadd.f32 %v2302_v53, %v4368_v23 }
 0x20e   :  { %v1475_v14 = vadd.f32 %v1441_v16, %v1283_v22  ;;  %1604 = vst.msk [vmem:[#allocation3 + $0xf0] sm:$0xff] %vm25_vm2, %v1572_v48  ;;  %v1700_v41 = vadd.f32 %v1668_v55, %v1636_v50  ;;  %vm2117_vm3 = vmand %vm2021_vm12, %vm2085_vm8  ;;  %v2213_v19 = vmul.f32 %v2571_v29, %v2539_v34  ;;  %v2375_v16 = vadd.f32 %v2374_v58, %v4371_v9 }
 0x20f   :  { %v1081_v49 = vpop.xlane.xlu0 %1080  ;;  %v1990_v28 = vld [vmem:[#allocation3 + $0xe8] sm:$0xff]  ;;  %v2603_v30 = vsel %vm2117_vm3, 1.0, %v2673_v37 }
 0x210   :  { %1508 = vst.msk [vmem:[#allocation2 + $0xf0] sm:$0xff] %vm25_vm2, %v1475_v14  ;;  %1732 = vst.msk [vmem:[#allocation4 + $0xf0] sm:$0xff] %vm25_vm2, %v1700_v41  ;;  %vm2022_vm15 = vcmp.gt.f32.partialorder %v1990_v28, 0.0  ;;  %v2245_v18 = vmul.f32 %v2603_v30, %v2213_v19  ;;  %v2304_v20 = vsel %vm25_vm2, %v2213_v19, 0.0 }
 0x211   :  { %v1252_v27 = vpop.xlane.xlu1 %1251  ;;  %v2054_v26 = vld [vmem:[#allocation4 + $0xe8] sm:$0xff]  ;;  %v2305_v0 = vadd.f32 %v2304_v20, %v2303_v7 }
 0x212   :  { %v1573_v47 = vadd.f32 %v1541_v54, %v1252_v27  ;;  %v1669_v11 = vsub.f32 %v1081_v49, %v1252_v27  ;;  %v1862_v10 = vld [vmem:[#allocation2 + $0xe8] sm:$0xff]  ;;  %vm2086_vm13 = vcmp.gt.f32.partialorder %v2054_v26, 0.0  ;;  %v2376_v63 = vsel %vm25_vm2, %v2245_v18, 0.0 }
 0x213   :  { %vm1894_vm5 = vcmp.eq.f32.partialorder %v1862_v10, 0.0  ;;  %v1444_v61 = vpop.xlane.xlu0 %1443  ;;  %vm2118_vm9 = vmand %vm2022_vm15, %vm2086_vm13  ;;  %v2377_v59 = vadd.f32 %v2376_v63, %v2375_v16 }
 0x214   :  { %1605 = vst.msk [vmem:[#allocation3 + $0xf8] sm:$0xff] %vm25_vm2, %v1573_v47  ;;  %v1701_v15 = vadd.f32 %v1669_v11, %v1637_v36  ;;  %v2572_v31 = vsel %vm1894_vm5, 1.0, %v2673_v37  ;;  %v1476_v1 = vadd.f32 %v1444_v61, %v1284_v60  ;;  %v2604_v8 = vsel %vm2118_vm9, 1.0, %v2673_v37 }
 0x215   :  { %v1991_v39 = vld [vmem:[#allocation3 + $0xf0] sm:$0xff]  ;;  %v2214_v25 = vmul.f32 %v2572_v31, %v2540_v43  ;;  %vm2393_vm5 = vcmp.eq.s32.totalorder %v2939_v24, 0 }
 0x216   :  { %1733 = vst.msk [vmem:[#allocation4 + $0xf8] sm:$0xff] %vm25_vm2, %v1701_v15  ;;  %1509 = vst.msk [vmem:[#allocation2 + $0xf8] sm:$0xff] %vm25_vm2, %v1476_v1  ;;  %vm2023_vm14 = vcmp.gt.f32.partialorder %v1991_v39, 0.0 }
 0x217   :  { %v1863_v38 = vld [vmem:[#allocation2 + $0xf0] sm:$0xff]  ;;  %v2246_v33 = vmul.f32 %v2604_v8, %v2214_v25  ;;  %v2306_v22 = vsel %vm25_vm2, %v2214_v25, 0.0 }
 0x218   :  { %vm1895_vm11 = vcmp.eq.f32.partialorder %v1863_v38, 0.0  ;;  %v2055_v42 = vld [vmem:[#allocation4 + $0xf0] sm:$0xff]  ;;  %v2307_v2 = vadd.f32 %v2306_v22, %v2305_v0 }
 0x219   :  { %v2573_v52 = vsel %vm1895_vm11, 1.0, %v2673_v37  ;;  %vm2087_vm1 = vcmp.gt.f32.partialorder %v2055_v42, 0.0  ;;  %v2378_v23 = vsel %vm25_vm2, %v2246_v33, 0.0 }
 0x21a   :  { %v2215_v21 = vmul.f32 %v2573_v52, %v2541_v35  ;;  %vm2119_vm0 = vmand %vm2023_vm14, %vm2087_vm1  ;;  %v2379_v6 = vadd.f32 %v2378_v23, %v2377_v59 }
 0x21b   :  { %v1992_v56 = vld [vmem:[#allocation3 + $0xf8] sm:$0xff]  ;;  %v2605_v13 = vsel %vm2119_vm0, 1.0, %v2673_v37 }
 0x21c   :  { %v2247_v50 = vmul.f32 %v2605_v13, %v2215_v21  ;;  %vm2024_vm8 = vcmp.gt.f32.partialorder %v1992_v56, 0.0  ;;  %v2308_v48 = vsel %vm25_vm2, %v2215_v21, 0.0 }
 0x21d   :  { %v2056_v46 = vld [vmem:[#allocation4 + $0xf8] sm:$0xff]  ;;  %v2309_v41 = vadd.f32 %v2308_v48, %v2307_v2 }
 0x21e   :  { %v1864_v40 = vld [vmem:[#allocation2 + $0xf8] sm:$0xff]  ;;  %vm2088_vm10 = vcmp.gt.f32.partialorder %v2056_v46, 0.0  ;;  %v2380_v4 = vsel %vm25_vm2, %v2247_v50, 0.0 }
 0x21f   :  { %vm1896_vm12 = vcmp.eq.f32.partialorder %v1864_v40, 0.0  ;;  %vm2120_vm7 = vmand %vm2024_vm8, %vm2088_vm10  ;;  %v2381_v49 = vadd.f32 %v2380_v4, %v2379_v6 }
 0x220   :  { %v2574_v55 = vsel %vm1896_vm12, 1.0, %v2673_v37  ;;  %v2606_v54 = vsel %vm2120_vm7, 1.0, %v2673_v37 }
 0x221   :  { %v2216_v14 = vmul.f32 %v2574_v55, %v2542_v17 }
 0x223   :  { %v2310_v32 = vsel %vm25_vm2, %v2216_v14, 0.0  ;;  %v2248_v9 = vmul.f32 %v2606_v54, %v2216_v14 }
 0x224   :  { %v2311_v44 = vadd.f32 %v2310_v32, %v2309_v41 }
 0x225   :  { %v2382_v51 = vsel %vm25_vm2, %v2248_v9, 0.0  ;;  %vm2394_vm2 = vcmp.eq.s32.totalorder %v2939_v24, 1 }
 0x226   :  { %2312 = vadd.xlane.f32.xlu1 %v2311_v44  ;;  %v2383_v34 = vadd.f32 %v2382_v51, %v2381_v49 }
 0x228   :  { %2384 = vadd.xlane.f32.xlu0 %v2383_v34 }
 0x2b3   :  { %v2313_v27 = vpop.xlane.xlu1 %2312 }
 0x2b4   :  { %v2314_v36 = vrot.slane %v2313_v27, 4 }
 0x2b5   :  { %v2385_v26 = vpop.xlane.xlu0 %2384 }
 0x2b6   :  { %v2315_v47 = vadd.f32 %v2314_v36, %v2313_v27  ;;  %v2386_v11 = vrot.slane %v2385_v26, 4 }
 0x2b8   :  { %v2316_v60 = vrot.slane %v2315_v47, 2  ;;  %v2387_v10 = vadd.f32 %v2386_v11, %v2385_v26 }
 0x2ba   :  { %v2388_v29 = vrot.slane %v2387_v10, 2  ;;  %v2317_v37 = vadd.f32 %v2316_v60, %v2315_v47 }
 0x2bc   :  { %v2389_v45 = vadd.f32 %v2388_v29, %v2387_v10  ;;  %v2318_v43 = vrot.slane %v2317_v37, 1 }
 0x2be   :  { %v2319_v57 = vadd.f32 %v2318_v43, %v2317_v37  ;;  %v2390_v28 = vrot.slane %v2389_v45, 1 }
 0x2c0   :  { %2607 = vpush %v2319_v57  ;;  %v2391_v5 = vadd.f32 %v2390_v28, %v2389_v45 }
 0x2c2   :  { %2609 = vpush %v2391_v5 }
 0x2f1   :  { %s2608_s0 = spop %2607 }
 0x2f2   :  { %v2395_v15 = vstv %s2608_s0 }
 0x2f3   :  { %v2396_v61 = vsel %vm2394_vm2, %v2395_v15, 0.0  ;;  %s2610_s6 = spop %2609 }
 0x2f4   :  { %v2397_v31 = vstv %s2610_s6 }
 0x2f5   :  { %v2398_v1 = vsel %vm2393_vm5, %v2397_v31, %v2396_v61 }
 0x2f6   :  { %2399 = vst [vmem:[#allocation5] sm:$0xff] %v2398_v1 }
 0x2f7   :  { %2659 = shalt.err (!%p2656_p4)
}
 0x2f8   :  { %s2660_s10 = scalar_lea.hbm %s4456_s5, 128 }
 0x2f9   :  { %p2661_p5 = scmp.ne.s32.totalorder %s4456_s5, %s2660_s10  ;;  %p2664_p6 = scmp.lt.u32.totalorder %s2660_s10, %s4456_s5 }
 0x2fb   :  { %p2666_p7 = pnand %p2664_p6, %p2661_p5 }
 0x2fd   :  { %2669 = shalt.err (!%p2666_p7)
}
 0x2fe   :  { %2409 = dma.vmem_to_hbm [thread:$0]  %s2407_s30, 128, %s4456_s5, [#allocation6]  }
 0x2ff   :  { %2670 = dma.done.wait [#allocation6], 128  }
 0x300   :  { %2671 = vsyncadd [#allocation6], 4294967168 }
 0x301   :  { %2413 = vsyncpa [#allocation6], 1 }

</bundles_post_ra>
